<compile_context>
chip_gen: v7x
topology: tpu7x:2x2x1
jax: 0.10.0
libtpu: 0.0.40
codegen_flags: <defaults>
</compile_context>

<pallas_src>
import jax
import jax.numpy as jnp
from jax.experimental import pallas as pl
from jax.experimental.pallas import tpu as pltpu

EMB = 128
IN2D = 2
UVF_DIM = IN2D + EMB          # 130
HID = 256
OUT_DIM = 6
OUT_PAD = 128                 # 6 padded up to a lane-dense 128-wide output slab
ROW_TILE = 256                # MXU-filling row tile (multiple of 128)


def local_warp_kernel(emb_ref, uv_ref,
                      we_ref, w1_ref, w2_ref, w3_ref, w4a_ref, w5_ref, w6_ref,
                      wuv_ref, bias_ref,
                      out_ref):
    emb = emb_ref[...]                      # (R, 128) bf16
    uv = uv_ref[...]                        # (R, 2)   f32
    wuv = wuv_ref[...]                      # (8, 512) f32 (rows 0..1 used)
    bias = bias_ref[...]                    # (8, 256) f32 (rows 0..6 used)

    u = uv[:, 0:1]                          # (R, 1)
    v = uv[:, 1:2]                          # (R, 1)

    def mm(x, w_ref):
        return jnp.dot(x, w_ref[...], preferred_element_type=jnp.float32)

    def relu_bf16(x):
        return jnp.maximum(x, 0.0).astype(jnp.bfloat16)

    # Embedding contributions for layer 0 and the layer-4 skip term: ONE fused
    # (R,128)@(128,512) MXU matmul; split by lane-aligned 256-wide slices.
    emb_both = mm(emb, we_ref)                                       # (R, 512) f32
    # uv (2-wide) contributions: cheap VPU broadcast FMAs instead of a 2-deep
    # (or padded) MXU contraction.
    uv_both = u * wuv[0:1, :] + v * wuv[1:2, :]                      # (R, 512) f32

    h = relu_bf16(emb_both[:, :HID] + uv_both[:, :HID] + bias[0:1, :])   # layer 0
    h = relu_bf16(mm(h, w1_ref) + bias[1:2, :])                          # layer 1
    h = relu_bf16(mm(h, w2_ref) + bias[2:3, :])                          # layer 2
    h = relu_bf16(mm(h, w3_ref) + bias[3:4, :])                          # layer 3
    # layer 4 (skip): Linear(cat([feat, uvf])) == feat@W4a + emb-part + uv-FMA + b4
    h = relu_bf16(mm(h, w4a_ref) + emb_both[:, HID:] + uv_both[:, HID:] + bias[4:5, :])
    h = relu_bf16(mm(h, w5_ref) + bias[5:6, :])                          # layer 5
    out_ref[...] = mm(h, w6_ref) + bias[6:7, :OUT_PAD]                   # layer 6 (no relu)


def init_params(key):
    """Deterministic synthetic parameters, PyTorch Linear shapes transposed to (in, out)."""
    dims = [
        (UVF_DIM, HID),        # layer 0
        (HID, HID),            # 1
        (HID, HID),            # 2
        (HID, HID),            # 3
        (HID + UVF_DIM, HID),  # 4 (skip concat)
        (HID, HID),            # 5
        (HID, OUT_DIM),        # 6
    ]
    ws, bs = [], []
    for k_in, k_out in dims:
        kw, kb, key = jax.random.split(key, 3)
        bound = 1.0 / jnp.sqrt(jnp.float32(k_in))
        ws.append(jax.random.uniform(kw, (k_in, k_out), jnp.float32, -bound, bound))
        bs.append(jax.random.uniform(kb, (k_out,), jnp.float32, -bound, bound))
    return ws, bs


def local_warp_pallas(uvf, ws, bs):
    n = uvf.shape[0]
    n_pad = ((n + ROW_TILE - 1) // ROW_TILE) * ROW_TILE

    # Split the 130-dim input into (uv, emb) and pad rows up to the tile multiple.
    # TODO(synk): for production batch sizes, fuse this pad/split into the input
    # producer instead of materializing padded copies in HBM.
    emb_p = jnp.zeros((n_pad, EMB), jnp.bfloat16).at[:n].set(
        uvf[:, IN2D:].astype(jnp.bfloat16))
    uv_p = jnp.zeros((n_pad, IN2D), jnp.float32).at[:n].set(uvf[:, :IN2D])

    # Weights stored (in, out); MXU operands cast to bf16.
    bf16 = lambda x: x.astype(jnp.bfloat16)
    # Fused embedding weight: [emb rows of layer 0 | emb rows of layer 4] -> (128, 512).
    w_emb = bf16(jnp.concatenate([ws[0][IN2D:], ws[4][HID + IN2D:]], axis=1))
    w1, w2, w3, w5 = (bf16(ws[1]), bf16(ws[2]), bf16(ws[3]), bf16(ws[5]))
    w4a = bf16(ws[4][:HID])                            # (256, 256) feat rows of layer 4
    w6 = bf16(jnp.zeros((HID, OUT_PAD), jnp.float32).at[:, :OUT_DIM].set(ws[6]))

    # uv weight rows for layers 0 and 4, packed side-by-side (kept f32, VPU FMA path).
    wuv = jnp.zeros((8, 2 * HID), jnp.float32)
    wuv = wuv.at[0, :HID].set(ws[0][0]).at[1, :HID].set(ws[0][1])
    wuv = wuv.at[0, HID:].set(ws[4][HID + 0]).at[1, HID:].set(ws[4][HID + 1])

    # All biases packed into one (8, 256) f32 slab; row 6 holds the 6-dim b6.
    b6_pad = jnp.zeros((HID,), jnp.float32).at[:OUT_DIM].set(bs[6])
    bias = jnp.stack(list(bs[:6]) + [b6_pad, jnp.zeros((HID,), jnp.float32)], axis=0)

    row = lambda d: pl.BlockSpec((ROW_TILE, d), lambda i: (i, 0))
    full = lambda shape: pl.BlockSpec(shape, lambda i: (0, 0))

    out_p = pl.pallas_call(
        local_warp_kernel,
        out_shape=jax.ShapeDtypeStruct((n_pad, OUT_PAD), jnp.float32),
        grid_spec=pltpu.PrefetchScalarGridSpec(
            num_scalar_prefetch=0,
            grid=(n_pad // ROW_TILE,),
            in_specs=[
                row(EMB),                     # emb (bf16), row-tiled
                row(IN2D),                    # uv  (f32),  row-tiled
                full((EMB, 2 * HID)),         # w_emb (layer0 | layer4 emb rows)
                full((HID, HID)),             # w1
                full((HID, HID)),             # w2
                full((HID, HID)),             # w3
                full((HID, HID)),             # w4a
                full((HID, HID)),             # w5
                full((HID, OUT_PAD)),         # w6
                full((8, 2 * HID)),           # wuv rows (f32)
                full((8, HID)),               # biases (f32)
            ],
            out_specs=pl.BlockSpec((ROW_TILE, OUT_PAD), lambda i: (i, 0)),
        ),
        compiler_params=pltpu.CompilerParams(
            dimension_semantics=("parallel",)),
    )(emb_p, uv_p, w_emb, w1, w2, w3, w4a, w5, w6, wuv, bias)

    return out_p[:n, :OUT_DIM]


def local_warp_ref(uvf, ws, bs, low_precision=False):
    """Pure-JAX reference of the PyTorch forward.

    low_precision=False : exact f32 module semantics.
    low_precision=True  : mimics the kernel's bf16-operand / f32-accumulate numerics.
    """
    cast = (lambda x: x.astype(jnp.bfloat16)) if low_precision else (lambda x: x)
    feat = cast(uvf)
    uvf_c = feat
    n_layers = len(ws)
    for li in range(n_layers):
        x = jnp.concatenate([feat, uvf_c], axis=-1) if li == 4 else feat
        y = jnp.dot(x, cast(ws[li]), preferred_element_type=jnp.float32) + bs[li]
        feat = cast(jnp.maximum(y, 0.0)) if li != n_layers - 1 else y
    return feat


if __name__ == "__main__":
    key = jax.random.PRNGKey(0)
    k_in, k_params = jax.random.split(key)

    N = 300  # exercises row padding and a 2-step parallel grid (2 TCs on v7x)
    uvf = jax.random.normal(k_in, (N, UVF_DIM), jnp.float32)

    ws, bs = init_params(k_params)

    warp = jax.block_until_ready(local_warp_pallas(uvf, ws, bs))
    assert warp.shape == (N, OUT_DIM)

    # Structural check vs. a reference with matching bf16 numerics (tight)...
    ref_bf16 = local_warp_ref(uvf, ws, bs, low_precision=True)
    assert jnp.allclose(warp, ref_bf16, atol=2e-2, rtol=2e-2), "mismatch vs. bf16 reference"

    # ...and a semantic check vs. the exact f32 module forward (bf16-relaxed tol).
    ref_f32 = local_warp_ref(uvf, ws, bs, low_precision=False)
    assert jnp.allclose(warp, ref_f32, atol=5e-2, rtol=5e-2), "mismatch vs. f32 reference"

    print("KERNEL_OK")
</pallas_src>

<mosaic_0001>
module attributes {stable_mosaic.version = 11 : i64} {
  func.func @local_warp_kernel(%arg0: i32, %arg1: memref<256x128xbf16, #tpu.memory_space<vmem>>, %arg2: memref<256x2xf32, #tpu.memory_space<vmem>>, %arg3: memref<128x512xbf16, #tpu.memory_space<vmem>>, %arg4: memref<256x256xbf16, #tpu.memory_space<vmem>>, %arg5: memref<256x256xbf16, #tpu.memory_space<vmem>>, %arg6: memref<256x256xbf16, #tpu.memory_space<vmem>>, %arg7: memref<256x256xbf16, #tpu.memory_space<vmem>>, %arg8: memref<256x256xbf16, #tpu.memory_space<vmem>>, %arg9: memref<256x128xbf16, #tpu.memory_space<vmem>>, %arg10: memref<8x512xf32, #tpu.memory_space<vmem>>, %arg11: memref<8x256xf32, #tpu.memory_space<vmem>>, %arg12: memref<256x128xf32, #tpu.memory_space<vmem>>) attributes {dimension_semantics = [#tpu.dimension_semantics<parallel>], iteration_bounds = array<i64: 2>, scalar_prefetch = 0 : i64, scratch_operands = 0 : i64, tpu.core_type = #tpu.core_type<tc>, window_params = [{transform_indices = @transform_0, window_bounds = array<i64: 256, 128>}, {transform_indices = @transform_1, window_bounds = array<i64: 256, 2>}, {pipeline_mode = #tpu.pipeline_mode<synchronous>, transform_indices = @transform_2, window_bounds = array<i64: 128, 512>}, {pipeline_mode = #tpu.pipeline_mode<synchronous>, transform_indices = @transform_3, window_bounds = array<i64: 256, 256>}, {pipeline_mode = #tpu.pipeline_mode<synchronous>, transform_indices = @transform_4, window_bounds = array<i64: 256, 256>}, {pipeline_mode = #tpu.pipeline_mode<synchronous>, transform_indices = @transform_5, window_bounds = array<i64: 256, 256>}, {pipeline_mode = #tpu.pipeline_mode<synchronous>, transform_indices = @transform_6, window_bounds = array<i64: 256, 256>}, {pipeline_mode = #tpu.pipeline_mode<synchronous>, transform_indices = @transform_7, window_bounds = array<i64: 256, 256>}, {pipeline_mode = #tpu.pipeline_mode<synchronous>, transform_indices = @transform_8, window_bounds = array<i64: 256, 128>}, {pipeline_mode = #tpu.pipeline_mode<synchronous>, transform_indices = @transform_9, window_bounds = array<i64: 8, 512>}, {pipeline_mode = #tpu.pipeline_mode<synchronous>, transform_indices = @transform_10, window_bounds = array<i64: 8, 256>}, {transform_indices = @transform_11, window_bounds = array<i64: 256, 128>}]} {
    %c0 = arith.constant 0 : index
    %c0_0 = arith.constant 0 : index
    %0 = vector.load %arg1[%c0, %c0_0] : memref<256x128xbf16, #tpu.memory_space<vmem>>, vector<256x128xbf16>
    %c0_1 = arith.constant 0 : index
    %c0_2 = arith.constant 0 : index
    %1 = vector.load %arg2[%c0_1, %c0_2] : memref<256x2xf32, #tpu.memory_space<vmem>>, vector<256x2xf32>
    %c0_3 = arith.constant 0 : index
    %c0_4 = arith.constant 0 : index
    %2 = vector.load %arg10[%c0_3, %c0_4] : memref<8x512xf32, #tpu.memory_space<vmem>>, vector<8x512xf32>
    %c0_5 = arith.constant 0 : index
    %c0_6 = arith.constant 0 : index
    %3 = vector.load %arg11[%c0_5, %c0_6] : memref<8x256xf32, #tpu.memory_space<vmem>>, vector<8x256xf32>
    %4 = vector.extract_strided_slice %1 {offsets = [0, 0], sizes = [256, 1], strides = [1, 1]} : vector<256x2xf32> to vector<256x1xf32>
    %5 = vector.extract_strided_slice %1 {offsets = [0, 1], sizes = [256, 1], strides = [1, 1]} : vector<256x2xf32> to vector<256x1xf32>
    %c0_7 = arith.constant 0 : index
    %c0_8 = arith.constant 0 : index
    %6 = vector.load %arg3[%c0_7, %c0_8] : memref<128x512xbf16, #tpu.memory_space<vmem>>, vector<128x512xbf16>
    %cst = arith.constant dense<0.000000e+00> : vector<256x512xf32>
    %7 = tpu.matmul %0, %6, %cst {dimension_numbers = #tpu.dot_dimension_numbers<[1], [0], [0], [1], [0, 0, 1, 1], [], []>} : vector<256x128xbf16>, vector<128x512xbf16>, vector<256x512xf32> -> vector<256x512xf32>
    %8 = vector.extract_strided_slice %2 {offsets = [0, 0], sizes = [1, 512], strides = [1, 1]} : vector<8x512xf32> to vector<1x512xf32>
    %9 = vector.broadcast %4 : vector<256x1xf32> to vector<256x512xf32>
    %10 = vector.broadcast %8 : vector<1x512xf32> to vector<256x512xf32>
    %11 = arith.mulf %9, %10 : vector<256x512xf32>
    %12 = vector.extract_strided_slice %2 {offsets = [1, 0], sizes = [1, 512], strides = [1, 1]} : vector<8x512xf32> to vector<1x512xf32>
    %13 = vector.broadcast %5 : vector<256x1xf32> to vector<256x512xf32>
    %14 = vector.broadcast %12 : vector<1x512xf32> to vector<256x512xf32>
    %15 = arith.mulf %13, %14 : vector<256x512xf32>
    %16 = arith.addf %11, %15 : vector<256x512xf32>
    %17 = vector.extract_strided_slice %7 {offsets = [0, 0], sizes = [256, 256], strides = [1, 1]} : vector<256x512xf32> to vector<256x256xf32>
    %18 = vector.extract_strided_slice %16 {offsets = [0, 0], sizes = [256, 256], strides = [1, 1]} : vector<256x512xf32> to vector<256x256xf32>
    %19 = arith.addf %17, %18 : vector<256x256xf32>
    %20 = vector.extract_strided_slice %3 {offsets = [0, 0], sizes = [1, 256], strides = [1, 1]} : vector<8x256xf32> to vector<1x256xf32>
    %21 = vector.broadcast %20 : vector<1x256xf32> to vector<256x256xf32>
    %22 = arith.addf %19, %21 : vector<256x256xf32>
    %cst_9 = arith.constant 0.000000e+00 : f32
    %23 = vector.broadcast %cst_9 : f32 to vector<256x256xf32>
    %24 = arith.maximumf %22, %23 : vector<256x256xf32>
    %25 = arith.truncf %24 : vector<256x256xf32> to vector<256x256xbf16>
    %c0_10 = arith.constant 0 : index
    %c0_11 = arith.constant 0 : index
    %26 = vector.load %arg4[%c0_10, %c0_11] : memref<256x256xbf16, #tpu.memory_space<vmem>>, vector<256x256xbf16>
    %cst_12 = arith.constant dense<0.000000e+00> : vector<256x256xf32>
    %27 = tpu.matmul %25, %26, %cst_12 {dimension_numbers = #tpu.dot_dimension_numbers<[1], [0], [0], [1], [0, 0, 1, 1], [], []>} : vector<256x256xbf16>, vector<256x256xbf16>, vector<256x256xf32> -> vector<256x256xf32>
    %28 = vector.extract_strided_slice %3 {offsets = [1, 0], sizes = [1, 256], strides = [1, 1]} : vector<8x256xf32> to vector<1x256xf32>
    %29 = vector.broadcast %28 : vector<1x256xf32> to vector<256x256xf32>
    %30 = arith.addf %27, %29 : vector<256x256xf32>
    %cst_13 = arith.constant 0.000000e+00 : f32
    %31 = vector.broadcast %cst_13 : f32 to vector<256x256xf32>
    %32 = arith.maximumf %30, %31 : vector<256x256xf32>
    %33 = arith.truncf %32 : vector<256x256xf32> to vector<256x256xbf16>
    %c0_14 = arith.constant 0 : index
    %c0_15 = arith.constant 0 : index
    %34 = vector.load %arg5[%c0_14, %c0_15] : memref<256x256xbf16, #tpu.memory_space<vmem>>, vector<256x256xbf16>
    %cst_16 = arith.constant dense<0.000000e+00> : vector<256x256xf32>
    %35 = tpu.matmul %33, %34, %cst_16 {dimension_numbers = #tpu.dot_dimension_numbers<[1], [0], [0], [1], [0, 0, 1, 1], [], []>} : vector<256x256xbf16>, vector<256x256xbf16>, vector<256x256xf32> -> vector<256x256xf32>
    %36 = vector.extract_strided_slice %3 {offsets = [2, 0], sizes = [1, 256], strides = [1, 1]} : vector<8x256xf32> to vector<1x256xf32>
    %37 = vector.broadcast %36 : vector<1x256xf32> to vector<256x256xf32>
    %38 = arith.addf %35, %37 : vector<256x256xf32>
    %cst_17 = arith.constant 0.000000e+00 : f32
    %39 = vector.broadcast %cst_17 : f32 to vector<256x256xf32>
    %40 = arith.maximumf %38, %39 : vector<256x256xf32>
    %41 = arith.truncf %40 : vector<256x256xf32> to vector<256x256xbf16>
    %c0_18 = arith.constant 0 : index
    %c0_19 = arith.constant 0 : index
    %42 = vector.load %arg6[%c0_18, %c0_19] : memref<256x256xbf16, #tpu.memory_space<vmem>>, vector<256x256xbf16>
    %cst_20 = arith.constant dense<0.000000e+00> : vector<256x256xf32>
    %43 = tpu.matmul %41, %42, %cst_20 {dimension_numbers = #tpu.dot_dimension_numbers<[1], [0], [0], [1], [0, 0, 1, 1], [], []>} : vector<256x256xbf16>, vector<256x256xbf16>, vector<256x256xf32> -> vector<256x256xf32>
    %44 = vector.extract_strided_slice %3 {offsets = [3, 0], sizes = [1, 256], strides = [1, 1]} : vector<8x256xf32> to vector<1x256xf32>
    %45 = vector.broadcast %44 : vector<1x256xf32> to vector<256x256xf32>
    %46 = arith.addf %43, %45 : vector<256x256xf32>
    %cst_21 = arith.constant 0.000000e+00 : f32
    %47 = vector.broadcast %cst_21 : f32 to vector<256x256xf32>
    %48 = arith.maximumf %46, %47 : vector<256x256xf32>
    %49 = arith.truncf %48 : vector<256x256xf32> to vector<256x256xbf16>
    %c0_22 = arith.constant 0 : index
    %c0_23 = arith.constant 0 : index
    %50 = vector.load %arg7[%c0_22, %c0_23] : memref<256x256xbf16, #tpu.memory_space<vmem>>, vector<256x256xbf16>
    %cst_24 = arith.constant dense<0.000000e+00> : vector<256x256xf32>
    %51 = tpu.matmul %49, %50, %cst_24 {dimension_numbers = #tpu.dot_dimension_numbers<[1], [0], [0], [1], [0, 0, 1, 1], [], []>} : vector<256x256xbf16>, vector<256x256xbf16>, vector<256x256xf32> -> vector<256x256xf32>
    %52 = vector.extract_strided_slice %7 {offsets = [0, 256], sizes = [256, 256], strides = [1, 1]} : vector<256x512xf32> to vector<256x256xf32>
    %53 = arith.addf %51, %52 : vector<256x256xf32>
    %54 = vector.extract_strided_slice %16 {offsets = [0, 256], sizes = [256, 256], strides = [1, 1]} : vector<256x512xf32> to vector<256x256xf32>
    %55 = arith.addf %53, %54 : vector<256x256xf32>
    %56 = vector.extract_strided_slice %3 {offsets = [4, 0], sizes = [1, 256], strides = [1, 1]} : vector<8x256xf32> to vector<1x256xf32>
    %57 = vector.broadcast %56 : vector<1x256xf32> to vector<256x256xf32>
    %58 = arith.addf %55, %57 : vector<256x256xf32>
    %cst_25 = arith.constant 0.000000e+00 : f32
    %59 = vector.broadcast %cst_25 : f32 to vector<256x256xf32>
    %60 = arith.maximumf %58, %59 : vector<256x256xf32>
    %61 = arith.truncf %60 : vector<256x256xf32> to vector<256x256xbf16>
    %c0_26 = arith.constant 0 : index
    %c0_27 = arith.constant 0 : index
    %62 = vector.load %arg8[%c0_26, %c0_27] : memref<256x256xbf16, #tpu.memory_space<vmem>>, vector<256x256xbf16>
    %cst_28 = arith.constant dense<0.000000e+00> : vector<256x256xf32>
    %63 = tpu.matmul %61, %62, %cst_28 {dimension_numbers = #tpu.dot_dimension_numbers<[1], [0], [0], [1], [0, 0, 1, 1], [], []>} : vector<256x256xbf16>, vector<256x256xbf16>, vector<256x256xf32> -> vector<256x256xf32>
    %64 = vector.extract_strided_slice %3 {offsets = [5, 0], sizes = [1, 256], strides = [1, 1]} : vector<8x256xf32> to vector<1x256xf32>
    %65 = vector.broadcast %64 : vector<1x256xf32> to vector<256x256xf32>
    %66 = arith.addf %63, %65 : vector<256x256xf32>
    %cst_29 = arith.constant 0.000000e+00 : f32
    %67 = vector.broadcast %cst_29 : f32 to vector<256x256xf32>
    %68 = arith.maximumf %66, %67 : vector<256x256xf32>
    %69 = arith.truncf %68 : vector<256x256xf32> to vector<256x256xbf16>
    %c0_30 = arith.constant 0 : index
    %c0_31 = arith.constant 0 : index
    %70 = vector.load %arg9[%c0_30, %c0_31] : memref<256x128xbf16, #tpu.memory_space<vmem>>, vector<256x128xbf16>
    %cst_32 = arith.constant dense<0.000000e+00> : vector<256x128xf32>
    %71 = tpu.matmul %69, %70, %cst_32 {dimension_numbers = #tpu.dot_dimension_numbers<[1], [0], [0], [1], [0, 0, 1, 1], [], []>} : vector<256x256xbf16>, vector<256x128xbf16>, vector<256x128xf32> -> vector<256x128xf32>
    %72 = vector.extract_strided_slice %3 {offsets = [6, 0], sizes = [1, 128], strides = [1, 1]} : vector<8x256xf32> to vector<1x128xf32>
    %73 = vector.broadcast %72 : vector<1x128xf32> to vector<256x128xf32>
    %74 = arith.addf %71, %73 : vector<256x128xf32>
    %c0_33 = arith.constant 0 : index
    %c0_34 = arith.constant 0 : index
    %75 = vector.load %arg12[%c0_33, %c0_34] : memref<256x128xf32, #tpu.memory_space<vmem>>, vector<256x128xf32>
    tpu.vector_store %arg12[%c0_33, %c0_34], %74 {strides = array<i32>} : memref<256x128xf32, #tpu.memory_space<vmem>>, vector<256x128xf32>,
    return
  }
  func.func @transform_0(%arg0: i32) -> (i32, i32) {
    %c0_i32 = arith.constant 0 : i32
    %c0_i32_0 = arith.constant 0 : i32
    return %arg0, %c0_i32 : i32, i32
  }
  func.func @transform_1(%arg0: i32) -> (i32, i32) {
    %c0_i32 = arith.constant 0 : i32
    %c0_i32_0 = arith.constant 0 : i32
    return %arg0, %c0_i32 : i32, i32
  }
  func.func @transform_2(%arg0: i32) -> (i32, i32) {
    %c0_i32 = arith.constant 0 : i32
    %c0_i32_0 = arith.constant 0 : i32
    %c0_i32_1 = arith.constant 0 : i32
    return %c0_i32, %c0_i32_0 : i32, i32
  }
  func.func @transform_3(%arg0: i32) -> (i32, i32) {
    %c0_i32 = arith.constant 0 : i32
    %c0_i32_0 = arith.constant 0 : i32
    %c0_i32_1 = arith.constant 0 : i32
    return %c0_i32, %c0_i32_0 : i32, i32
  }
  func.func @transform_4(%arg0: i32) -> (i32, i32) {
    %c0_i32 = arith.constant 0 : i32
    %c0_i32_0 = arith.constant 0 : i32
    %c0_i32_1 = arith.constant 0 : i32
    return %c0_i32, %c0_i32_0 : i32, i32
  }
  func.func @transform_5(%arg0: i32) -> (i32, i32) {
    %c0_i32 = arith.constant 0 : i32
    %c0_i32_0 = arith.constant 0 : i32
    %c0_i32_1 = arith.constant 0 : i32
    return %c0_i32, %c0_i32_0 : i32, i32
  }
  func.func @transform_6(%arg0: i32) -> (i32, i32) {
    %c0_i32 = arith.constant 0 : i32
    %c0_i32_0 = arith.constant 0 : i32
    %c0_i32_1 = arith.constant 0 : i32
    return %c0_i32, %c0_i32_0 : i32, i32
  }
  func.func @transform_7(%arg0: i32) -> (i32, i32) {
    %c0_i32 = arith.constant 0 : i32
    %c0_i32_0 = arith.constant 0 : i32
    %c0_i32_1 = arith.constant 0 : i32
    return %c0_i32, %c0_i32_0 : i32, i32
  }
  func.func @transform_8(%arg0: i32) -> (i32, i32) {
    %c0_i32 = arith.constant 0 : i32
    %c0_i32_0 = arith.constant 0 : i32
    %c0_i32_1 = arith.constant 0 : i32
    return %c0_i32, %c0_i32_0 : i32, i32
  }
  func.func @transform_9(%arg0: i32) -> (i32, i32) {
    %c0_i32 = arith.constant 0 : i32
    %c0_i32_0 = arith.constant 0 : i32
    %c0_i32_1 = arith.constant 0 : i32
    return %c0_i32, %c0_i32_0 : i32, i32
  }
  func.func @transform_10(%arg0: i32) -> (i32, i32) {
    %c0_i32 = arith.constant 0 : i32
    %c0_i32_0 = arith.constant 0 : i32
    %c0_i32_1 = arith.constant 0 : i32
    return %c0_i32, %c0_i32_0 : i32, i32
  }
  func.func @transform_11(%arg0: i32) -> (i32, i32) {
    %c0_i32 = arith.constant 0 : i32
    %c0_i32_0 = arith.constant 0 : i32
    return %arg0, %c0_i32 : i32, i32
  }
}

</mosaic_0001>

<bundles_post_ra>
// kernel: tpu_custom_call.1
= control target key start
LH: loop header
LB: loop body
LE: loop exit
PB: predicated region body
PF: predicated region fallthrough
CT: control target
= control target key end

     0   :  { %s8542_s0 = inlined_call_operand.vmem [shape: bf16[512,128], index: 0, kind: input, shape index: {}]   ;;  %s8543_s1 = inlined_call_operand.vmem [shape: f32[512,2], index: 1, kind: input, shape index: {}]   ;;  %s8544_s2 = inlined_call_operand.vmem [shape: bf16[128,512], index: 2, kind: input, shape index: {}]   ;;  %s8545_s3 = inlined_call_operand.hbm [shape: bf16[256,256], index: 3, kind: input, shape index: {}]   ;;  %s8546_s4 = inlined_call_operand.hbm [shape: bf16[256,256], index: 4, kind: input, shape index: {}]   ;;  %s8547_s5 = inlined_call_operand.hbm [shape: bf16[256,256], index: 5, kind: input, shape index: {}]   ;;  %s8548_s6 = inlined_call_operand.hbm [shape: bf16[256,256], index: 6, kind: input, shape index: {}]   ;;  %s8549_s7 = inlined_call_operand.hbm [shape: bf16[256,256], index: 7, kind: input, shape index: {}]   ;;  %s8550_s8 = inlined_call_operand.hbm [shape: bf16[256,128], index: 8, kind: input, shape index: {}]   ;;  %s8551_s9 = inlined_call_operand.vmem [shape: f32[8,512], index: 9, kind: input, shape index: {}]   ;;  %s8552_s10 = inlined_call_operand.hbm [shape: f32[8,256], index: 10, kind: input, shape index: {}]   ;;  %s8553_s11 = inlined_call_operand.hbm [shape: f32[512,128], index: 11, kind: output, shape index: {}]  }
   0x1   :  { %8610 = sst [smem:[#allocation95_spill]] %s8546_s4 }
   0x2   :  { %8611 = sst [smem:[#allocation96_spill]] %s8548_s6 }
   0x3   :  { %8612 = sst [smem:[#allocation97_spill]] %s8553_s11 }
   0x4   :  { %16 = vsyncpa [#allocation3], 0 }
   0x5   :  { %17 = vsyncpa [#allocation6], 0 }
   0x6   :  { %18 = vsyncpa [#allocation9], 0 }
   0x7   :  { %19 = vsyncpa [#allocation12], 0 }
   0x8   :  { %20 = vsyncpa [#allocation4], 0 }
   0x9   :  { %22 = vsyncpa [#allocation4 + $0x1], 0  ;;  %s6528_s17 = smov 0   ;;  %s6530_s18 = smov 0  }
   0xa   :  { %s6532_s19 = smov 0   ;;  %s6534_s20 = smov 0  }
   0xb LB: > { %8613 = sst [smem:[#allocation20_spill]] %s6438_s17  ;;  %s6549_s21 = sadd.s32 4294967295, %s6450_s20   ;;  %s6450_s20 = sphi %s6534_s20, %s8794_s20   ;;  %s6446_s19 = sphi %s6532_s19, %s8796_s19   ;;  %s6442_s18 = sphi %s6530_s18, %s8798_s18   ;;  %s6438_s17 = sphi %s6528_s17, %s8797_s17  }
   0xc   : > { %8614 = sst [smem:[#allocation21_spill]] %s6446_s19  ;;  %s5246_s22 = sadd.s32 4294967294, %s6450_s20  }
   0xd   : > { %8615 = sst [smem:[#allocation22_spill]] %s6450_s20  ;;  %s6553_s23 = sadd.s32 1, %s6450_s20  }
   0xe   : > { %8616 = sst [smem:[#allocation23_spill]] %s6553_s23  ;;  %s276_s24 = sadd.s32 1, %s6446_s19 }
   0xf   : > { %s273_s25 = ssub.s32 %s6450_s20, %s6553_s23  ;;  %p286_p0 = scmp.ne.s32.totalorder %s6446_s19, %s6442_s18 }
  0x10   : > { %p274_p1 = scmp.eq.s32.totalorder %s273_s25, 0  ;;  %p287_p2 = scmp.eq.s32.totalorder %s6549_s21, 1 }
  0x11   : > { %p292_p3 = scmp.ne.s32.totalorder %s6442_s18, %s6438_s17  ;;  %p293_p4 = scmp.eq.s32.totalorder %s5246_s22, 1 }
  0x12   : > { %s6564_s26 = scalar_select %p274_p1, %s6446_s19, %s276_s24  }
  0x13   : > { %p6566_p5 = por %p287_p2, %p286_p0  ;;  %p6570_p6 = por %p293_p4, %p292_p3 }
  0x14   : > { %8617 = sst [smem:[#allocation24_spill]] %s6564_s26  ;;  %p5247_p7 = scmp.ge.s32.totalorder %s6450_s20, 1 }
  0x15   : > { %s8618_s27 = scalar_select %p6566_p5, 1, 0 }
  0x16   : > { %s8619_s28 = scalar_select %p6570_p6, 1, 0 }
  0x17   : > { %p300_p8 = scmp.lt.s32.totalorder %s6450_s20, 3  ;;  %p8557_p9 = scmp.eq.s32.totalorder %s6549_s21, 0 }
  0x18   : > { %8620 = sst [smem:[#allocation25_spill]] %s8619_s28  ;;  %s6452_s30 = smov [#allocation5]  }
  0x19   : > { %p6577_p10 = pnand %p5247_p7, %p300_p8  ;;  %s328_s12 = sshll.u32 %s6452_s30, 4  ;;  %s6583_s12 = int_to_ptr.vmem [resolvable:$true] %s328_s12 }
  0x1a   : > { %s6453_s14 = smov [#allocation8]   ;;  %s6454_s16 = smov [#allocation11]  }
  0x1b   : > { %s8621_s29 = scalar_select %p6577_p10, 1, 0 }
  0x1c   : > { %p5705_p11 = pneg %p6577_p10  ;;  %s354_s15 = sshll.u32 %s6453_s14, 4  ;;  %s6591_s15 = int_to_ptr.vmem [resolvable:$true] %s354_s15 }
  0x1d   : > { %s6593_s22 = sshll.u32 %s6454_s16, 4  ;;  %s8623_s4 = sld [smem:[#allocation95_spill]]  ;;  %s381_s22 = int_to_ptr.vmem [resolvable:$true] %s6593_s22 }
  0x1e   : > { %p6587_p12 = pnand %p8557_p9, %p5705_p11 }
  0x20   : > { %p6603_p0 = pneg %p6587_p12 }
  0x23   : > { %s6176_s26 = scalar_lea.hbm %s8623_s4, 4096 }
  0x24   : > { %p6177_p13 = scmp.ne.s32.totalorder %s8623_s4, %s6176_s26  ;;  %p6183_p3 = scmp.lt.u32.totalorder %s6176_s26, %s8623_s4 }
  0x26   : > { %p6179_p1 = pnand %p6603_p0, %p6177_p13 }
  0x28   : > { %p6180_p2 = pneg %p6179_p1 }
  0x2a   : > { %p6185_p4 = pnand %p6183_p3, %p6180_p2 }
  0x2c   : > { %6188 = shalt.err (!%p6185_p4)
}
  0x2d   : > { %s6189_s19 = scalar_lea.vmem %s6583_s12, 4096  ;;  %p6197_p9 = scmp.lt.s32.totalorder %s6583_s12, %s6583_s12 }
  0x2e   : > { %p6190_p7 = scmp.ne.s32.totalorder %s6583_s12, %s6189_s19  ;;  %p6198_p6 = scmp.lt.s32.totalorder %s6189_s19, %s6189_s19 }
  0x30   : > { %p6192_p8 = pnand %p6190_p7, %p6603_p0  ;;  %p6199_p13 = por %p6198_p6, %p6197_p9 }
  0x32   : > { %p6193_p11 = pneg %p6192_p8 }
  0x34   : > { %p6200_p1 = pnand %p6199_p13, %p6193_p11 }
  0x36   : > { %6203 = shalt.err (!%p6200_p1)
}
  0x37   : > { %s8564_s24 = smov 128   ;;  %s8566_s26 = smov 8  }
  0x38   : > { %5711 = dma.hbm_to_vmem [thread:$0]  (!%p6587_p12), %s8623_s4, 4096, %s6583_s12, [#allocation6], %s8564_s24, %s8564_s24, %s8566_s26  }
  0x39   : > { %s8625_s6 = sld [smem:[#allocation96_spill]] }
  0x3f   : > { %s6204_s19 = scalar_lea.hbm %s8625_s6, 4096 }
  0x40   : > { %p6205_p6 = scmp.ne.s32.totalorder %s8625_s6, %s6204_s19  ;;  %p6211_p3 = scmp.lt.u32.totalorder %s6204_s19, %s8625_s6 }
  0x42   : > { %p6207_p9 = pnand %p6205_p6, %p6603_p0 }
  0x44   : > { %p6208_p2 = pneg %p6207_p9 }
  0x46   : > { %p6213_p4 = pnand %p6211_p3, %p6208_p2 }
  0x48   : > { %6216 = shalt.err (!%p6213_p4)
}
  0x49   : > { %s6217_s12 = scalar_lea.vmem %s6591_s15, 4096  ;;  %p6225_p13 = scmp.lt.s32.totalorder %s6591_s15, %s6591_s15 }
  0x4a   : > { %p6218_p7 = scmp.ne.s32.totalorder %s6591_s15, %s6217_s12  ;;  %p6226_p1 = scmp.lt.s32.totalorder %s6217_s12, %s6217_s12 }
  0x4c   : > { %p6220_p8 = pnand %p6218_p7, %p6603_p0  ;;  %p6227_p6 = por %p6226_p1, %p6225_p13 }
  0x4e   : > { %p6221_p11 = pneg %p6220_p8 }
  0x50   : > { %p6228_p9 = pnand %p6227_p6, %p6221_p11 }
  0x52   : > { %6231 = shalt.err (!%p6228_p9)
}
  0x53   : > { %5717 = dma.hbm_to_vmem [thread:$0]  (!%p6587_p12), %s8625_s6, 4096, %s6591_s15, [#allocation9], %s8564_s24, %s8564_s24, %s8566_s26  }
  0x54   : > { %s6232_s25 = scalar_lea.hbm %s8550_s8, 2048 }
  0x55   : > { %p6233_p2 = scmp.ne.s32.totalorder %s8550_s8, %s6232_s25  ;;  %p6239_p7 = scmp.lt.u32.totalorder %s6232_s25, %s8550_s8 }
  0x57   : > { %p6235_p3 = pnand %p6233_p2, %p6603_p0 }
  0x59   : > { %p6236_p4 = pneg %p6235_p3 }
  0x5b   : > { %p6241_p8 = pnand %p6239_p7, %p6236_p4 }
  0x5d   : > { %6244 = shalt.err (!%p6241_p8)
}
  0x5e   : > { %s6245_s12 = scalar_lea.vmem %s381_s22, 2048  ;;  %p6253_p6 = scmp.lt.s32.totalorder %s381_s22, %s381_s22 }
  0x5f   : > { %p6246_p11 = scmp.ne.s32.totalorder %s381_s22, %s6245_s12  ;;  %p6254_p9 = scmp.lt.s32.totalorder %s6245_s12, %s6245_s12 }
  0x61   : > { %p6248_p13 = pnand %p6246_p11, %p6603_p0  ;;  %p6255_p5 = por %p6254_p9, %p6253_p6 }
  0x63   : > { %p6249_p1 = pneg %p6248_p13 }
  0x65   : > { %p6256_p10 = pnand %p6255_p5, %p6249_p1 }
  0x67   : > { %6259 = shalt.err (!%p6256_p10)
}
  0x68   : > { %s6457_s15 = smov 64   ;;  %s6458_s11 = smov 4  }
  0x69   : > { %5723 = dma.hbm_to_vmem [thread:$0]  (!%p6587_p12), %s8550_s8, 2048, %s381_s22, [#allocation12], %s6457_s15, %s6457_s15, %s6458_s11  }
  0x6a   : > { %s6459_s28 = smov [#allocation2]   ;;  %s6460_s30 = smov [#allocation7]  }
  0x6b   : > { %s315_s25 = sshll.u32 %s6459_s28, 4  ;;  %s341_s14 = sshll.u32 %s6460_s30, 4  ;;  %s316_s25 = int_to_ptr.vmem [resolvable:$true] %s315_s25  ;;  %s342_s14 = int_to_ptr.vmem [resolvable:$true] %s341_s14 }
  0x6c   : > { %s6260_s12 = scalar_lea.hbm %s8545_s3, 4096 }
  0x6d   : > { %p6261_p5 = scmp.ne.s32.totalorder %s8545_s3, %s6260_s12  ;;  %p6267_p3 = scmp.lt.u32.totalorder %s6260_s12, %s8545_s3 }
  0x6f   : > { %p6263_p10 = pnand %p6261_p5, %p6603_p0 }
  0x71   : > { %p6264_p2 = pneg %p6263_p10 }
  0x73   : > { %p6269_p4 = pnand %p6267_p3, %p6264_p2 }
  0x75   : > { %6272 = shalt.err (!%p6269_p4)
}
  0x76   : > { %s6273_s22 = scalar_lea.vmem %s316_s25, 4096  ;;  %p6281_p13 = scmp.lt.s32.totalorder %s316_s25, %s316_s25 }
  0x77   : > { %p6274_p7 = scmp.ne.s32.totalorder %s316_s25, %s6273_s22  ;;  %p6282_p1 = scmp.lt.s32.totalorder %s6273_s22, %s6273_s22 }
  0x79   : > { %p6276_p8 = pnand %p6274_p7, %p6603_p0  ;;  %p6283_p6 = por %p6282_p1, %p6281_p13 }
  0x7b   : > { %p6277_p11 = pneg %p6276_p8 }
  0x7d   : > { %p6284_p9 = pnand %p6283_p6, %p6277_p11 }
  0x7f   : > { %6287 = shalt.err (!%p6284_p9)
}
  0x80   : > { %s8626_s24 = smov 8   ;;  %s8627_s26 = smov 128  }
  0x81   : > { %5708 = dma.hbm_to_vmem [thread:$0]  (!%p6587_p12), %s8545_s3, 4096, %s316_s25, [#allocation3], %s8627_s26, %s8627_s26, %s8626_s24  }
  0x82   : > { %s6288_s17 = scalar_lea.hbm %s8547_s5, 4096 }
  0x83   : > { %p6289_p5 = scmp.ne.s32.totalorder %s8547_s5, %s6288_s17  ;;  %p6295_p3 = scmp.lt.u32.totalorder %s6288_s17, %s8547_s5 }
  0x85   : > { %p6291_p10 = pnand %p6289_p5, %p6603_p0 }
  0x87   : > { %p6292_p2 = pneg %p6291_p10 }
  0x89   : > { %p6297_p4 = pnand %p6295_p3, %p6292_p2 }
  0x8b   : > { %6300 = shalt.err (!%p6297_p4)
}
  0x8c   : > { %s6301_s19 = scalar_lea.vmem %s342_s14, 4096  ;;  %p6309_p13 = scmp.lt.s32.totalorder %s342_s14, %s342_s14 }
  0x8d   : > { %p6302_p7 = scmp.ne.s32.totalorder %s342_s14, %s6301_s19  ;;  %p6310_p1 = scmp.lt.s32.totalorder %s6301_s19, %s6301_s19 }
  0x8f   : > { %p6304_p8 = pnand %p6302_p7, %p6603_p0  ;;  %p6311_p6 = por %p6310_p1, %p6309_p13 }
  0x91   : > { %p6305_p11 = pneg %p6304_p8 }
  0x93   : > { %p6312_p9 = pnand %p6311_p6, %p6305_p11 }
  0x95   : > { %6315 = shalt.err (!%p6312_p9)
}
  0x96   : > { %5714 = dma.hbm_to_vmem [thread:$0]  (!%p6587_p12), %s8547_s5, 4096, %s342_s14, [#allocation6], %s8627_s26, %s8627_s26, %s8626_s24  }
  0x97   : > { %s6461_s22 = smov [#allocation10]   ;;  %s6462_s6 = smov [#allocation13]  }
  0x98   : > { %s367_s4 = sshll.u32 %s6461_s22, 4  ;;  %s397_s15 = sshll.u32 %s6462_s6, 4  ;;  %s368_s4 = int_to_ptr.vmem [resolvable:$true] %s367_s4  ;;  %s398_s15 = int_to_ptr.vmem [resolvable:$true] %s397_s15 }
  0x99   : > { %s6316_s20 = scalar_lea.hbm %s8549_s7, 4096 }
  0x9a   : > { %p6317_p5 = scmp.ne.s32.totalorder %s8549_s7, %s6316_s20  ;;  %p6323_p3 = scmp.lt.u32.totalorder %s6316_s20, %s8549_s7 }
  0x9c   : > { %p6319_p10 = pnand %p6317_p5, %p6603_p0 }
  0x9e   : > { %p6320_p2 = pneg %p6319_p10 }
  0xa0   : > { %p6325_p4 = pnand %p6323_p3, %p6320_p2 }
  0xa2   : > { %6328 = shalt.err (!%p6325_p4)
}
  0xa3   : > { %s6329_s14 = scalar_lea.vmem %s368_s4, 4096  ;;  %p6337_p13 = scmp.lt.s32.totalorder %s368_s4, %s368_s4 }
  0xa4   : > { %p6330_p7 = scmp.ne.s32.totalorder %s368_s4, %s6329_s14  ;;  %p6338_p1 = scmp.lt.s32.totalorder %s6329_s14, %s6329_s14 }
  0xa6   : > { %p6332_p8 = pnand %p6330_p7, %p6603_p0  ;;  %p6339_p6 = por %p6338_p1, %p6337_p13 }
  0xa8   : > { %p6333_p11 = pneg %p6332_p8 }
  0xaa   : > { %p6340_p9 = pnand %p6339_p6, %p6333_p11 }
  0xac   : > { %6343 = shalt.err (!%p6340_p9)
}
  0xad   : > { %5720 = dma.hbm_to_vmem [thread:$0]  (!%p6587_p12), %s8549_s7, 4096, %s368_s4, [#allocation9], %s8627_s26, %s8627_s26, %s8626_s24  }
  0xae   : > { %s6344_s11 = scalar_lea.hbm %s8552_s10, 256 }
  0xaf   : > { %p6345_p5 = scmp.ne.s32.totalorder %s8552_s10, %s6344_s11  ;;  %p6351_p3 = scmp.lt.u32.totalorder %s6344_s11, %s8552_s10 }
  0xb1   : > { %p6347_p10 = pnand %p6345_p5, %p6603_p0 }
  0xb3   : > { %p6348_p2 = pneg %p6347_p10 }
  0xb5   : > { %p6353_p4 = pnand %p6351_p3, %p6348_p2 }
  0xb7   : > { %6356 = shalt.err (!%p6353_p4)
}
  0xb8   : > { %s6357_s16 = scalar_lea.vmem %s398_s15, 256  ;;  %p6365_p13 = scmp.lt.s32.totalorder %s398_s15, %s398_s15 }
  0xb9   : > { %p6358_p7 = scmp.ne.s32.totalorder %s398_s15, %s6357_s16  ;;  %p6366_p1 = scmp.lt.s32.totalorder %s6357_s16, %s6357_s16 }
  0xbb   : > { %p6360_p8 = pnand %p6358_p7, %p6603_p0  ;;  %p6367_p6 = por %p6366_p1, %p6365_p13 }
  0xbd   : > { %p6361_p11 = pneg %p6360_p8 }
  0xbf   : > { %p6368_p9 = pnand %p6367_p6, %p6361_p11 }
  0xc1   : > { %6371 = shalt.err (!%p6368_p9)
}
  0xc2   : > { %5726 = dma.hbm_to_vmem [thread:$0]  (!%p6587_p12), %s8552_s10, 256, %s398_s15, [#allocation12]  }
  0xc3   : > { %p8628_p5 = scmp.ne.s32.totalorder %s8621_s29, 0 }
  0xc5   : > { %428 = sbr.rel (%p8628_p5) target bundleno = 1942 (0x796), region = 64 }
  0xcc   : > { %p8629_p10 = scmp.eq.s32.totalorder %s6549_s21, 0 }
  0xce   : > { %6417 = dma.done.wait (%p8629_p10), [#allocation3], 4096   ;;  %p8630_p0 = pmov %p8629_p10 }
  0xd0   : > { %6419 = vsyncadd (%p8630_p0), [#allocation3], 4294963200  ;;  %p8631_p2 = pmov %p8630_p0 }
  0xd1   : > { %p8632_p3 = pmov %p8630_p0 }
  0xd2   : > { %6421 = dma.done.wait (%p8631_p2), [#allocation6], 8192  }
  0xd3   : > { %6423 = vsyncadd (%p8632_p3), [#allocation6], 4294959104  ;;  %p8633_p4 = pmov %p8630_p0 }
  0xd4   : > { %p8634_p12 = pmov %p8630_p0 }
  0xd5   : > { %6425 = dma.done.wait (%p8633_p4), [#allocation9], 8192  }
  0xd6   : > { %6427 = vsyncadd (%p8634_p12), [#allocation9], 4294959104  ;;  %p8635_p7 = pmov %p8630_p0 }
  0xd7   : > { %p8636_p8 = pmov %p8630_p0 }
  0xd8   : > { %6429 = dma.done.wait (%p8635_p7), [#allocation12], 2304  }
  0xd9   : > { %6431 = vsyncadd (%p8636_p8), [#allocation12], 4294964992  ;;  %v8568_v0 = vmov 0   ;;  %v6464_v1 = vmov 1   ;;  %s5265_s23 = sshll.u32 %s6549_s21, 5  ;;  %s5498_s6 = sshll.u32 %s6549_s21, 12 }
  0xda   : > { %901 = vmatprep.mubr.bf16.mxu0 %v8568_v0  ;;  %5794 = vset.pattern.permute.xlu1 %v6464_v1  ;;  %p498_p11 = scmp.lt.s32.totalorder %s5265_s23, 63  ;;  %v5834_v2 = vld [vmem:[%s8544_s2 + $0x4] ss:$16 sps:$4 sm:$0xff]   ;;  %v5836_v3 = vld [vmem:[%s8544_s2] ss:$16 sps:$4 sm:$0xff]   ;;  %s8788_s28 = sld [smem:[#allocation97_spill]] }
  0xdb   : > { %5793 = vset.pattern.permute.xlu0 %v8568_v0  ;;  %1094 = vmatprep.mubr.bf16.mxu1 %v8568_v0  ;;  %v5837_v4 = vld [vmem:[%s8544_s2 + $0x24] ss:$16 sps:$4 sm:$0xff]   ;;  %v5839_v5 = vld [vmem:[%s8544_s2 + $0x20] ss:$16 sps:$4 sm:$0xff]   ;;  %p8789_p1 = scmp.ne.s32.totalorder %s8618_s27, 0  ;;  %s6465_s24 = smov [#allocation14]  }
  0xdc   : > { %869 = vmatprep.subr.bf16.mxu0 %v5834_v2  ;;  %s8800_s23 = smov (!%p498_p11, %s5265_s23), 63  ;;  %v5840_v6 = vld [vmem:[%s8544_s2 + $0x44] ss:$16 sps:$4 sm:$0xff]   ;;  %v5842_v7 = vld [vmem:[%s8544_s2 + $0x40] ss:$16 sps:$4 sm:$0xff]   ;;  %s6376_s26 = sshll.u32 %s6465_s24, 4  ;;  %s6377_s26 = int_to_ptr.vmem [resolvable:$false] %s6376_s26 }
  0xdd   : > { %870 = vmatpush1.bf16.msra.mxu0 %v5836_v3  ;;  %s5266_s11 = sshll.u32 %s8800_s23, 2  ;;  %s5268_s17 = sshll.u32 %s8800_s23, 3  ;;  %v5843_v8 = vld [vmem:[%s8544_s2 + $0x64] ss:$16 sps:$4 sm:$0xff]   ;;  %v5845_v9 = vld [vmem:[%s8544_s2 + $0x60] ss:$16 sps:$4 sm:$0xff]  }
  0xde   : > { %871 = vmatprep.subr.bf16.mxu0 %v5837_v4  ;;  %s6800_s29 = scalar_lea.vmem %s8542_s0, %s5266_s11  ;;  %s6805_s15 = scalar_lea.vmem %s8543_s1, %s5268_s17  ;;  %v5846_v10 = vld [vmem:[%s8544_s2 + $0x84] ss:$16 sps:$4 sm:$0xff]   ;;  %v5848_v13 = vld [vmem:[%s8544_s2 + $0x80] ss:$16 sps:$4 sm:$0xff]  }
  0xdf   : > { %v543_v11 = vld [vmem:[%s6805_s15] sm:$0xff]  ;;  %v544_v12 = vld [vmem:[%s6805_s15 + $0x8] sm:$0xff]  ;;  %v545_v16 = vld [vmem:[%s6805_s15 + $0x10] sm:$0xff]  ;;  %s6378_s13 = scalar_lea.vmem %s6377_s26, 8192 }
  0xe0   : > { %1560 = vperm.xlu1 %5794, %v543_v11   ;;  %1257 = vperm.xlu0 %5793, %v543_v11   ;;  %v5849_v14 = vld [vmem:[%s8544_s2 + $0xa4] ss:$16 sps:$4 sm:$0xff]   ;;  %v5851_v15 = vld [vmem:[%s8544_s2 + $0xa0] ss:$16 sps:$4 sm:$0xff]   ;;  %v546_v17 = vld [vmem:[%s6805_s15 + $0x18] sm:$0xff]  ;;  %s8492_s30 = scalar_lea.hbm %s8788_s28, %s5498_s6 }
  0xe1   : > { %872 = vmatpush1.bf16.msra.mxu0 %v5839_v5  ;;  %v5852_v18 = vld [vmem:[%s8544_s2 + $0xc4] ss:$16 sps:$4 sm:$0xff]   ;;  %v5854_v19 = vld [vmem:[%s8544_s2 + $0xc0] ss:$16 sps:$4 sm:$0xff]   ;;  %v548_v28 = vld [vmem:[%s6805_s15 + $0x28] sm:$0xff] }
  0xe2   : > { %873 = vmatprep.subr.bf16.mxu0 %v5840_v6  ;;  %v5855_v20 = vld [vmem:[%s8544_s2 + $0xe4] ss:$16 sps:$4 sm:$0xff]   ;;  %v5857_v21 = vld [vmem:[%s8544_s2 + $0xe0] ss:$16 sps:$4 sm:$0xff]   ;;  %v5859_v31 = vld [vmem:[%s6800_s29 + $0x8] sm:$0xff]  }
  0xe3   : > { %v549_v22 = vld [vmem:[%s6805_s15 + $0x30] sm:$0xff]  ;;  %v5872_v23 = vld [vmem:[#allocation2 + $0x4] ss:$8 sps:$4 sm:$0xff]   ;;  %v5870_v26 = vld [vmem:[#allocation2] ss:$8 sps:$4 sm:$0xff]  }
  0xe4   : > { %1564 = vperm.xlu1 %5794, %v544_v12   ;;  %1262 = vperm.xlu0 %5793, %v544_v12   ;;  %v547_v24 = vld [vmem:[%s6805_s15 + $0x20] sm:$0xff]  ;;  %v5876_v27 = vld [vmem:[#allocation2 + $0x14] ss:$8 sps:$4 sm:$0xff]   ;;  %v5874_v29 = vld [vmem:[#allocation2 + $0x10] ss:$8 sps:$4 sm:$0xff]  }
  0xe5   : > { %874 = vmatpush1.bf16.msra.mxu0 %v5842_v7  ;;  %v5858_v25 = vld [vmem:[%s6800_s29] sm:$0xff]   ;;  %v5884_v33 = vld [vmem:[#allocation2 + $0x34] ss:$8 sps:$4 sm:$0xff]   ;;  %v552_v34 = vld [vmem:[%s6805_s15 + $0x48] sm:$0xff] }
  0xe6   : > { %875 = vmatprep.subr.bf16.mxu0 %v5843_v8  ;;  %v5880_v30 = vld [vmem:[#allocation2 + $0x24] ss:$8 sps:$4 sm:$0xff]   ;;  %v5878_v32 = vld [vmem:[#allocation2 + $0x20] ss:$8 sps:$4 sm:$0xff]   ;;  %v550_v35 = vld [vmem:[%s6805_s15 + $0x38] sm:$0xff] }
  0xe7   : > { %v553_v36 = vld [vmem:[%s6805_s15 + $0x50] sm:$0xff]  ;;  %v5888_v38 = vld [vmem:[#allocation2 + $0x44] ss:$8 sps:$4 sm:$0xff]   ;;  %v5886_v40 = vld [vmem:[#allocation2 + $0x40] ss:$8 sps:$4 sm:$0xff]  }
  0xe8   : > { %5795 = vset.pattern.permute.xlu1 %v8568_v0  ;;  %1267 = vperm.xlu0 %5793, %v545_v16   ;;  %v5882_v37 = vld [vmem:[#allocation2 + $0x30] ss:$8 sps:$4 sm:$0xff]   ;;  %v5891_v41 = vld [vmem:[#allocation2 + $0x54] ss:$8 sps:$4 sm:$0xff]   ;;  %v551_v42 = vld [vmem:[%s6805_s15 + $0x40] sm:$0xff] }
  0xe9   : > { %876 = vmatpush1.bf16.msra.mxu0 %v5845_v9  ;;  %1272 = vperm.xlu1 %5795, %v546_v17   ;;  %v5860_v39 = vld [vmem:[%s6800_s29 + $0x10] sm:$0xff]   ;;  %v5861_v43 = vld [vmem:[%s6800_s29 + $0x18] sm:$0xff]   ;;  %v5894_v46 = vld [vmem:[#allocation2 + $0x64] ss:$8 sps:$4 sm:$0xff]  }
  0xea   : > { %877 = vmatprep.subr.bf16.mxu0 %v5846_v10  ;;  %v5889_v44 = vld [vmem:[#allocation2 + $0x50] ss:$8 sps:$4 sm:$0xff]   ;;  %v5892_v47 = vld [vmem:[#allocation2 + $0x60] ss:$8 sps:$4 sm:$0xff]   ;;  %v5897_v48 = vld [vmem:[#allocation2 + $0x74] ss:$8 sps:$4 sm:$0xff]  }
  0xeb   : > { %v557_v45 = vld [vmem:[%s6805_s15 + $0x70] sm:$0xff]  ;;  %v5862_v49 = vld [vmem:[%s6800_s29 + $0x20] sm:$0xff]   ;;  %v556_v50 = vld [vmem:[%s6805_s15 + $0x68] sm:$0xff] }
  0xec   : > { %5796 = vset.pattern.permute.xlu0 %v6464_v1  ;;  %v5895_v51 = vld [vmem:[#allocation2 + $0x70] ss:$8 sps:$4 sm:$0xff]   ;;  %v5900_v52 = vld [vmem:[#allocation2 + $0x84] ss:$8 sps:$4 sm:$0xff]   ;;  %v5898_v53 = vld [vmem:[#allocation2 + $0x80] ss:$8 sps:$4 sm:$0xff]  }
  0xed   : > { %878 = vmatpush1.bf16.msra.mxu0 %v5848_v13  ;;  %5797 = vset.pattern.permute.xlu1 %v6464_v1  ;;  %v5903_v54 = vld [vmem:[#allocation2 + $0x94] ss:$8 sps:$4 sm:$0xff]   ;;  %v6871_v56 = vld [vmem:[%s6805_s15 + $0x88] sm:$0xff]  ;;  %v5901_v57 = vld [vmem:[#allocation2 + $0x90] ss:$8 sps:$4 sm:$0xff]  }
  0xee   : > { %879 = vmatprep.subr.bf16.mxu0 %v5849_v14  ;;  %1568 = vperm.xlu0 %5796, %v545_v16   ;;  %v554_v55 = vld [vmem:[%s6805_s15 + $0x58] sm:$0xff]  ;;  %v5906_v58 = vld [vmem:[#allocation2 + $0xa4] ss:$8 sps:$4 sm:$0xff]   ;;  %v5904_v60 = vld [vmem:[#allocation2 + $0xa0] ss:$8 sps:$4 sm:$0xff]  }
  0xef   : > { %1572 = vperm.xlu1 %5797, %v546_v17   ;;  %v5863_v59 = vld [vmem:[%s6800_s29 + $0x28] sm:$0xff]   ;;  %v561_v61 = vld [vmem:[%s6805_s15 + $0x90] sm:$0xff]  ;;  %v555_v63 = vld [vmem:[%s6805_s15 + $0x60] sm:$0xff] }
  0xf0   : > { %v5909_v62 = vld [vmem:[#allocation2 + $0xb4] ss:$8 sps:$4 sm:$0xff]   ;;  %v5907_v2 = vld [vmem:[#allocation2 + $0xb0] ss:$8 sps:$4 sm:$0xff]   ;;  %v5912_v4 = vld [vmem:[#allocation2 + $0xc4] ss:$8 sps:$4 sm:$0xff]  }
  0xf1   : > { %880 = vmatpush1.bf16.msra.mxu0 %v5851_v15  ;;  %v5864_v3 = vld [vmem:[%s6800_s29 + $0x30] sm:$0xff]   ;;  %v5910_v6 = vld [vmem:[#allocation2 + $0xc0] ss:$8 sps:$4 sm:$0xff]   ;;  %v5865_v8 = vld [vmem:[%s6800_s29 + $0x38] sm:$0xff]  }
  0xf2   : > { %881 = vmatprep.subr.bf16.mxu0 %v5852_v18  ;;  %1584 = vperm.xlu0 %5796, %v549_v22   ;;  %v565_v5 = vld [vmem:[%s6805_s15 + $0xb0] sm:$0xff]  ;;  %v5918_v10 = vld [vmem:[#allocation2 + $0xe4] ss:$8 sps:$4 sm:$0xff]   ;;  %v558_v12 = vld [vmem:[%s6805_s15 + $0x78] sm:$0xff] }
  0xf3   : > { %5798 = vset.pattern.permute.xlu1 %v8568_v0  ;;  %v5915_v7 = vld [vmem:[#allocation2 + $0xd4] ss:$8 sps:$4 sm:$0xff]   ;;  %v5913_v9 = vld [vmem:[#allocation2 + $0xd0] ss:$8 sps:$4 sm:$0xff]   ;;  %v6888_v11 = vld [vmem:[%s6805_s15 + $0xa8] sm:$0xff] }
  0xf4   : > { %1277 = vperm.xlu1 %5798, %v547_v24   ;;  %v5916_v13 = vld [vmem:[#allocation2 + $0xe0] ss:$8 sps:$4 sm:$0xff]   ;;  %v569_v18 = vld [vmem:[%s6805_s15 + $0xd0] sm:$0xff] }
  0xf5   : > { %882 = vmatpush1.bf16.msra.mxu0 %v5854_v19  ;;  %v5866_v14 = vld [vmem:[%s6800_s29 + $0x40] sm:$0xff]   ;;  %v6897_v15 = vld [vmem:[%s6805_s15 + $0xc8] sm:$0xff]  ;;  %v5868_v19 = vld [vmem:[%s6800_s29 + $0x50] sm:$0xff]  }
  0xf6   : > { %883 = vmatprep.subr.bf16.mxu0 %v5855_v20  ;;  %5801 = vset.pattern.permute.xlu0 %v8568_v0  ;;  %v559_v16 = vld [vmem:[%s6805_s15 + $0x80] sm:$0xff]  ;;  %v5867_v17 = vld [vmem:[%s6800_s29 + $0x48] sm:$0xff]  }
  0xf7   : > { %1282 = vperm.xlu0 %5801, %v548_v28   ;;  %v6912_v20 = vld [vmem:[%s6805_s15 + $0xe8] sm:$0xff] }
  0xf8   : > { %5799 = vset.pattern.permute.xlu1 %v6464_v1 }
  0xf9   : > { %884 = vmatpush1.bf16.msra.mxu0 %v5857_v21  ;;  %1576 = vperm.xlu1 %5799, %v547_v24   ;;  %v562_v21 = vld [vmem:[%s6805_s15 + $0x98] sm:$0xff] }
  0xfa   : > { %2391 = vmatprep.subr.bf16.mxu0 %v5872_v23  ;;  %v5869_v23 = vld [vmem:[%s6800_s29 + $0x58] sm:$0xff]  }
  0xfb   : > { %1287 = vperm.xlu0 %5801, %v549_v22   ;;  %v573_v22 = vld [vmem:[%s6805_s15 + $0xf0] sm:$0xff] }
  0xfc   : > { %902 = vmatmul.mubr.bf16.vlgmr.msra.gmra.mrb[0].mxu0 %v5858_v25  ;;  %v5921_v24 = vld [vmem:[#allocation2 + $0xf4] ss:$8 sps:$4 sm:$0xff]   ;;  %v563_v25 = vld [vmem:[%s6805_s15 + $0xa0] sm:$0xff] }
  0xfd   : > { %911 = vmatprep.mubr.bf16.mxu0 %v8568_v0  ;;  %2392 = vmatpush1.bf16.msra.mxu0 %v5870_v26  ;;  %v5919_v26 = vld [vmem:[#allocation2 + $0xf0] ss:$8 sps:$4 sm:$0xff]  }
  0xfe   : > { %2393 = vmatprep.subr.bf16.mxu0 %v5876_v27  ;;  %1580 = vperm.xlu1 %5799, %v548_v28   ;;  %v5873_v27 = vld [vmem:[%s6800_s29 + $0x60] sm:$0xff]   ;;  %v1415_v28 = vlaneseq }
  0xff   : > { %1302 = vperm.xlu0 %5801, %v552_v34  }
 0x101   : > { %2394 = vmatpush1.bf16.msra.mxu0 %v5874_v29  ;;  %v6927_v29 = vshrl.u32 %v1415_v28, 7 }
 0x102   : > { %2395 = vmatprep.subr.bf16.mxu0 %v5880_v30  ;;  %5800 = vset.pattern.permute.xlu1 %v8568_v0  ;;  %v5877_v30 = vld [vmem:[%s6800_s29 + $0x68] sm:$0xff]  }
 0x103   : > { %1292 = vperm.xlu1 %5800, %v550_v35   ;;  %1307 = vperm.xlu0 %5801, %v553_v36   ;;  %8637 = vst [vmem:[#allocation26_spill] sm:$0xff] %v6927_v29 }
 0x104   : > { %912 = vmatmul.mubr.bf16.gmra.mrb[4].mxu0 %v5859_v31  ;;  %v6933_v31 = vsub.s32 0, %v6927_v29 }
 0x105   : > { %921 = vmatprep.mubr.bf16.mxu0 %v8568_v0  ;;  %2396 = vmatpush1.bf16.msra.mxu0 %v5878_v32  ;;  %v6936_v32 = vsub.s32 1, %v6927_v29 }
 0x106   : > { %2397 = vmatprep.subr.bf16.mxu0 %v5884_v33  ;;  %v577_v33 = vld [vmem:[%s8551_s9 + $0x10] sm:$0xff] }
 0x107   : > { %5802 = vset.pattern.permute.xlu1 %v6464_v1  ;;  %5806 = vset.pattern.permute.xlu0 %v6464_v1  ;;  %8638 = vst [vmem:[#allocation27_spill] sm:$0xff] %v6936_v32 }
 0x108   : > { %1588 = vperm.xlu1 %5802, %v550_v35   ;;  %1600 = vperm.xlu0 %5806, %v553_v36   ;;  %v6946_v35 = vrot.slane %v577_v33, %v6936_v32 }
 0x109   : > { %2398 = vmatpush1.bf16.msra.mxu0 %v5882_v37  ;;  %v6952_v37 = vrot.slane %v577_v33, %v6933_v31 }
 0x10a   : > { %2399 = vmatprep.subr.bf16.mxu0 %v5888_v38 }
 0x10c   : > { %922 = vmatmul.mubr.bf16.gmra.mrb[8].mxu0 %v5860_v39  ;;  %5803 = vset.pattern.permute.xlu1 %v8568_v0  ;;  %v566_v39 = vld [vmem:[%s6805_s15 + $0xb8] sm:$0xff] }
 0x10d   : > { %931 = vmatprep.mubr.bf16.mxu0 %v8568_v0  ;;  %2400 = vmatpush1.bf16.msra.mxu0 %v5886_v40 }
 0x10e   : > { %2401 = vmatprep.subr.bf16.mxu0 %v5891_v41  ;;  %1297 = vperm.xlu1 %5803, %v551_v42  }
 0x10f   : > { %1616 = vperm.xlu0 %5806, %v557_v45  }
 0x111   : > { %2402 = vmatpush1.bf16.msra.mxu0 %v5889_v44 }
 0x112   : > { %2403 = vmatprep.subr.bf16.mxu0 %v5894_v46  ;;  %5804 = vset.pattern.permute.xlu1 %v6464_v1 }
 0x113   : > { %1592 = vperm.xlu1 %5804, %v551_v42   ;;  %5811 = vset.pattern.permute.xlu0 %v8568_v0  ;;  %v5881_v42 = vld [vmem:[%s6800_s29 + $0x70] sm:$0xff]  }
 0x114   : > { %932 = vmatmul.mubr.bf16.gmra.mrb[12].mxu0 %v5861_v43  ;;  %1322 = vperm.xlu0 %5811, %v556_v50  }
 0x115   : > { %941 = vmatprep.mubr.bf16.mxu0 %v8568_v0  ;;  %2404 = vmatpush1.bf16.msra.mxu0 %v5892_v47 }
 0x116   : > { %2405 = vmatprep.subr.bf16.mxu0 %v5897_v48 }
 0x117   : > { %1596 = vperm.xlu1 %5804, %v552_v34   ;;  %v578_v34 = vld [vmem:[%s8551_s9 + $0x18] sm:$0xff] }
 0x118   : > { %1327 = vperm.xlu0 %5811, %v557_v45   ;;  %v6949_v36 = vrot.slane %v578_v34, %v6936_v32  ;;  %v6955_v38 = vrot.slane %v578_v34, %v6933_v31 }
 0x119   : > { %2406 = vmatpush1.bf16.msra.mxu0 %v5895_v51 }
 0x11a   : > { %2407 = vmatprep.subr.bf16.mxu0 %v5900_v52 }
 0x11b   : > { %5805 = vset.pattern.permute.xlu1 %v8568_v0 }
 0x11c   : > { %942 = vmatmul.mubr.bf16.gmra.mrb[16].mxu0 %v5862_v49  ;;  %1312 = vperm.xlu1 %5805, %v554_v55  }
 0x11d   : > { %951 = vmatprep.mubr.bf16.mxu0 %v8568_v0  ;;  %2408 = vmatpush1.bf16.msra.mxu0 %v5898_v53 }
 0x11e   : > { %2409 = vmatprep.subr.bf16.mxu0 %v5903_v54  ;;  %1342 = vperm.xlu0 %5811, %v6871_v56  }
 0x120   : > { %5807 = vset.pattern.permute.xlu1 %v6464_v1 }
 0x121   : > { %2410 = vmatpush1.bf16.msra.mxu0 %v5901_v57  ;;  %1604 = vperm.xlu1 %5807, %v554_v55  }
 0x122   : > { %2411 = vmatprep.subr.bf16.mxu0 %v5906_v58  ;;  %1347 = vperm.xlu0 %5811, %v561_v61   ;;  %v567_v58 = vld [vmem:[%s6805_s15 + $0xc0] sm:$0xff] }
 0x124   : > { %952 = vmatmul.mubr.bf16.gmra.mrb[20].mxu0 %v5863_v59 }
 0x125   : > { %961 = vmatprep.mubr.bf16.mxu0 %v8568_v0  ;;  %2412 = vmatpush1.bf16.msra.mxu0 %v5904_v60  ;;  %v5885_v60 = vld [vmem:[%s6800_s29 + $0x78] sm:$0xff]  }
 0x126   : > { %2413 = vmatprep.subr.bf16.mxu0 %v5909_v62  ;;  %5808 = vset.pattern.permute.xlu1 %v8568_v0 }
 0x127   : > { %1317 = vperm.xlu1 %5808, %v555_v63   ;;  %5816 = vset.pattern.permute.xlu0 %v6464_v1 }
 0x128   : > { %1632 = vperm.xlu0 %5816, %v561_v61  }
 0x129   : > { %2414 = vmatpush1.bf16.msra.mxu0 %v5907_v2 }
 0x12a   : > { %2415 = vmatprep.subr.bf16.mxu0 %v5912_v4 }
 0x12b   : > { %5809 = vset.pattern.permute.xlu1 %v6464_v1 }
 0x12c   : > { %962 = vmatmul.mubr.bf16.gmra.mrb[24].mxu0 %v5864_v3  ;;  %1608 = vperm.xlu1 %5809, %v555_v63  }
 0x12d   : > { %971 = vmatprep.mubr.bf16.mxu0 %v8568_v0  ;;  %1648 = vperm.xlu0 %5816, %v565_v5  }
 0x12e   : > { %2416 = vmatpush1.bf16.msra.mxu0 %v5910_v6 }
 0x12f   : > { %2417 = vmatprep.subr.bf16.mxu0 %v5915_v7 }
 0x130   : > { %1612 = vperm.xlu1 %5809, %v556_v50  }
 0x131   : > { %5821 = vset.pattern.permute.xlu0 %v8568_v0 }
 0x132   : > { %1362 = vperm.xlu0 %5821, %v6888_v11   ;;  %2418 = vmatpush1.bf16.msra.mxu0 %v5913_v9 }
 0x133   : > { %2419 = vmatprep.subr.bf16.mxu0 %v5918_v10 }
 0x134   : > { %972 = vmatmul.mubr.bf16.gmra.mrb[28].mxu0 %v5865_v8  ;;  %5810 = vset.pattern.permute.xlu1 %v8568_v0 }
 0x135   : > { %981 = vmatprep.mubr.bf16.mxu0 %v8568_v0  ;;  %1332 = vperm.xlu1 %5810, %v558_v12  }
 0x136   : > { %1367 = vperm.xlu0 %5821, %v565_v5   ;;  %2420 = vmatpush1.bf16.msra.mxu0 %v5916_v13 }
 0x137   : > { %2421 = vmatprep.subr.bf16.mxu0 %v5921_v24 }
 0x139   : > { %5812 = vset.pattern.permute.xlu1 %v6464_v1 }
 0x13a   : > { %1620 = vperm.xlu1 %5812, %v558_v12   ;;  %1382 = vperm.xlu0 %5821, %v6897_v15  }
 0x13b   : > { %2422 = vmatpush1.bf16.msra.mxu0 %v5919_v26 }
 0x13c   : > { %982 = vmatmul.mubr.bf16.gmra.mrb[32].mxu0 %v5866_v14 }
 0x13d   : > { %991 = vmatprep.mubr.bf16.mxu0 %v8568_v0 }
 0x13e   : > { %5813 = vset.pattern.permute.xlu1 %v8568_v0  ;;  %5826 = vset.pattern.permute.xlu0 %v6464_v1 }
 0x13f   : > { %1337 = vperm.xlu1 %5813, %v559_v16   ;;  %1664 = vperm.xlu0 %5826, %v569_v18  }
 0x143   : > { %5814 = vset.pattern.permute.xlu1 %v6464_v1  ;;  %5827 = vset.pattern.permute.xlu0 %v8568_v0 }
 0x144   : > { %992 = vmatmul.mubr.bf16.gmra.mrb[36].mxu0 %v5867_v17  ;;  %1624 = vperm.xlu1 %5814, %v559_v16   ;;  %v570_v17 = vld [vmem:[%s6805_s15 + $0xd8] sm:$0xff] }
 0x145   : > { %1001 = vmatprep.mubr.bf16.mxu0 %v8568_v0  ;;  %1387 = vperm.xlu0 %5827, %v569_v18  }
 0x148   : > { %1628 = vperm.xlu1 %5814, %v6871_v56  }
 0x149   : > { %1402 = vperm.xlu0 %5827, %v6912_v20  }
 0x14c   : > { %1002 = vmatmul.mubr.bf16.gmra.mrb[40].mxu0 %v5868_v19  ;;  %5815 = vset.pattern.permute.xlu1 %v8568_v0 }
 0x14d   : > { %1011 = vmatprep.mubr.bf16.mxu0 %v8568_v0  ;;  %1352 = vperm.xlu1 %5815, %v562_v21  }
 0x14e   : > { %1407 = vperm.xlu0 %5827, %v573_v22  }
 0x151   : > { %5817 = vset.pattern.permute.xlu1 %v6464_v1 }
 0x152   : > { %1636 = vperm.xlu1 %5817, %v562_v21   ;;  %5832 = vset.pattern.permute.xlu0 %v6464_v1 }
 0x153   : > { %1680 = vperm.xlu0 %5832, %v573_v22  }
 0x154   : > { %1012 = vmatmul.mubr.bf16.gmra.mrb[44].mxu0 %v5869_v23 }
 0x155   : > { %1021 = vmatprep.mubr.bf16.mxu0 %v8568_v0 }
 0x156   : > { %5818 = vset.pattern.permute.xlu1 %v8568_v0 }
 0x157   : > { %1357 = vperm.xlu1 %5818, %v563_v25  }
 0x15b   : > { %5819 = vset.pattern.permute.xlu1 %v6464_v1 }
 0x15c   : > { %1022 = vmatmul.mubr.bf16.gmra.mrb[48].mxu0 %v5873_v27  ;;  %1640 = vperm.xlu1 %5819, %v563_v25  }
 0x15d   : > { %1031 = vmatprep.mubr.bf16.mxu0 %v8568_v0 }
 0x15f   : > { %v6959_v40 = vpop.permute.xlu1 %1560  ;;  %v6961_v41 = vpop.permute.xlu0 %1257 }
 0x160   : > { %1644 = vperm.xlu1 %5819, %v6888_v11   ;;  %v1433_v43 = vmul.f32 %v6952_v37, %v6961_v41  ;;  %v1705_v44 = vmul.f32 %v6946_v35, %v6959_v40  ;;  %v1434_v45 = vmul.f32 %v6955_v38, %v6961_v41  ;;  %v1706_v46 = vmul.f32 %v6949_v36, %v6959_v40 }
 0x162   : > { %v6977_v49 = vadd.f32 %v1705_v44, %v1433_v43  ;;  %v6979_v50 = vadd.f32 %v1706_v46, %v1434_v45 }
 0x163   : > { %v6973_v47 = vpop.permute.xlu1 %1564  ;;  %v6975_v48 = vpop.permute.xlu0 %1262 }
 0x164   : > { %1032 = vmatmul.mubr.bf16.gmra.mrb[52].mxu0 %v5877_v30  ;;  %5820 = vset.pattern.permute.xlu1 %v8568_v0  ;;  %8639 = vst [vmem:[#allocation28_spill] sm:$0xff] %v6977_v49  ;;  %8640 = vst [vmem:[#allocation29_spill] sm:$0xff] %v6979_v50  ;;  %v1437_v51 = vmul.f32 %v6952_v37, %v6975_v48  ;;  %v1709_v52 = vmul.f32 %v6946_v35, %v6973_v47 }
 0x165   : > { %1041 = vmatprep.mubr.bf16.mxu0 %v8568_v0  ;;  %1372 = vperm.xlu1 %5820, %v566_v39   ;;  %v1438_v53 = vmul.f32 %v6955_v38, %v6975_v48  ;;  %v1710_v54 = vmul.f32 %v6949_v36, %v6973_v47 }
 0x166   : > { %v6993_v56 = vadd.f32 %v1709_v52, %v1437_v51 }
 0x167   : > { %v6991_v55 = vpop.permute.xlu0 %1267  ;;  %v6998_v59 = vadd.f32 %v1710_v54, %v1438_v53  ;;  %v571_v54 = vld [vmem:[%s6805_s15 + $0xe0] sm:$0xff] }
 0x168   : > { %8641 = vst [vmem:[#allocation30_spill] sm:$0xff] %v6993_v56  ;;  %v6995_v57 = vpop.permute.xlu1 %1272  ;;  %v1441_v61 = vmul.f32 %v6952_v37, %v6991_v55  ;;  %v1442_v62 = vmul.f32 %v6955_v38, %v6991_v55 }
 0x169   : > { %5822 = vset.pattern.permute.xlu1 %v6464_v1  ;;  %8642 = vst [vmem:[#allocation31_spill] sm:$0xff] %v6998_v59  ;;  %v1445_v2 = vmul.f32 %v6952_v37, %v6995_v57  ;;  %v1446_v3 = vmul.f32 %v6955_v38, %v6995_v57 }
 0x16a   : > { %1652 = vperm.xlu1 %5822, %v566_v39  }
 0x16c   : > { %1042 = vmatmul.mubr.bf16.gmra.mrb[56].mxu0 %v5881_v42 }
 0x16d   : > { %1051 = vmatprep.mubr.bf16.mxu0 %v8568_v0  ;;  %v7006_v63 = vpop.permute.xlu0 %1568 }
 0x16e   : > { %5823 = vset.pattern.permute.xlu1 %v8568_v0  ;;  %v7012_v4 = vpop.permute.xlu1 %1572  ;;  %v1713_v5 = vmul.f32 %v6946_v35, %v7006_v63  ;;  %v1714_v6 = vmul.f32 %v6949_v36, %v7006_v63 }
 0x16f   : > { %1377 = vperm.xlu1 %5823, %v567_v58   ;;  %v1717_v7 = vmul.f32 %v6946_v35, %v7012_v4  ;;  %v1718_v8 = vmul.f32 %v6949_v36, %v7012_v4 }
 0x170   : > { %v7023_v9 = vadd.f32 %v1713_v5, %v1441_v61  ;;  %v7025_v10 = vadd.f32 %v1714_v6, %v1442_v62 }
 0x171   : > { %v7027_v11 = vpop.permute.xlu0 %1584  ;;  %v7029_v12 = vadd.f32 %v1717_v7, %v1445_v2  ;;  %v7031_v13 = vadd.f32 %v1718_v8, %v1446_v3 }
 0x172   : > { %8643 = vst [vmem:[#allocation32_spill] sm:$0xff] %v7023_v9  ;;  %8644 = vst [vmem:[#allocation33_spill] sm:$0xff] %v7025_v10  ;;  %v1729_v24 = vmul.f32 %v6946_v35, %v7027_v11  ;;  %v1730_v25 = vmul.f32 %v6949_v36, %v7027_v11 }
 0x173   : > { %5824 = vset.pattern.permute.xlu1 %v6464_v1  ;;  %8645 = vst [vmem:[#allocation34_spill] sm:$0xff] %v7029_v12  ;;  %8646 = vst [vmem:[#allocation35_spill] sm:$0xff] %v7031_v13  ;;  %v7033_v14 = vpop.permute.xlu1 %1277 }
 0x174   : > { %1052 = vmatmul.mubr.bf16.gmra.mrb[60].mxu0 %v5885_v60  ;;  %1656 = vperm.xlu1 %5824, %v567_v58   ;;  %v1449_v19 = vmul.f32 %v6952_v37, %v7033_v14  ;;  %v1450_v21 = vmul.f32 %v6955_v38, %v7033_v14 }
 0x176   : > { %v7036_v16 = vpop.permute.xlu0 %1282 }
 0x177   : > { %v1453_v26 = vmul.f32 %v6952_v37, %v7036_v16  ;;  %v1454_v27 = vmul.f32 %v6955_v38, %v7036_v16 }
 0x178   : > { %1660 = vperm.xlu1 %5824, %v6897_v15   ;;  %v7039_v18 = vpop.permute.xlu1 %1576 }
 0x179   : > { %v1721_v22 = vmul.f32 %v6946_v35, %v7039_v18  ;;  %v1722_v23 = vmul.f32 %v6949_v36, %v7039_v18 }
 0x17a   : > { %v7050_v15 = vpop.permute.xlu0 %1287 }
 0x17b   : > { %v7062_v30 = vadd.f32 %v1721_v22, %v1449_v19  ;;  %v7064_v33 = vadd.f32 %v1722_v23, %v1450_v21  ;;  %v1457_v34 = vmul.f32 %v6952_v37, %v7050_v15  ;;  %v1458_v39 = vmul.f32 %v6955_v38, %v7050_v15 }
 0x17c   : > { %5825 = vset.pattern.permute.xlu1 %v8568_v0 }
 0x17d   : > { %1392 = vperm.xlu1 %5825, %v570_v17   ;;  %v7060_v28 = vpop.permute.xlu1 %1580  ;;  %8647 = vst [vmem:[#allocation36_spill] sm:$0xff] %v7062_v30  ;;  %8648 = vst [vmem:[#allocation37_spill] sm:$0xff] %v7064_v33  ;;  %v7077_v45 = vadd.f32 %v1729_v24, %v1457_v34  ;;  %v7079_v46 = vadd.f32 %v1730_v25, %v1458_v39  ;;  %v5943_v33 = vld [vmem:[%s8544_s2 + $0xec] ss:$16 sps:$4 sm:$0xff]  }
 0x17e   : > { %v7071_v42 = vpop.permute.xlu0 %1302  ;;  %v1725_v43 = vmul.f32 %v6946_v35, %v7060_v28  ;;  %v1726_v44 = vmul.f32 %v6949_v36, %v7060_v28 }
 0x17f   : > { %8649 = vst [vmem:[#allocation38_spill] sm:$0xff] %v7077_v45  ;;  %8650 = vst [vmem:[#allocation39_spill] sm:$0xff] %v7079_v46  ;;  %v5940_v46 = vld [vmem:[%s8544_s2 + $0xcc] ss:$16 sps:$4 sm:$0xff]  }
 0x180   : > { %v7081_v51 = vadd.f32 %v1725_v43, %v1453_v26  ;;  %v7083_v52 = vadd.f32 %v1726_v44, %v1454_v27  ;;  %v574_v26 = vld [vmem:[%s6805_s15 + $0xf8] sm:$0xff] }
 0x181   : > { %5828 = vset.pattern.permute.xlu1 %v6464_v1 }
 0x182   : > { %1668 = vperm.xlu1 %5828, %v570_v17   ;;  %8651 = vst [vmem:[#allocation40_spill] sm:$0xff] %v7081_v51  ;;  %8652 = vst [vmem:[#allocation41_spill] sm:$0xff] %v7083_v52  ;;  %v7085_v53 = vpop.permute.xlu1 %1292  ;;  %v7088_v58 = vpop.permute.xlu0 %1307 }
 0x183   : > { %v1461_v61 = vmul.f32 %v6952_v37, %v7085_v53  ;;  %v1462_v62 = vmul.f32 %v6955_v38, %v7085_v53  ;;  %v1473_v6 = vmul.f32 %v6952_v37, %v7088_v58  ;;  %v1474_v7 = vmul.f32 %v6955_v38, %v7088_v58 }
 0x186   : > { %5829 = vset.pattern.permute.xlu1 %v8568_v0 }
 0x187   : > { %1397 = vperm.xlu1 %5829, %v571_v54   ;;  %v7091_v60 = vpop.permute.xlu1 %1588  ;;  %v7102_v5 = vpop.permute.xlu0 %1600 }
 0x188   : > { %v1733_v2 = vmul.f32 %v6946_v35, %v7091_v60  ;;  %v1734_v3 = vmul.f32 %v6949_v36, %v7091_v60  ;;  %v1745_v19 = vmul.f32 %v6946_v35, %v7102_v5  ;;  %v1746_v21 = vmul.f32 %v6949_v36, %v7102_v5 }
 0x18a   : > { %v7108_v8 = vadd.f32 %v1733_v2, %v1461_v61  ;;  %v7110_v17 = vadd.f32 %v1734_v3, %v1462_v62  ;;  %v7121_v24 = vadd.f32 %v1745_v19, %v1473_v6  ;;  %v7123_v25 = vadd.f32 %v1746_v21, %v1474_v7  ;;  %v5924_v61 = vld [vmem:[%s8544_s2 + $0x8] ss:$16 sps:$4 sm:$0xff]  }
 0x18b   : > { %5830 = vset.pattern.permute.xlu1 %v6464_v1  ;;  %v1469_v3 = vmul.f32 %v6952_v37, %v7071_v42  ;;  %v1470_v6 = vmul.f32 %v6955_v38, %v7071_v42 }
 0x18c   : > { %1672 = vperm.xlu1 %5830, %v571_v54   ;;  %8653 = vst [vmem:[#allocation42_spill] sm:$0xff] %v7108_v8  ;;  %8654 = vst [vmem:[#allocation43_spill] sm:$0xff] %v7110_v17  ;;  %v5922_v54 = vld [vmem:[%s8544_s2 + $0xc] ss:$16 sps:$4 sm:$0xff]  }
 0x18d   : > { %v7116_v22 = vpop.permute.xlu1 %1297  ;;  %8655 = vst [vmem:[#allocation44_spill] sm:$0xff] %v7121_v24  ;;  %8656 = vst [vmem:[#allocation45_spill] sm:$0xff] %v7123_v25  ;;  %1062 = vmatprep.subr.bf16.mxu1 %v5922_v54 }
 0x18e   : > { %v7118_v23 = vpop.permute.xlu0 %1616  ;;  %v1465_v27 = vmul.f32 %v6952_v37, %v7116_v22  ;;  %v1466_v34 = vmul.f32 %v6955_v38, %v7116_v22  ;;  %1063 = vmatpush1.bf16.msra.mxu1 %v5924_v61  ;;  %v5927_v61 = vld [vmem:[%s8544_s2 + $0x28] ss:$16 sps:$4 sm:$0xff]  }
 0x18f   : > { %v1761_v19 = vmul.f32 %v6946_v35, %v7118_v23  ;;  %v1762_v21 = vmul.f32 %v6949_v36, %v7118_v23 }
 0x190   : > { %1676 = vperm.xlu1 %5830, %v6912_v20  }
 0x192   : > { %v7130_v39 = vpop.permute.xlu1 %1592 }
 0x193   : > { %v7133_v43 = vpop.permute.xlu0 %1322  ;;  %v1737_v20 = vmul.f32 %v6946_v35, %v7130_v39  ;;  %v1738_v44 = vmul.f32 %v6949_v36, %v7130_v39 }
 0x194   : > { %5831 = vset.pattern.permute.xlu1 %v8568_v0 }
 0x195   : > { %1412 = vperm.xlu1 %5831, %v574_v26   ;;  %v7145_v62 = vadd.f32 %v1737_v20, %v1465_v27  ;;  %v7147_v2 = vadd.f32 %v1738_v44, %v1466_v34  ;;  %v5925_v20 = vld [vmem:[%s8544_s2 + $0x2c] ss:$16 sps:$4 sm:$0xff]  }
 0x196   : > { %v7153_v7 = vpop.permute.xlu1 %1596  ;;  %1064 = vmatprep.subr.bf16.mxu1 %v5925_v20  ;;  %v5933_v20 = vld [vmem:[%s8544_s2 + $0x68] ss:$16 sps:$4 sm:$0xff]  }
 0x197   : > { %8657 = vst [vmem:[#allocation46_spill] sm:$0xff] %v7145_v62  ;;  %8658 = vst [vmem:[#allocation47_spill] sm:$0xff] %v7147_v2  ;;  %v7159_v0 = vpop.permute.xlu0 %1327  ;;  %v1741_v27 = vmul.f32 %v6946_v35, %v7153_v7  ;;  %v1742_v34 = vmul.f32 %v6949_v36, %v7153_v7  ;;  %1065 = vmatpush1.bf16.msra.mxu1 %v5927_v61 }
 0x198   : > { %v1489_v44 = vmul.f32 %v6952_v37, %v7159_v0  ;;  %v1490_v54 = vmul.f32 %v6955_v38, %v7159_v0 }
 0x199   : > { %5833 = vset.pattern.permute.xlu1 %v6464_v1  ;;  %v7176_v25 = vadd.f32 %v1741_v27, %v1469_v3  ;;  %v7178_v24 = vadd.f32 %v1742_v34, %v1470_v6  ;;  %v5930_v3 = vld [vmem:[%s8544_s2 + $0x48] ss:$16 sps:$4 sm:$0xff]   ;;  %v5931_v27 = vld [vmem:[%s8544_s2 + $0x6c] ss:$16 sps:$4 sm:$0xff]  }
 0x19a   : > { %1684 = vperm.xlu1 %5833, %v574_v26   ;;  %v7180_v1 = vadd.f32 %v1761_v19, %v1489_v44  ;;  %v7182_v2 = vadd.f32 %v1762_v21, %v1490_v54  ;;  %v5928_v26 = vld [vmem:[%s8544_s2 + $0x4c] ss:$16 sps:$4 sm:$0xff]  }
 0x19b   : > { %8659 = vst [vmem:[#allocation48_spill] sm:$0xff] %v7176_v25  ;;  %8660 = vst [vmem:[#allocation49_spill] sm:$0xff] %v7178_v24  ;;  %v7184_v62 = vpop.permute.xlu1 %1312  ;;  %1066 = vmatprep.subr.bf16.mxu1 %v5928_v26 }
 0x19c   : > { %8661 = vst [vmem:[#allocation50_spill] sm:$0xff] %v7180_v1  ;;  %8662 = vst [vmem:[#allocation51_spill] sm:$0xff] %v7182_v2  ;;  %1067 = vmatpush1.bf16.msra.mxu1 %v5930_v3  ;;  %v1477_v6 = vmul.f32 %v6952_v37, %v7184_v62  ;;  %v1478_v19 = vmul.f32 %v6955_v38, %v7184_v62  ;;  %v5934_v3 = vld [vmem:[%s8544_s2 + $0x8c] ss:$16 sps:$4 sm:$0xff]   ;;  %v5936_v1 = vld [vmem:[%s8544_s2 + $0x88] ss:$16 sps:$4 sm:$0xff]  }
 0x19d   : > { %v7189_v17 = vpop.permute.xlu0 %1342  ;;  %1068 = vmatprep.subr.bf16.mxu1 %v5931_v27 }
 0x19e   : > { %8663 = vst [vmem:[#allocation52_spill] sm:$0xff] %v7189_v17 }
 0x1a0   : > { %v7198_v21 = vpop.permute.xlu1 %1604  ;;  %1069 = vmatpush1.bf16.msra.mxu1 %v5933_v20 }
 0x1a1   : > { %v7203_v34 = vpop.permute.xlu0 %1347  ;;  %v1749_v44 = vmul.f32 %v6946_v35, %v7198_v21  ;;  %v1750_v54 = vmul.f32 %v6949_v36, %v7198_v21  ;;  %1070 = vmatprep.subr.bf16.mxu1 %v5934_v3 }
 0x1a2   : > { %8664 = vst [vmem:[#allocation53_spill] sm:$0xff] %v7203_v34  ;;  %v1505_v24 = vmul.f32 %v6952_v37, %v7203_v34  ;;  %v1506_v27 = vmul.f32 %v6955_v38, %v7203_v34  ;;  %v1502_v34 = vmul.f32 %v6955_v38, %v7189_v17 }
 0x1a3   : > { %v7212_v61 = vadd.f32 %v1749_v44, %v1477_v6  ;;  %v7214_v26 = vadd.f32 %v1750_v54, %v1478_v19  ;;  %v5937_v44 = vld [vmem:[%s8544_s2 + $0xac] ss:$16 sps:$4 sm:$0xff]   ;;  %v5939_v54 = vld [vmem:[%s8544_s2 + $0xa8] ss:$16 sps:$4 sm:$0xff]  }
 0x1a4   : > { %1071 = vmatpush1.bf16.msra.mxu1 %v5936_v1 }
 0x1a5   : > { %8665 = vst [vmem:[#allocation54_spill] sm:$0xff] %v7212_v61  ;;  %8666 = vst [vmem:[#allocation55_spill] sm:$0xff] %v7214_v26  ;;  %1072 = vmatprep.subr.bf16.mxu1 %v5937_v44  ;;  %v1486_v44 = vmul.f32 %v6955_v38, %v7133_v43 }
 0x1a6   : > { %v7219_v2 = vpop.permute.xlu1 %1317 }
 0x1a7   : > { %8667 = vst [vmem:[#allocation56_spill] sm:$0xff] %v7219_v2  ;;  %v7228_v6 = vpop.permute.xlu0 %1632  ;;  %v1481_v25 = vmul.f32 %v6952_v37, %v7219_v2  ;;  %v1482_v8 = vmul.f32 %v6955_v38, %v7219_v2 }
 0x1a8   : > { %8668 = vst [vmem:[#allocation57_spill] sm:$0xff] %v7228_v6  ;;  %v1777_v19 = vmul.f32 %v6946_v35, %v7228_v6  ;;  %v1778_v20 = vmul.f32 %v6949_v36, %v7228_v6  ;;  %1073 = vmatpush1.bf16.msra.mxu1 %v5939_v54  ;;  %v5951_v6 = vld [vmem:[#allocation5 + $0x14] ss:$8 sps:$4 sm:$0xff]  }
 0x1a9   : > { %1074 = vmatprep.subr.bf16.mxu1 %v5940_v46  ;;  %v5945_v46 = vld [vmem:[%s8544_s2 + $0xe8] ss:$16 sps:$4 sm:$0xff]  }
 0x1aa   : > { %v7240_v26 = vadd.f32 %v1777_v19, %v1505_v24  ;;  %v7242_v61 = vadd.f32 %v1778_v20, %v1506_v27  ;;  %v5942_v19 = vld [vmem:[%s8544_s2 + $0xc8] ss:$16 sps:$4 sm:$0xff]   ;;  %v1485_v20 = vmul.f32 %v6952_v37, %v7133_v43 }
 0x1ab   : > { %v7244_v3 = vpop.permute.xlu1 %1608 }
 0x1ac   : > { %8669 = vst [vmem:[#allocation58_spill] sm:$0xff] %v7240_v26  ;;  %8670 = vst [vmem:[#allocation59_spill] sm:$0xff] %v7242_v61  ;;  %v7246_v1 = vpop.permute.xlu0 %1648  ;;  %v1753_v24 = vmul.f32 %v6946_v35, %v7244_v3  ;;  %v1754_v27 = vmul.f32 %v6949_v36, %v7244_v3  ;;  %1075 = vmatpush1.bf16.msra.mxu1 %v5942_v19 }
 0x1ad   : > { %8671 = vst [vmem:[#allocation60_spill] sm:$0xff] %v7244_v3  ;;  %8672 = vst [vmem:[#allocation61_spill] sm:$0xff] %v7246_v1  ;;  %1076 = vmatprep.subr.bf16.mxu1 %v5943_v33  ;;  %v1793_v19 = vmul.f32 %v6946_v35, %v7246_v1  ;;  %v575_v33 = vld [vmem:[%s8551_s9] sm:$0xff] }
 0x1ae   : > { %v7268_v61 = vadd.f32 %v1753_v24, %v1481_v25  ;;  %v7270_v26 = vadd.f32 %v1754_v27, %v1482_v8  ;;  %v7322_v12 = vrot.slane %v575_v33, %v6936_v32 }
 0x1af   : > { %v7266_v54 = vpop.permute.xlu1 %1612 }
 0x1b0   : > { %8673 = vst [vmem:[#allocation62_spill] sm:$0xff] %v7266_v54  ;;  %8674 = vst [vmem:[#allocation63_spill] sm:$0xff] %v7268_v61  ;;  %v1757_v52 = vmul.f32 %v6946_v35, %v7266_v54  ;;  %v1758_v51 = vmul.f32 %v6949_v36, %v7266_v54  ;;  %1077 = vmatpush1.bf16.msra.mxu1 %v5945_v46  ;;  %v1703_v50 = vmul.f32 %v7322_v12, %v6959_v40 }
 0x1b1   : > { %8675 = vst [vmem:[#allocation64_spill] sm:$0xff] %v7270_v26  ;;  %v7272_v45 = vpop.permute.xlu0 %1362  ;;  %v1794_v26 = vmul.f32 %v6949_v36, %v7246_v1  ;;  %v5949_v1 = vld [vmem:[#allocation5 + $0x10] ss:$8 sps:$4 sm:$0xff]  }
 0x1b2   : > { %v7284_v8 = vadd.f32 %v1757_v52, %v1485_v20  ;;  %v7286_v25 = vadd.f32 %v1758_v51, %v1486_v44  ;;  %v6154_v51 = vld [vmem:[%s6800_s29] sm:$0xff]   ;;  %v576_v20 = vld [vmem:[%s8551_s9 + $0x8] sm:$0xff]  ;;  %v8680_v44 = vmov 0  }
 0x1b3   : > { %1095 = vmatmul.mubr.bf16.vlgmr.msra.gmra.mrb[0].mxu1 %v6154_v51  ;;  %v7319_v51 = vrot.slane %v575_v33, %v6933_v31  ;;  %v7329_v59 = vrot.slane %v576_v20, %v6933_v31 }
 0x1b4   : > { %8676 = vst [vmem:[#allocation65_spill] sm:$0xff] %v7284_v8  ;;  %8677 = vst [vmem:[#allocation66_spill] sm:$0xff] %v7286_v25  ;;  %v7288_v24 = vpop.permute.xlu1 %1332  ;;  %1104 = vmatprep.mubr.bf16.mxu1 %v8680_v44 }
 0x1b5   : > { %8678 = vst [vmem:[#allocation67_spill] sm:$0xff] %v7288_v24  ;;  %v7290_v27 = vpop.permute.xlu0 %1367  ;;  %v1493_v46 = vmul.f32 %v6952_v37, %v7288_v24  ;;  %v1494_v25 = vmul.f32 %v6955_v38, %v7288_v24  ;;  %v1431_v56 = vmul.f32 %v7319_v51, %v6961_v41  ;;  %v1432_v29 = vmul.f32 %v7329_v59, %v6961_v41 }
 0x1b6   : > { %8679 = vst [vmem:[#allocation68_spill] sm:$0xff] %v7290_v27  ;;  %v1521_v61 = vmul.f32 %v6952_v37, %v7290_v27  ;;  %v1522_v52 = vmul.f32 %v6955_v38, %v7290_v27 }
 0x1b8   : > { %v7312_v8 = vadd.f32 %v1793_v19, %v1521_v61  ;;  %v7314_v30 = vadd.f32 %v1794_v26, %v1522_v52  ;;  %v7332_v61 = vrot.slane %v576_v20, %v6936_v32  ;;  %v5946_v19 = vld [vmem:[#allocation5] ss:$8 sps:$4 sm:$0xff]   ;;  %v5948_v52 = vld [vmem:[#allocation5 + $0x4] ss:$8 sps:$4 sm:$0xff]   ;;  %v1436_v32 = vmul.f32 %v7329_v59, %v6975_v48 }
 0x1b9   : > { %v7316_v13 = vpop.permute.xlu1 %1620  ;;  %v7334_v26 = vpop.permute.xlu0 %1382  ;;  %2880 = vmatprep.subr.bf16.mxu1 %v5948_v52  ;;  %v580_v20 = vld [vmem:[#allocation13 + $0x8] sm:$0xff]  ;;  %v1707_v52 = vmul.f32 %v7322_v12, %v6973_v47 }
 0x1ba   : > { %8681 = vst [vmem:[#allocation69_spill] sm:$0xff] %v7312_v8  ;;  %8682 = vst [vmem:[#allocation70_spill] sm:$0xff] %v7314_v30  ;;  %v1765_v10 = vmul.f32 %v6946_v35, %v7316_v13  ;;  %v1766_v9 = vmul.f32 %v6949_v36, %v7316_v13  ;;  %v579_v8 = vld [vmem:[#allocation13] sm:$0xff]  ;;  %2881 = vmatpush1.bf16.msra.mxu1 %v5946_v19  ;;  %v7362_v41 = vrot.slane %v580_v20, %v6933_v31 }
 0x1bb   : > { %8683 = vst [vmem:[#allocation71_spill] sm:$0xff] %v7316_v13  ;;  %8684 = vst [vmem:[#allocation72_spill] sm:$0xff] %v7334_v26  ;;  %v7359_v19 = vrot.slane %v579_v8, %v6933_v31  ;;  %v1708_v8 = vmul.f32 %v7332_v61, %v6973_v47  ;;  %2882 = vmatprep.subr.bf16.mxu1 %v5951_v6  ;;  %v1440_v6 = vmul.f32 %v7329_v59, %v6991_v55 }
 0x1bc   : > { %v7336_v30 = vadd.f32 %v1765_v10, %v1493_v46  ;;  %v7338_v33 = vadd.f32 %v1766_v9, %v1494_v25  ;;  %v1704_v10 = vmul.f32 %v7332_v61, %v6959_v40  ;;  %v6155_v25 = vld [vmem:[%s6800_s29 + $0x8] sm:$0xff]   ;;  %v1435_v46 = vmul.f32 %v7319_v51, %v6975_v48 }
 0x1bd   : > { %1105 = vmatmul.mubr.bf16.gmra.mrb[4].mxu1 %v6155_v25  ;;  %v1712_v13 = vmul.f32 %v7332_v61, %v7006_v63 }
 0x1be   : > { %8685 = vst [vmem:[#allocation73_spill] sm:$0xff] %v7336_v30  ;;  %8686 = vst [vmem:[#allocation74_spill] sm:$0xff] %v7338_v33  ;;  %v7344_v49 = vpop.permute.xlu1 %1337  ;;  %v7350_v9 = vpop.permute.xlu0 %1664  ;;  %1114 = vmatprep.mubr.bf16.mxu1 %v8680_v44  ;;  %v1831_v33 = vadd.f32 %v1703_v50, %v1431_v56  ;;  %v1832_v30 = vadd.f32 %v1704_v10, %v1432_v29  ;;  %v7376_v56 = vadd.f32 %v1707_v52, %v1435_v46 }
 0x1bf   : > { %8687 = vst [vmem:[#allocation75_spill] sm:$0xff] %v7344_v49  ;;  %8688 = vst [vmem:[#allocation76_spill] sm:$0xff] %v7350_v9  ;;  %v1497_v40 = vmul.f32 %v6952_v37, %v7344_v49  ;;  %v1498_v25 = vmul.f32 %v6955_v38, %v7344_v49  ;;  %v1809_v50 = vmul.f32 %v6946_v35, %v7350_v9  ;;  %2883 = vmatpush1.bf16.msra.mxu1 %v5949_v1 }
 0x1c0   : > { %v1810_v31 = vmul.f32 %v6949_v36, %v7350_v9  ;;  %v1439_v10 = vmul.f32 %v7319_v51, %v6991_v55  ;;  %v1711_v9 = vmul.f32 %v7322_v12, %v7006_v63 }
 0x1c3   : > { %v7370_v27 = vpop.permute.xlu1 %1624 }
 0x1c4   : > { %8689 = vst [vmem:[#allocation77_spill] sm:$0xff] %v7370_v27  ;;  %v7380_v20 = vpop.permute.xlu0 %1387  ;;  %v1769_v29 = vmul.f32 %v6946_v35, %v7370_v27  ;;  %v1770_v48 = vmul.f32 %v6949_v36, %v7370_v27  ;;  %v1501_v27 = vmul.f32 %v6952_v37, %v7189_v17 }
 0x1c5   : > { %8690 = vst [vmem:[#allocation78_spill] sm:$0xff] %v7380_v20  ;;  %v1537_v46 = vmul.f32 %v6952_v37, %v7380_v20  ;;  %v1538_v47 = vmul.f32 %v6955_v38, %v7380_v20  ;;  %v6156_v20 = vld [vmem:[%s6800_s29 + $0x10] sm:$0xff]  }
 0x1c6   : > { %v7394_v52 = vadd.f32 %v1769_v29, %v1497_v40  ;;  %v7396_v49 = vadd.f32 %v1770_v48, %v1498_v25  ;;  %1115 = vmatmul.mubr.bf16.gmra.mrb[8].mxu1 %v6156_v20  ;;  %v1836_v25 = vadd.f32 %v1708_v8, %v1436_v32  ;;  %v1443_v29 = vmul.f32 %v7319_v51, %v6995_v57 }
 0x1c7   : > { %v7406_v24 = vpop.permute.xlu1 %1628  ;;  %v7409_v1 = vadd.f32 %v1809_v50, %v1537_v46  ;;  %v7411_v40 = vadd.f32 %v1810_v31, %v1538_v47  ;;  %1124 = vmatprep.mubr.bf16.mxu1 %v8680_v44  ;;  %v1715_v50 = vmul.f32 %v7322_v12, %v7012_v4  ;;  %v1444_v32 = vmul.f32 %v7329_v59, %v6995_v57 }
 0x1c8   : > { %8691 = vst [vmem:[#allocation79_spill] sm:$0xff] %v7394_v52  ;;  %8692 = vst [vmem:[#allocation80_spill] sm:$0xff] %v7396_v49  ;;  %v7415_v48 = vpop.permute.xlu0 %1402  ;;  %v1773_v55 = vmul.f32 %v6946_v35, %v7406_v24  ;;  %v1774_v63 = vmul.f32 %v6949_v36, %v7406_v24  ;;  %v7422_v49 = vadd.f32 %v1711_v9, %v1439_v10 }
 0x1c9   : > { %8693 = vst [vmem:[#allocation81_spill] sm:$0xff] %v7406_v24  ;;  %8694 = vst [vmem:[#allocation82_spill] sm:$0xff] %v7409_v1  ;;  %v1716_v31 = vmul.f32 %v7332_v61, %v7012_v4  ;;  %v1447_v8 = vmul.f32 %v7319_v51, %v7033_v14  ;;  %v1719_v20 = vmul.f32 %v7322_v12, %v7039_v18  ;;  %v5954_v1 = vld [vmem:[#allocation5 + $0x24] ss:$8 sps:$4 sm:$0xff]  }
 0x1ca   : > { %8695 = vst [vmem:[#allocation83_spill] sm:$0xff] %v7411_v40  ;;  %8696 = vst [vmem:[#allocation84_spill] sm:$0xff] %v7415_v48  ;;  %v7434_v46 = vadd.f32 %v1773_v55, %v1501_v27  ;;  %v7436_v47 = vadd.f32 %v1774_v63, %v1502_v34  ;;  %v7438_v9 = vadd.f32 %v1712_v13, %v1440_v6  ;;  %v5952_v40 = vld [vmem:[#allocation5 + $0x20] ss:$8 sps:$4 sm:$0xff]   ;;  %2884 = vmatprep.subr.bf16.mxu1 %v5954_v1 }
 0x1cb   : > { %v1448_v10 = vmul.f32 %v7329_v59, %v7033_v14  ;;  %v1720_v57 = vmul.f32 %v7332_v61, %v7039_v18  ;;  %v1727_v4 = vmul.f32 %v7322_v12, %v7027_v11  ;;  %v1451_v27 = vmul.f32 %v7319_v51, %v7036_v16  ;;  %v5957_v18 = vld [vmem:[#allocation5 + $0x34] ss:$8 sps:$4 sm:$0xff]   ;;  %2885 = vmatpush1.bf16.msra.mxu1 %v5952_v40 }
 0x1cc   : > { %8697 = vst [vmem:[#allocation85_spill] sm:$0xff] %v7434_v46  ;;  %8698 = vst [vmem:[#allocation86_spill] sm:$0xff] %v7436_v47  ;;  %v1455_v34 = vmul.f32 %v7319_v51, %v7050_v15  ;;  %v1456_v13 = vmul.f32 %v7329_v59, %v7050_v15  ;;  %v1728_v14 = vmul.f32 %v7332_v61, %v7027_v11  ;;  %v7454_v6 = vpop.permute.xlu1 %1352  ;;  %2886 = vmatprep.subr.bf16.mxu1 %v5957_v18 }
 0x1cd   : > { %v1723_v47 = vmul.f32 %v7322_v12, %v7060_v28  ;;  %v1452_v46 = vmul.f32 %v7329_v59, %v7036_v16  ;;  %v1724_v48 = vmul.f32 %v7332_v61, %v7060_v28  ;;  %v1843_v17 = vadd.f32 %v1715_v50, %v1443_v29  ;;  %v6157_v28 = vld [vmem:[%s6800_s29 + $0x18] sm:$0xff]  }
 0x1ce   : > { %v7462_v11 = vadd.f32 %v1716_v31, %v1444_v32  ;;  %v7464_v26 = vadd.f32 %v1719_v20, %v1447_v8  ;;  %v7470_v2 = vadd.f32 %v1720_v57, %v1448_v10  ;;  %1125 = vmatmul.mubr.bf16.gmra.mrb[12].mxu1 %v6157_v28  ;;  %v7474_v29 = vadd.f32 %v1727_v4, %v1455_v34  ;;  %v5960_v31 = vld [vmem:[#allocation5 + $0x44] ss:$8 sps:$4 sm:$0xff]  }
 0x1cf   : > { %v903_v52 = vpop.f32.mrb[0].mxu0  ;;  %v7476_v50 = vadd.f32 %v1728_v14, %v1456_v13  ;;  %1134 = vmatprep.mubr.bf16.mxu1 %v8680_v44  ;;  %v7480_v32 = vadd.f32 %v1723_v47, %v1451_v27  ;;  %v7497_v20 = vmul.f32 %v7329_v59, %v7071_v42  ;;  %v1731_v57 = vmul.f32 %v7322_v12, %v7091_v60 }
 0x1d0   : > { %v1959_v55 = vadd.f32 %v1831_v33, %v903_v52  ;;  %v905_v63 = vpop.f32.mrb[1].mxu0  ;;  %v7466_v33 = vpop.permute.xlu0 %1407  ;;  %v5955_v52 = vld [vmem:[#allocation5 + $0x30] ss:$8 sps:$4 sm:$0xff]   ;;  %v7505_v4 = vmul.f32 %v7319_v51, %v7088_v58 }
 0x1d1   : > { %v1960_v15 = vadd.f32 %v1832_v30, %v905_v63  ;;  %v907_v24 = vpop.f32.mrb[2].mxu0  ;;  %8699 = vst [vmem:[#allocation87_spill] sm:$0xff] %v7466_v33  ;;  %2887 = vmatpush1.bf16.msra.mxu1 %v5955_v52  ;;  %v5963_v63 = vld [vmem:[#allocation5 + $0x54] ss:$8 sps:$4 sm:$0xff]  }
 0x1d2   : > { %v2031_v54 = vadd.f32 %v7359_v19, %v1959_v55  ;;  %v1961_v16 = vadd.f32 %v7376_v56, %v907_v24  ;;  %v909_v3 = vpop.f32.mrb[3].mxu0  ;;  %v7482_v24 = vadd.f32 %v1724_v48, %v1452_v46  ;;  %v7486_v56 = vmul.f32 %v7319_v51, %v7071_v42  ;;  %v7499_v48 = vpop.permute.xlu1 %1636  ;;  %v5958_v46 = vld [vmem:[#allocation5 + $0x40] ss:$8 sps:$4 sm:$0xff]   ;;  %2888 = vmatprep.subr.bf16.mxu1 %v5960_v31 }
 0x1d3   : > { %v2032_v30 = vadd.f32 %v7362_v41, %v1960_v15  ;;  %v1962_v1 = vadd.f32 %v1836_v25, %v909_v3  ;;  %v1459_v3 = vmul.f32 %v7319_v51, %v7085_v53  ;;  %v7493_v25 = vmul.f32 %v7329_v59, %v7085_v53 }
 0x1d4   : > { %v2033_v40 = vadd.f32 %v7359_v19, %v1961_v16  ;;  %v2095_v47 = vmax.f32 %v2031_v54, 0.0  ;;  %v7507_v13 = vpop.permute.xlu0 %1680  ;;  %v1509_v42 = vmul.f32 %v6952_v37, %v7454_v6  ;;  %v1510_v54 = vmul.f32 %v6955_v38, %v7454_v6 }
 0x1d5   : > { %v2034_v8 = vadd.f32 %v7362_v41, %v1962_v1  ;;  %v2096_v53 = vmax.f32 %v2032_v30, 0.0  ;;  %8700 = vst [vmem:[#allocation88_spill] sm:$0xff] %v7507_v13  ;;  %v1781_v15 = vmul.f32 %v6946_v35, %v7499_v48  ;;  %v1782_v52 = vmul.f32 %v6949_v36, %v7499_v48  ;;  %2889 = vmatpush1.bf16.msra.mxu1 %v5958_v46  ;;  %v5966_v46 = vld [vmem:[#allocation5 + $0x64] ss:$8 sps:$4 sm:$0xff]  }
 0x1d6   : > { %v2097_v10 = vmax.f32 %v2033_v40, 0.0  ;;  %v7519_v1 = vpop.permute.xlu1 %1357  ;;  %v5961_v40 = vld [vmem:[#allocation5 + $0x50] ss:$8 sps:$4 sm:$0xff]   ;;  %v1554_v31 = vmul.f32 %v6955_v38, %v7466_v33  ;;  %2890 = vmatprep.subr.bf16.mxu1 %v5963_v63 }
 0x1d7   : > { %v2098_v27 = vmax.f32 %v2034_v8, 0.0  ;;  %v913_v34 = vpop.f32.mrb[4].mxu0 }
 0x1d8   : > { %v2159_v14 = vpack.c.bf16 %v2097_v10, %v2095_v47  ;;  %v1963_v18 = vadd.f32 %v7422_v49, %v913_v34  ;;  %v915_v55 = vpop.f32.mrb[5].mxu0  ;;  %v1553_v49 = vmul.f32 %v6952_v37, %v7466_v33  ;;  %v1825_v34 = vmul.f32 %v6946_v35, %v7507_v13 }
 0x1d9   : > { %v1964_v16 = vadd.f32 %v7438_v9, %v915_v55  ;;  %v917_v28 = vpop.f32.mrb[6].mxu0  ;;  %v2160_v30 = vpack.c.bf16 %v2098_v27, %v2096_v53  ;;  %v1826_v9 = vmul.f32 %v6949_v36, %v7507_v13  ;;  %v6158_v53 = vld [vmem:[%s6800_s29 + $0x20] sm:$0xff]   ;;  %v1472_v33 = vmul.f32 %v7329_v59, %v7088_v58  ;;  %2891 = vmatpush1.bf16.msra.mxu1 %v5961_v40 }
 0x1da   : > { %v2035_v8 = vadd.f32 %v7359_v19, %v1963_v18  ;;  %v1965_v47 = vadd.f32 %v1843_v17, %v917_v28  ;;  %v919_v10 = vpop.f32.mrb[7].mxu0  ;;  %1135 = vmatmul.mubr.bf16.gmra.mrb[16].mxu1 %v6158_v53  ;;  %v7537_v18 = vadd.f32 %v1781_v15, %v1509_v42  ;;  %v7539_v28 = vadd.f32 %v1782_v52, %v1510_v54  ;;  %v5964_v58 = vld [vmem:[#allocation5 + $0x60] ss:$8 sps:$4 sm:$0xff]  }
 0x1db   : > { %v2036_v27 = vadd.f32 %v7362_v41, %v1964_v16  ;;  %v1966_v55 = vadd.f32 %v7462_v11, %v919_v10  ;;  %2423 = vmatprep.mubr.bf16.mxu0 %v2160_v30  ;;  %1144 = vmatprep.mubr.bf16.mxu1 %v8680_v44  ;;  %v7542_v16 = vadd.f32 %v1731_v57, %v1459_v3  ;;  %v7546_v10 = vpop.permute.xlu1 %1640 }
 0x1dc   : > { %v2037_v17 = vadd.f32 %v7359_v19, %v1965_v47  ;;  %2424 = vmatmul.mubr.bf16.vlgmr.msra.gmra.mrb[64].mxu0 %v2159_v14  ;;  %v2099_v53 = vmax.f32 %v2035_v8, 0.0  ;;  %v1732_v11 = vmul.f32 %v7332_v61, %v7091_v60  ;;  %2892 = vmatprep.subr.bf16.mxu1 %v5966_v46  ;;  %v5969_v14 = vld [vmem:[#allocation5 + $0x74] ss:$8 sps:$4 sm:$0xff]   ;;  %v1513_v42 = vmul.f32 %v6952_v37, %v7519_v1 }
 0x1dd   : > { %v2038_v13 = vadd.f32 %v7362_v41, %v1966_v55  ;;  %v7550_v54 = vadd.f32 %v1825_v34, %v1553_v49  ;;  %v7552_v63 = vadd.f32 %v1826_v9, %v1554_v31  ;;  %v2100_v15 = vmax.f32 %v2036_v27, 0.0  ;;  %2893 = vmatpush1.bf16.msra.mxu1 %v5964_v58  ;;  %v5967_v27 = vld [vmem:[#allocation5 + $0x70] ss:$8 sps:$4 sm:$0xff]  }
 0x1de   : > { %v2101_v30 = vmax.f32 %v2037_v17, 0.0  ;;  %v1743_v60 = vmul.f32 %v7322_v12, %v7102_v5  ;;  %v1785_v52 = vmul.f32 %v6946_v35, %v7546_v10  ;;  %v1514_v49 = vmul.f32 %v6955_v38, %v7519_v1  ;;  %2894 = vmatprep.subr.bf16.mxu1 %v5969_v14 }
 0x1df   : > { %8701 = vst [vmem:[#allocation89_spill] sm:$0xff] %v7550_v54  ;;  %8702 = vst [vmem:[#allocation90_spill] sm:$0xff] %v7552_v63  ;;  %v2102_v3 = vmax.f32 %v2038_v13, 0.0  ;;  %v923_v57 = vpop.f32.mrb[8].mxu0  ;;  %v1786_v31 = vmul.f32 %v6949_v36, %v7546_v10  ;;  %v1744_v46 = vmul.f32 %v7332_v61, %v7102_v5  ;;  %v5985_v63 = vld [vmem:[#allocation5 + $0xd0] ss:$8 sps:$4 sm:$0xff]  }
 0x1e0   : > { %v1967_v40 = vadd.f32 %v7464_v26, %v923_v57  ;;  %v925_v8 = vpop.f32.mrb[9].mxu0  ;;  %v2161_v47 = vpack.c.bf16 %v2101_v30, %v2099_v53  ;;  %v1517_v26 = vmul.f32 %v6952_v37, %v7272_v45  ;;  %v7570_v30 = vpop.permute.xlu1 %1644  ;;  %v6159_v57 = vld [vmem:[%s6800_s29 + $0x28] sm:$0xff]   ;;  %v8710_v54 = vld [vmem:[#allocation72_spill] sm:$0xff] }
 0x1e1   : > { %v1968_v13 = vadd.f32 %v7470_v2, %v925_v8  ;;  %v927_v34 = vpop.f32.mrb[10].mxu0  ;;  %v2162_v9 = vpack.c.bf16 %v2102_v3, %v2100_v15  ;;  %v5972_v2 = vld [vmem:[#allocation5 + $0x84] ss:$8 sps:$4 sm:$0xff]   ;;  %v7573_v15 = vadd.f32 %v1785_v52, %v1513_v42  ;;  %v1860_v3 = vadd.f32 %v1732_v11, %v7493_v25  ;;  %2895 = vmatpush1.bf16.msra.mxu1 %v5967_v27  ;;  %v5970_v25 = vld [vmem:[#allocation5 + $0x80] ss:$8 sps:$4 sm:$0xff]  }
 0x1e2   : > { %v2039_v55 = vadd.f32 %v7359_v19, %v1967_v40  ;;  %v1969_v17 = vadd.f32 %v7480_v32, %v927_v34  ;;  %v929_v53 = vpop.f32.mrb[11].mxu0  ;;  %1145 = vmatmul.mubr.bf16.gmra.mrb[20].mxu1 %v6159_v57  ;;  %v7579_v40 = vadd.f32 %v1743_v60, %v7505_v4  ;;  %v7583_v8 = vadd.f32 %v1786_v31, %v1514_v49 }
 0x1e3   : > { %v2040_v5 = vadd.f32 %v7362_v41, %v1968_v13  ;;  %v1970_v58 = vadd.f32 %v7482_v24, %v929_v53  ;;  %2433 = vmatprep.mubr.bf16.mxu0 %v2162_v9  ;;  %1154 = vmatprep.mubr.bf16.mxu1 %v8680_v44  ;;  %v1789_v14 = vmul.f32 %v6946_v35, %v7570_v30 }
 0x1e4   : > { %v2041_v32 = vadd.f32 %v7359_v19, %v1969_v17  ;;  %2434 = vmatmul.mubr.bf16.gmra.mrb[68].mxu0 %v2161_v47  ;;  %v1463_v24 = vmul.f32 %v7319_v51, %v7116_v22  ;;  %v7590_v52 = vadd.f32 %v1744_v46, %v1472_v33  ;;  %v1518_v4 = vmul.f32 %v6955_v38, %v7272_v45  ;;  %v5975_v47 = vld [vmem:[#allocation5 + $0x94] ss:$8 sps:$4 sm:$0xff]   ;;  %v7602_v27 = vpop.permute.xlu1 %1372 }
 0x1e5   : > { %v2042_v42 = vadd.f32 %v7362_v41, %v1970_v58  ;;  %v2103_v11 = vmax.f32 %v2039_v55, 0.0  ;;  %2896 = vmatprep.subr.bf16.mxu1 %v5972_v2  ;;  %v7594_v49 = vadd.f32 %v1789_v14, %v1517_v26  ;;  %v1790_v31 = vmul.f32 %v6949_v36, %v7570_v30 }
 0x1e6   : > { %v2105_v60 = vmax.f32 %v2041_v32, 0.0  ;;  %v2104_v13 = vmax.f32 %v2040_v5, 0.0  ;;  %v1735_v33 = vmul.f32 %v7322_v12, %v7130_v39  ;;  %v1464_v46 = vmul.f32 %v7329_v59, %v7116_v22  ;;  %2897 = vmatpush1.bf16.msra.mxu1 %v5970_v25  ;;  %v5973_v32 = vld [vmem:[#allocation5 + $0x90] ss:$8 sps:$4 sm:$0xff]  }
 0x1e7   : > { %8703 = vst [vmem:[#allocation91_spill] sm:$0xff] %v7594_v49  ;;  %v2106_v34 = vmax.f32 %v2042_v42, 0.0  ;;  %v933_v9 = vpop.f32.mrb[12].mxu0  ;;  %v1736_v53 = vmul.f32 %v7332_v61, %v7130_v39  ;;  %v1739_v57 = vmul.f32 %v7322_v12, %v7153_v7  ;;  %v1740_v22 = vmul.f32 %v7332_v61, %v7153_v7  ;;  %2898 = vmatprep.subr.bf16.mxu1 %v5975_v47 }
 0x1e8   : > { %v1971_v55 = vadd.f32 %v7474_v29, %v933_v9  ;;  %v935_v17 = vpop.f32.mrb[13].mxu0  ;;  %v2163_v26 = vpack.c.bf16 %v2105_v60, %v2103_v11  ;;  %v7612_v14 = vadd.f32 %v1790_v31, %v1518_v4  ;;  %v7618_v39 = vmul.f32 %v7322_v12, %v7118_v23  ;;  %v6160_v60 = vld [vmem:[%s6800_s29 + $0x30] sm:$0xff]  }
 0x1e9   : > { %v1972_v2 = vadd.f32 %v7476_v50, %v935_v17  ;;  %v937_v5 = vpop.f32.mrb[14].mxu0  ;;  %v2164_v58 = vpack.c.bf16 %v2106_v34, %v2104_v13  ;;  %v5978_v50 = vld [vmem:[#allocation5 + $0xa4] ss:$8 sps:$4 sm:$0xff]   ;;  %v7624_v25 = vmul.f32 %v7332_v61, %v7118_v23  ;;  %v1863_v4 = vadd.f32 %v1735_v33, %v1463_v24  ;;  %v7628_v31 = vpop.permute.xlu1 %1652  ;;  %v5976_v17 = vld [vmem:[#allocation5 + $0xa0] ss:$8 sps:$4 sm:$0xff]  }
 0x1ea   : > { %8704 = vst [vmem:[#allocation92_spill] sm:$0xff] %v7612_v14  ;;  %v2043_v29 = vadd.f32 %v7359_v19, %v1971_v55  ;;  %v1973_v42 = vadd.f32 %v7542_v16, %v937_v5  ;;  %v939_v11 = vpop.f32.mrb[15].mxu0  ;;  %1155 = vmatmul.mubr.bf16.gmra.mrb[24].mxu1 %v6160_v60  ;;  %v1525_v47 = vmul.f32 %v6952_v37, %v7602_v27 }
 0x1eb   : > { %v2044_v13 = vadd.f32 %v7362_v41, %v1972_v2  ;;  %v1974_v7 = vadd.f32 %v1860_v3, %v939_v11  ;;  %2443 = vmatprep.mubr.bf16.mxu0 %v2164_v58  ;;  %1164 = vmatprep.mubr.bf16.mxu1 %v8680_v44  ;;  %v1526_v34 = vmul.f32 %v6955_v38, %v7602_v27 }
 0x1ec   : > { %v2045_v16 = vadd.f32 %v7359_v19, %v1973_v42  ;;  %2444 = vmatmul.mubr.bf16.gmra.mrb[72].mxu0 %v2163_v26  ;;  %v1864_v9 = vadd.f32 %v1736_v53, %v1464_v46  ;;  %v1867_v23 = vadd.f32 %v1739_v57, %v7486_v56  ;;  %v1868_v55 = vadd.f32 %v1740_v22, %v7497_v20  ;;  %v5981_v22 = vld [vmem:[#allocation5 + $0xb4] ss:$8 sps:$4 sm:$0xff]  }
 0x1ed   : > { %v2046_v3 = vadd.f32 %v7362_v41, %v1974_v7  ;;  %2899 = vmatpush1.bf16.msra.mxu1 %v5973_v32  ;;  %v2107_v2 = vmax.f32 %v2043_v29, 0.0  ;;  %v1797_v24 = vmul.f32 %v6946_v35, %v7628_v31  ;;  %v1798_v33 = vmul.f32 %v6949_v36, %v7628_v31 }
 0x1ee   : > { %v2109_v26 = vmax.f32 %v2045_v16, 0.0  ;;  %2900 = vmatprep.subr.bf16.mxu1 %v5978_v50  ;;  %v2108_v5 = vmax.f32 %v2044_v13, 0.0  ;;  %v1475_v46 = vmul.f32 %v7319_v51, %v7184_v62  ;;  %v1747_v56 = vmul.f32 %v7322_v12, %v7198_v21  ;;  %v7653_v16 = vpop.permute.xlu1 %1377 }
 0x1ef   : > { %v2110_v58 = vmax.f32 %v2046_v3, 0.0  ;;  %v943_v42 = vpop.f32.mrb[16].mxu0  ;;  %v7645_v32 = vadd.f32 %v1797_v24, %v1525_v47  ;;  %v7647_v29 = vadd.f32 %v1798_v33, %v1526_v34  ;;  %v1476_v13 = vmul.f32 %v7329_v59, %v7184_v62  ;;  %v6161_v62 = vld [vmem:[%s6800_s29 + $0x38] sm:$0xff]  }
 0x1f0   : > { %v1975_v20 = vadd.f32 %v1863_v4, %v943_v42  ;;  %v945_v53 = vpop.f32.mrb[17].mxu0  ;;  %v2165_v57 = vpack.c.bf16 %v2109_v26, %v2107_v2  ;;  %v1748_v7 = vmul.f32 %v7332_v61, %v7198_v21  ;;  %v5979_v4 = vld [vmem:[#allocation5 + $0xb0] ss:$8 sps:$4 sm:$0xff]   ;;  %v7658_v34 = vmul.f32 %v7319_v51, %v7133_v43  ;;  %v5984_v26 = vld [vmem:[#allocation5 + $0xc4] ss:$8 sps:$4 sm:$0xff]  }
 0x1f1   : > { %8705 = vst [vmem:[#allocation93_spill] sm:$0xff] %v7645_v32  ;;  %8706 = vst [vmem:[#allocation94_spill] sm:$0xff] %v7647_v29  ;;  %v1976_v11 = vadd.f32 %v1864_v9, %v945_v53  ;;  %v947_v60 = vpop.f32.mrb[18].mxu0  ;;  %v2166_v50 = vpack.c.bf16 %v2110_v58, %v2108_v5  ;;  %2901 = vmatpush1.bf16.msra.mxu1 %v5976_v17  ;;  %v7662_v9 = vmul.f32 %v7329_v59, %v7133_v43  ;;  %v5982_v53 = vld [vmem:[#allocation5 + $0xc0] ss:$8 sps:$4 sm:$0xff]  }
 0x1f2   : > { %v2047_v3 = vadd.f32 %v7359_v19, %v1975_v20  ;;  %v1977_v2 = vadd.f32 %v1867_v23, %v947_v60  ;;  %v949_v47 = vpop.f32.mrb[19].mxu0  ;;  %1165 = vmatmul.mubr.bf16.gmra.mrb[28].mxu1 %v6161_v62  ;;  %v7668_v17 = vmul.f32 %v7319_v51, %v7159_v0  ;;  %v1875_v33 = vadd.f32 %v1747_v56, %v1475_v46  ;;  %v6162_v32 = vld [vmem:[%s6800_s29 + $0x40] sm:$0xff]  }
 0x1f3   : > { %v2048_v21 = vadd.f32 %v7362_v41, %v1976_v11  ;;  %v1978_v24 = vadd.f32 %v1868_v55, %v949_v47  ;;  %2453 = vmatprep.mubr.bf16.mxu0 %v2166_v50  ;;  %1174 = vmatprep.mubr.bf16.mxu1 %v8680_v44  ;;  %v7674_v43 = vmul.f32 %v7329_v59, %v7159_v0  ;;  %v8707_v55 = vld [vmem:[#allocation56_spill] sm:$0xff]  ;;  %v7683_v56 = vpop.permute.xlu1 %1656  ;;  %v5987_v0 = vld [vmem:[#allocation5 + $0xd4] ss:$8 sps:$4 sm:$0xff]  }
 0x1f4   : > { %v2049_v23 = vadd.f32 %v7359_v19, %v1977_v2  ;;  %2454 = vmatmul.mubr.bf16.gmra.mrb[76].mxu0 %v2165_v57  ;;  %2902 = vmatprep.subr.bf16.mxu1 %v5981_v22  ;;  %v1876_v58 = vadd.f32 %v1748_v7, %v1476_v13  ;;  %v1479_v42 = vmul.f32 %v7319_v51, %v8707_v55  ;;  %v2111_v11 = vmax.f32 %v2047_v3, 0.0  ;;  %v8708_v57 = vld [vmem:[#allocation60_spill] sm:$0xff] }
 0x1f5   : > { %v2050_v5 = vadd.f32 %v7362_v41, %v1978_v24  ;;  %v1480_v20 = vmul.f32 %v7329_v59, %v8707_v55  ;;  %2903 = vmatpush1.bf16.msra.mxu1 %v5979_v4  ;;  %v1751_v46 = vmul.f32 %v7322_v12, %v8708_v57  ;;  %v1529_v22 = vmul.f32 %v6952_v37, %v7653_v16  ;;  %v8709_v55 = vld [vmem:[#allocation62_spill] sm:$0xff] }
 0x1f6   : > { %v2113_v60 = vmax.f32 %v2049_v23, 0.0  ;;  %2904 = vmatprep.subr.bf16.mxu1 %v5984_v26  ;;  %v2112_v50 = vmax.f32 %v2048_v21, 0.0  ;;  %v1752_v2 = vmul.f32 %v7332_v61, %v8708_v57  ;;  %v1801_v4 = vmul.f32 %v6946_v35, %v7683_v56 }
 0x1f7   : > { %v2114_v13 = vmax.f32 %v2050_v5, 0.0  ;;  %v953_v7 = vpop.f32.mrb[20].mxu0  ;;  %v1530_v26 = vmul.f32 %v6955_v38, %v7653_v16  ;;  %v1802_v24 = vmul.f32 %v6949_v36, %v7683_v56  ;;  %v1755_v57 = vmul.f32 %v7322_v12, %v8709_v55  ;;  %v7702_v29 = vpop.permute.xlu1 %1660 }
 0x1f8   : > { %v1979_v3 = vadd.f32 %v7579_v40, %v953_v7  ;;  %v955_v47 = vpop.f32.mrb[21].mxu0  ;;  %v2167_v62 = vpack.c.bf16 %v2113_v60, %v2111_v11  ;;  %v1533_v40 = vmul.f32 %v6952_v37, %v8710_v54  ;;  %v1756_v14 = vmul.f32 %v7332_v61, %v8709_v55 }
 0x1f9   : > { %v1980_v21 = vadd.f32 %v7590_v52, %v955_v47  ;;  %v957_v23 = vpop.f32.mrb[22].mxu0  ;;  %v2168_v5 = vpack.c.bf16 %v2114_v13, %v2112_v50  ;;  %2905 = vmatpush1.bf16.msra.mxu1 %v5982_v53  ;;  %v5990_v52 = vld [vmem:[#allocation5 + $0xe4] ss:$8 sps:$4 sm:$0xff]   ;;  %v7705_v47 = vadd.f32 %v1801_v4, %v1529_v22  ;;  %v1879_v53 = vadd.f32 %v1751_v46, %v1479_v42  ;;  %v5988_v42 = vld [vmem:[#allocation5 + $0xe0] ss:$8 sps:$4 sm:$0xff]  }
 0x1fa   : > { %v2051_v11 = vadd.f32 %v7359_v19, %v1979_v3  ;;  %v1981_v60 = vadd.f32 %v1875_v33, %v957_v23  ;;  %v959_v7 = vpop.f32.mrb[23].mxu0  ;;  %1175 = vmatmul.mubr.bf16.gmra.mrb[32].mxu1 %v6162_v32  ;;  %2906 = vmatprep.subr.bf16.mxu1 %v5987_v0  ;;  %v7712_v33 = vadd.f32 %v1802_v24, %v1530_v26 }
 0x1fb   : > { %8711 = vst [vmem:[#allocation56_spill] sm:$0xff] %v7705_v47  ;;  %v2052_v50 = vadd.f32 %v7362_v41, %v1980_v21  ;;  %v1982_v13 = vadd.f32 %v1876_v58, %v959_v7  ;;  %2463 = vmatprep.mubr.bf16.mxu0 %v2168_v5  ;;  %1184 = vmatprep.mubr.bf16.mxu1 %v8680_v44 }
 0x1fc   : > { %v2053_v3 = vadd.f32 %v7359_v19, %v1981_v60  ;;  %2464 = vmatmul.mubr.bf16.gmra.mrb[80].mxu0 %v2167_v62  ;;  %8712 = vst [vmem:[#allocation60_spill] sm:$0xff] %v7712_v33  ;;  %v1805_v32 = vmul.f32 %v6946_v35, %v7702_v29  ;;  %v1880_v22 = vadd.f32 %v1752_v2, %v1480_v20  ;;  %v2115_v4 = vmax.f32 %v2051_v11, 0.0  ;;  %v8714_v2 = vld [vmem:[#allocation67_spill] sm:$0xff] }
 0x1fd   : > { %v2054_v0 = vadd.f32 %v7362_v41, %v1982_v13  ;;  %v1883_v58 = vadd.f32 %v1755_v57, %v7658_v34  ;;  %2907 = vmatpush1.bf16.msra.mxu1 %v5985_v63  ;;  %v1534_v46 = vmul.f32 %v6955_v38, %v8710_v54  ;;  %v1806_v26 = vmul.f32 %v6949_v36, %v7702_v29  ;;  %v7727_v34 = vpop.permute.xlu1 %1392  ;;  %v8715_v60 = vld [vmem:[#allocation71_spill] sm:$0xff] }
 0x1fe   : > { %v2117_v21 = vmax.f32 %v2053_v3, 0.0  ;;  %2908 = vmatprep.subr.bf16.mxu1 %v5990_v52  ;;  %v7720_v62 = vadd.f32 %v1805_v32, %v1533_v40  ;;  %v2116_v24 = vmax.f32 %v2052_v50, 0.0  ;;  %v1884_v20 = vadd.f32 %v1756_v14, %v7662_v9 }
 0x1ff   : > { %v2118_v23 = vmax.f32 %v2054_v0, 0.0  ;;  %v963_v5 = vpop.f32.mrb[24].mxu0  ;;  %v1491_v63 = vmul.f32 %v7319_v51, %v8714_v2  ;;  %v1763_v40 = vmul.f32 %v7322_v12, %v8715_v60  ;;  %v1492_v7 = vmul.f32 %v7329_v59, %v8714_v2 }
 0x200   : > { %8713 = vst [vmem:[#allocation62_spill] sm:$0xff] %v7720_v62  ;;  %v1983_v55 = vadd.f32 %v1879_v53, %v963_v5  ;;  %v965_v57 = vpop.f32.mrb[25].mxu0  ;;  %v2169_v11 = vpack.c.bf16 %v2117_v21, %v2115_v4  ;;  %v1764_v14 = vmul.f32 %v7332_v61, %v8715_v60  ;;  %v7735_v9 = vadd.f32 %v1806_v26, %v1534_v46  ;;  %v6163_v21 = vld [vmem:[%s6800_s29 + $0x48] sm:$0xff]  }
 0x201   : > { %v1984_v52 = vadd.f32 %v1880_v22, %v965_v57  ;;  %v967_v50 = vpop.f32.mrb[26].mxu0  ;;  %v2170_v13 = vpack.c.bf16 %v2118_v23, %v2116_v24  ;;  %2909 = vmatpush1.bf16.msra.mxu1 %v5988_v42  ;;  %v1887_v0 = vadd.f32 %v7618_v39, %v7668_v17  ;;  %v1888_v4 = vadd.f32 %v7624_v25, %v7674_v43  ;;  %v8717_v23 = vld [vmem:[#allocation52_spill] sm:$0xff]  ;;  %v7750_v17 = vpop.permute.xlu1 %1668 }
 0x202   : > { %8716 = vst [vmem:[#allocation72_spill] sm:$0xff] %v7735_v9  ;;  %v2055_v53 = vadd.f32 %v7359_v19, %v1983_v55  ;;  %v1985_v3 = vadd.f32 %v1883_v58, %v967_v50  ;;  %v969_v32 = vpop.f32.mrb[27].mxu0  ;;  %1185 = vmatmul.mubr.bf16.gmra.mrb[36].mxu1 %v6163_v21  ;;  %v1499_v42 = vmul.f32 %v7319_v51, %v8717_v23 }
 0x203   : > { %v2056_v22 = vadd.f32 %v7362_v41, %v1984_v52  ;;  %v1986_v24 = vadd.f32 %v1884_v20, %v969_v32  ;;  %2473 = vmatprep.mubr.bf16.mxu0 %v2170_v13  ;;  %1194 = vmatprep.mubr.bf16.mxu1 %v8680_v44  ;;  %v1500_v39 = vmul.f32 %v7329_v59, %v8717_v23  ;;  %v8718_v20 = vld [vmem:[#allocation53_spill] sm:$0xff] }
 0x204   : > { %v2057_v58 = vadd.f32 %v7359_v19, %v1985_v3  ;;  %2474 = vmatmul.mubr.bf16.gmra.mrb[84].mxu0 %v2169_v11  ;;  %v1541_v25 = vmul.f32 %v6952_v37, %v7727_v34  ;;  %v1542_v43 = vmul.f32 %v6955_v38, %v7727_v34  ;;  %v1891_v26 = vadd.f32 %v1763_v40, %v1491_v63  ;;  %v8719_v3 = vld [vmem:[#allocation75_spill] sm:$0xff]  ;;  %v8720_v63 = vld [vmem:[#allocation77_spill] sm:$0xff] }
 0x205   : > { %v2058_v46 = vadd.f32 %v7362_v41, %v1986_v24  ;;  %v1892_v5 = vadd.f32 %v1764_v14, %v1492_v7  ;;  %v7759_v2 = vmul.f32 %v7319_v51, %v8718_v20  ;;  %v2119_v55 = vmax.f32 %v2055_v53, 0.0 }
 0x206   : > { %v2121_v57 = vmax.f32 %v2057_v58, 0.0  ;;  %v1813_v11 = vmul.f32 %v6946_v35, %v7750_v17  ;;  %v1814_v60 = vmul.f32 %v6949_v36, %v7750_v17  ;;  %v2120_v52 = vmax.f32 %v2056_v22, 0.0  ;;  %v7777_v62 = vpop.permute.xlu1 %1397 }
 0x207   : > { %v2122_v50 = vmax.f32 %v2058_v46, 0.0  ;;  %v973_v13 = vpop.f32.mrb[28].mxu0  ;;  %v1495_v32 = vmul.f32 %v7319_v51, %v8719_v3  ;;  %v1767_v40 = vmul.f32 %v7322_v12, %v8720_v63  ;;  %v1496_v22 = vmul.f32 %v7329_v59, %v8719_v3 }
 0x208   : > { %v1987_v7 = vadd.f32 %v1887_v0, %v973_v13  ;;  %v975_v14 = vpop.f32.mrb[29].mxu0  ;;  %v2171_v53 = vpack.c.bf16 %v2121_v57, %v2119_v55  ;;  %v7769_v21 = vadd.f32 %v1813_v11, %v1541_v25  ;;  %v7771_v24 = vadd.f32 %v1814_v60, %v1542_v43  ;;  %v8723_v55 = vld [vmem:[#allocation57_spill] sm:$0xff]  ;;  %v6164_v43 = vld [vmem:[%s6800_s29 + $0x50] sm:$0xff]  }
 0x209   : > { %v1988_v23 = vadd.f32 %v1888_v4, %v975_v14  ;;  %v977_v58 = vpop.f32.mrb[30].mxu0  ;;  %v2172_v9 = vpack.c.bf16 %v2122_v50, %v2120_v52  ;;  %v1768_v46 = vmul.f32 %v7332_v61, %v8720_v63  ;;  %v1775_v25 = vmul.f32 %v7322_v12, %v8723_v55  ;;  %v8724_v60 = vld [vmem:[#allocation81_spill] sm:$0xff] }
 0x20a   : > { %8721 = vst [vmem:[#allocation67_spill] sm:$0xff] %v7769_v21  ;;  %8722 = vst [vmem:[#allocation71_spill] sm:$0xff] %v7771_v24  ;;  %v2059_v0 = vadd.f32 %v7359_v19, %v1987_v7  ;;  %v1989_v13 = vadd.f32 %v1891_v26, %v977_v58  ;;  %v979_v33 = vpop.f32.mrb[31].mxu0  ;;  %v7784_v4 = vmul.f32 %v7329_v59, %v8718_v20  ;;  %1195 = vmatmul.mubr.bf16.gmra.mrb[40].mxu1 %v6164_v43 }
 0x20b   : > { %v2060_v57 = vadd.f32 %v7362_v41, %v1988_v23  ;;  %v1990_v11 = vadd.f32 %v1892_v5, %v979_v33  ;;  %2483 = vmatprep.mubr.bf16.mxu0 %v2172_v9  ;;  %v1771_v52 = vmul.f32 %v7322_v12, %v8724_v60  ;;  %1204 = vmatprep.mubr.bf16.mxu1 %v8680_v44  ;;  %v8725_v33 = vld [vmem:[#allocation84_spill] sm:$0xff]  ;;  %v7801_v58 = vpop.permute.xlu1 %1672 }
 0x20c   : > { %v2061_v26 = vadd.f32 %v7359_v19, %v1989_v13  ;;  %2484 = vmatmul.mubr.bf16.gmra.mrb[88].mxu0 %v2171_v53  ;;  %v1895_v50 = vadd.f32 %v1767_v40, %v1495_v32  ;;  %v1772_v3 = vmul.f32 %v7332_v61, %v8724_v60  ;;  %v1776_v20 = vmul.f32 %v7332_v61, %v8723_v55 }
 0x20d   : > { %v2062_v63 = vadd.f32 %v7362_v41, %v1990_v11  ;;  %v1896_v7 = vadd.f32 %v1768_v46, %v1496_v22  ;;  %v1549_v9 = vmul.f32 %v6952_v37, %v8725_v33  ;;  %v1550_v5 = vmul.f32 %v6955_v38, %v8725_v33 }
 0x20e   : > { %v2123_v14 = vmax.f32 %v2059_v0, 0.0  ;;  %v2125_v23 = vmax.f32 %v2061_v26, 0.0  ;;  %v1545_v32 = vmul.f32 %v6952_v37, %v7777_v62  ;;  %v1546_v40 = vmul.f32 %v6955_v38, %v7777_v62 }
 0x20f   : > { %v2124_v53 = vmax.f32 %v2060_v57, 0.0  ;;  %v2126_v13 = vmax.f32 %v2062_v63, 0.0  ;;  %v983_v55 = vpop.f32.mrb[32].mxu0  ;;  %v1899_v22 = vadd.f32 %v1771_v52, %v1499_v42  ;;  %v1817_v46 = vmul.f32 %v6946_v35, %v7801_v58 }
 0x210   : > { %v1991_v43 = vadd.f32 %v1895_v50, %v983_v55  ;;  %v985_v11 = vpop.f32.mrb[33].mxu0  ;;  %v1900_v0 = vadd.f32 %v1772_v3, %v1500_v39  ;;  %v2173_v60 = vpack.c.bf16 %v2125_v23, %v2123_v14  ;;  %v1818_v26 = vmul.f32 %v6949_v36, %v7801_v58  ;;  %v7816_v50 = vpop.permute.xlu1 %1676  ;;  %v6165_v39 = vld [vmem:[%s6800_s29 + $0x58] sm:$0xff]  }
 0x211   : > { %v1992_v24 = vadd.f32 %v1896_v7, %v985_v11  ;;  %v987_v21 = vpop.f32.mrb[34].mxu0  ;;  %v2174_v47 = vpack.c.bf16 %v2126_v13, %v2124_v53  ;;  %v1507_v57 = vmul.f32 %v7319_v51, %v7454_v6  ;;  %v1508_v42 = vmul.f32 %v7329_v59, %v7454_v6 }
 0x212   : > { %v2063_v52 = vadd.f32 %v7359_v19, %v1991_v43  ;;  %v1993_v63 = vadd.f32 %v1899_v22, %v987_v21  ;;  %v989_v49 = vpop.f32.mrb[35].mxu0  ;;  %1205 = vmatmul.mubr.bf16.gmra.mrb[44].mxu1 %v6165_v39  ;;  %v7819_v3 = vadd.f32 %v1817_v46, %v1545_v32  ;;  %v7821_v14 = vadd.f32 %v1818_v26, %v1546_v40 }
 0x213   : > { %v2064_v7 = vadd.f32 %v7362_v41, %v1992_v24  ;;  %v1994_v23 = vadd.f32 %v1900_v0, %v989_v49  ;;  %2493 = vmatprep.mubr.bf16.mxu0 %v2174_v47  ;;  %v1779_v53 = vmul.f32 %v7322_v12, %v7499_v48  ;;  %v1780_v6 = vmul.f32 %v7332_v61, %v7499_v48 }
 0x214   : > { %v2065_v21 = vadd.f32 %v7359_v19, %v1993_v63  ;;  %2494 = vmatmul.mubr.bf16.gmra.mrb[92].mxu0 %v2173_v60  ;;  %1214 = vmatprep.mubr.bf16.mxu1 %v8680_v44  ;;  %v1821_v32 = vmul.f32 %v6946_v35, %v7816_v50  ;;  %v1822_v40 = vmul.f32 %v6949_v36, %v7816_v50  ;;  %v2127_v24 = vmax.f32 %v2063_v52, 0.0  ;;  %v7843_v60 = vpop.permute.xlu1 %1412 }
 0x215   : > { %v2066_v49 = vadd.f32 %v7362_v41, %v1994_v23  ;;  %v1903_v47 = vadd.f32 %v1775_v25, %v7759_v2  ;;  %v2128_v22 = vmax.f32 %v2064_v7, 0.0  ;;  %v1904_v11 = vadd.f32 %v1776_v20, %v7784_v4 }
 0x216   : > { %v2129_v13 = vmax.f32 %v2065_v21, 0.0  ;;  %v7836_v55 = vadd.f32 %v1821_v32, %v1549_v9  ;;  %v7838_v48 = vadd.f32 %v1822_v40, %v1550_v5  ;;  %v1515_v0 = vmul.f32 %v7319_v51, %v7272_v45 }
 0x217   : > { %v2130_v46 = vmax.f32 %v2066_v49, 0.0  ;;  %v993_v43 = vpop.f32.mrb[36].mxu0  ;;  %v1907_v2 = vadd.f32 %v1779_v53, %v1507_v57  ;;  %v1908_v25 = vadd.f32 %v1780_v6, %v1508_v42  ;;  %v1511_v7 = vmul.f32 %v7319_v51, %v7519_v1  ;;  %v6166_v42 = vld [vmem:[%s6800_s29 + $0x60] sm:$0xff]  }
 0x218   : > { %v1995_v26 = vadd.f32 %v1903_v47, %v993_v43  ;;  %v995_v63 = vpop.f32.mrb[37].mxu0  ;;  %v2175_v52 = vpack.c.bf16 %v2129_v13, %v2127_v24  ;;  %v1783_v4 = vmul.f32 %v7322_v12, %v7546_v10  ;;  %v1512_v32 = vmul.f32 %v7329_v59, %v7519_v1 }
 0x219   : > { %v1996_v9 = vadd.f32 %v1904_v11, %v995_v63  ;;  %v997_v39 = vpop.f32.mrb[38].mxu0  ;;  %v2176_v5 = vpack.c.bf16 %v2130_v46, %v2128_v22  ;;  %v1784_v57 = vmul.f32 %v7332_v61, %v7546_v10  ;;  %v1787_v40 = vmul.f32 %v7322_v12, %v7570_v30  ;;  %v7860_v47 = vpop.permute.xlu1 %1684 }
 0x21a   : > { %v2067_v20 = vadd.f32 %v7359_v19, %v1995_v26  ;;  %v1997_v23 = vadd.f32 %v1907_v2, %v997_v39  ;;  %v999_v21 = vpop.f32.mrb[39].mxu0  ;;  %1215 = vmatmul.mubr.bf16.gmra.mrb[48].mxu1 %v6166_v42  ;;  %v1557_v1 = vmul.f32 %v6952_v37, %v7843_v60  ;;  %v1558_v10 = vmul.f32 %v6955_v38, %v7843_v60 }
 0x21b   : > { %v2068_v53 = vadd.f32 %v7362_v41, %v1996_v9  ;;  %v1998_v6 = vadd.f32 %v1908_v25, %v999_v21  ;;  %2503 = vmatprep.mubr.bf16.mxu0 %v2176_v5  ;;  %1224 = vmatprep.mubr.bf16.mxu1 %v8680_v44  ;;  %v1911_v13 = vadd.f32 %v1783_v4, %v1511_v7 }
 0x21c   : > { %v2069_v49 = vadd.f32 %v7359_v19, %v1997_v23  ;;  %2504 = vmatmul.mubr.bf16.gmra.mrb[96].mxu0 %v2175_v52  ;;  %v1516_v22 = vmul.f32 %v7329_v59, %v7272_v45  ;;  %v1788_v46 = vmul.f32 %v7332_v61, %v7570_v30  ;;  %v2131_v43 = vmax.f32 %v2067_v20, 0.0  ;;  %v8726_v23 = vld [vmem:[#allocation61_spill] sm:$0xff] }
 0x21d   : > { %v2070_v24 = vadd.f32 %v7362_v41, %v1998_v6  ;;  %v1829_v26 = vmul.f32 %v6946_v35, %v7860_v47  ;;  %v1830_v37 = vmul.f32 %v6949_v36, %v7860_v47  ;;  %v2132_v63 = vmax.f32 %v2068_v53, 0.0  ;;  %v6167_v6 = vld [vmem:[%s6800_s29 + $0x68] sm:$0xff]  }
 0x21e   : > { %v2133_v11 = vmax.f32 %v2069_v49, 0.0  ;;  %v1912_v25 = vadd.f32 %v1784_v57, %v1512_v32  ;;  %v1915_v52 = vadd.f32 %v1787_v40, %v1515_v0  ;;  %v1916_v20 = vadd.f32 %v1788_v46, %v1516_v22  ;;  %v8727_v0 = vld [vmem:[#allocation68_spill] sm:$0xff] }
 0x21f   : > { %v2134_v2 = vmax.f32 %v2070_v24, 0.0  ;;  %v1003_v38 = vpop.f32.mrb[40].mxu0  ;;  %v7875_v5 = vadd.f32 %v1829_v26, %v1557_v1  ;;  %v7877_v30 = vadd.f32 %v1830_v37, %v1558_v10  ;;  %v1791_v36 = vmul.f32 %v7322_v12, %v8726_v23 }
 0x220   : > { %v1999_v9 = vadd.f32 %v1911_v13, %v1003_v38  ;;  %v1005_v39 = vpop.f32.mrb[41].mxu0  ;;  %v2177_v45 = vpack.c.bf16 %v2133_v11, %v2131_v43  ;;  %v1519_v57 = vmul.f32 %v7319_v51, %v8727_v0  ;;  %v1792_v53 = vmul.f32 %v7332_v61, %v8726_v23 }
 0x221   : > { %v2000_v7 = vadd.f32 %v1912_v25, %v1005_v39  ;;  %v1007_v4 = vpop.f32.mrb[42].mxu0  ;;  %v2178_v35 = vpack.c.bf16 %v2134_v2, %v2132_v63  ;;  %v1520_v1 = vmul.f32 %v7329_v59, %v8727_v0  ;;  %v1523_v24 = vmul.f32 %v7319_v51, %v7602_v27 }
 0x222   : > { %v2071_v21 = vadd.f32 %v7359_v19, %v1999_v9  ;;  %v2001_v42 = vadd.f32 %v1915_v52, %v1007_v4  ;;  %v1009_v32 = vpop.f32.mrb[43].mxu0  ;;  %1225 = vmatmul.mubr.bf16.gmra.mrb[52].mxu1 %v6167_v6  ;;  %v1795_v13 = vmul.f32 %v7322_v12, %v7628_v31  ;;  %v1524_v46 = vmul.f32 %v7329_v59, %v7602_v27 }
 0x223   : > { %v2072_v40 = vadd.f32 %v7362_v41, %v2000_v7  ;;  %v2002_v49 = vadd.f32 %v1916_v20, %v1009_v32  ;;  %2513 = vmatprep.mubr.bf16.mxu0 %v2178_v35  ;;  %1234 = vmatprep.mubr.bf16.mxu1 %v8680_v44  ;;  %v1796_v43 = vmul.f32 %v7332_v61, %v7628_v31  ;;  %v6168_v32 = vld [vmem:[%s6800_s29 + $0x70] sm:$0xff]  }
 0x224   : > { %v2073_v10 = vadd.f32 %v7359_v19, %v2001_v42  ;;  %2514 = vmatmul.mubr.bf16.gmra.mrb[100].mxu0 %v2177_v45  ;;  %v2135_v11 = vmax.f32 %v2071_v21, 0.0  ;;  %v1919_v37 = vadd.f32 %v1791_v36, %v1519_v57  ;;  %v1920_v25 = vadd.f32 %v1792_v53, %v1520_v1 }
 0x225   : > { %v2074_v22 = vadd.f32 %v7362_v41, %v2002_v49  ;;  %v2136_v63 = vmax.f32 %v2072_v40, 0.0  ;;  %v1923_v39 = vadd.f32 %v1795_v13, %v1523_v24  ;;  %v1924_v20 = vadd.f32 %v1796_v43, %v1524_v46 }
 0x226   : > { %v2137_v26 = vmax.f32 %v2073_v10, 0.0  ;;  %v1527_v27 = vmul.f32 %v7319_v51, %v7653_v16  ;;  %v1799_v21 = vmul.f32 %v7322_v12, %v7683_v56  ;;  %v1528_v42 = vmul.f32 %v7329_v59, %v7653_v16 }
 0x227   : > { %v2138_v2 = vmax.f32 %v2074_v22, 0.0  ;;  %v1013_v38 = vpop.f32.mrb[44].mxu0  ;;  %v1800_v53 = vmul.f32 %v7332_v61, %v7683_v56  ;;  %v1531_v40 = vmul.f32 %v7319_v51, %v8710_v54  ;;  %v1803_v16 = vmul.f32 %v7322_v12, %v7702_v29 }
 0x228   : > { %v2003_v52 = vadd.f32 %v1919_v37, %v1013_v38  ;;  %v1015_v9 = vpop.f32.mrb[45].mxu0  ;;  %v2179_v45 = vpack.c.bf16 %v2137_v26, %v2135_v11  ;;  %v1532_v1 = vmul.f32 %v7329_v59, %v8710_v54  ;;  %v1804_v10 = vmul.f32 %v7332_v61, %v7702_v29 }
 0x229   : > { %v2004_v7 = vadd.f32 %v1920_v25, %v1015_v9  ;;  %v1017_v4 = vpop.f32.mrb[46].mxu0  ;;  %v2180_v35 = vpack.c.bf16 %v2138_v2, %v2136_v63  ;;  %v1928_v43 = vadd.f32 %v1800_v53, %v1528_v42  ;;  %v1931_v37 = vadd.f32 %v1803_v16, %v1531_v40 }
 0x22a   : > { %v2075_v31 = vadd.f32 %v7359_v19, %v2003_v52  ;;  %v2005_v23 = vadd.f32 %v1923_v39, %v1017_v4  ;;  %v1019_v36 = vpop.f32.mrb[47].mxu0  ;;  %1235 = vmatmul.mubr.bf16.gmra.mrb[56].mxu1 %v6168_v32  ;;  %v1932_v25 = vadd.f32 %v1804_v10, %v1532_v1  ;;  %v8728_v39 = vld [vmem:[#allocation78_spill] sm:$0xff]  ;;  %v1811_v42 = vmul.f32 %v7322_v12, %v7750_v17 }
 0x22b   : > { %v2076_v0 = vadd.f32 %v7362_v41, %v2004_v7  ;;  %v2006_v57 = vadd.f32 %v1924_v20, %v1019_v36  ;;  %2523 = vmatprep.mubr.bf16.mxu0 %v2180_v35  ;;  %1244 = vmatprep.mubr.bf16.mxu1 %v8680_v44  ;;  %v1927_v44 = vadd.f32 %v1799_v21, %v1527_v27  ;;  %v8729_v7 = vld [vmem:[#allocation76_spill] sm:$0xff]  ;;  %v6169_v20 = vld [vmem:[%s6800_s29 + $0x78] sm:$0xff]   ;;  %s494_s29 = sand.u32 1, %s6442_s18  }
 0x22c   : > { %v2077_v6 = vadd.f32 %v7359_v19, %v2005_v23  ;;  %2524 = vmatmul.mubr.bf16.gmra.mrb[104].mxu0 %v2179_v45  ;;  %v2139_v56 = vmax.f32 %v2075_v31, 0.0  ;;  %v1535_v45 = vmul.f32 %v7319_v51, %v8728_v39  ;;  %v1807_v4 = vmul.f32 %v7322_v12, %v8729_v7  ;;  %v5993_v32 = vld [vmem:[#allocation5 + $0xf4] ss:$8 sps:$4 sm:$0xff]   ;;  %s5264_s15 = sshll.u32 %s494_s29, 8  ;;  %s8501_s21 = scalar_lea.sflag [#allocation4], %s494_s29 }
 0x22d   : > { %v2078_v49 = vadd.f32 %v7362_v41, %v2006_v57  ;;  %v2140_v13 = vmax.f32 %v2076_v0, 0.0  ;;  %v1536_v31 = vmul.f32 %v7329_v59, %v8728_v39  ;;  %v1808_v23 = vmul.f32 %v7332_v61, %v8729_v7  ;;  %2910 = vmatprep.subr.bf16.mxu1 %v5993_v32  ;;  %s8425_s22 = scalar_lea.vmem [#allocation14], %s5264_s15 }
 0x22e   : > { %v2141_v24 = vmax.f32 %v2077_v6, 0.0  ;;  %v1539_v21 = vmul.f32 %v7319_v51, %v7727_v34  ;;  %v1540_v57 = vmul.f32 %v7329_v59, %v7727_v34  ;;  %v1812_v53 = vmul.f32 %v7332_v61, %v7750_v17  ;;  %v5991_v6 = vld [vmem:[#allocation5 + $0xf0] ss:$8 sps:$4 sm:$0xff]   ;;  %s5103_s11 = sshll.u32 %s8425_s22, 4  ;;  %s8494_s11 = int_to_ptr.vmem [resolvable:$true] %s5103_s11 }
 0x22f   : > { %v2142_v22 = vmax.f32 %v2078_v49, 0.0  ;;  %v1023_v46 = vpop.f32.mrb[48].mxu0  ;;  %v1935_v49 = vadd.f32 %v1807_v4, %v1535_v45  ;;  %2911 = vmatpush1.bf16.msra.mxu1 %v5991_v6  ;;  %v1547_v39 = vmul.f32 %v7319_v51, %v8725_v33  ;;  %v1819_v45 = vmul.f32 %v7322_v12, %v7816_v50  ;;  %s6372_s16 = scalar_lea.vmem %s8494_s11, 4096  ;;  %p6379_p5 = scmp.lt.s32.totalorder %s8494_s11, %s6377_s26 }
 0x230   : > { %v2007_v11 = vadd.f32 %v1927_v44, %v1023_v46  ;;  %v1025_v26 = vpop.f32.mrb[49].mxu0  ;;  %v2181_v63 = vpack.c.bf16 %v2141_v24, %v2139_v56  ;;  %v1936_v24 = vadd.f32 %v1808_v23, %v1536_v31  ;;  %v1940_v34 = vadd.f32 %v1812_v53, %v1540_v57  ;;  %p6373_p13 = scmp.ne.s32.totalorder %s8494_s11, %s6372_s16  ;;  %p6380_p10 = scmp.lt.s32.totalorder %s6378_s13, %s6372_s16 }
 0x231   : > { %v2008_v2 = vadd.f32 %v1928_v43, %v1025_v26  ;;  %v1027_v38 = vpop.f32.mrb[50].mxu0  ;;  %v2182_v52 = vpack.c.bf16 %v2142_v22, %v2140_v13  ;;  %v1939_v22 = vadd.f32 %v1811_v42, %v1539_v21  ;;  %v1548_v4 = vmul.f32 %v7329_v59, %v8725_v33 }
 0x232   : > { %v2079_v54 = vadd.f32 %v7359_v19, %v2007_v11  ;;  %v2009_v9 = vadd.f32 %v1931_v37, %v1027_v38  ;;  %v1029_v29 = vpop.f32.mrb[51].mxu0  ;;  %1245 = vmatmul.mubr.bf16.gmra.mrb[60].mxu1 %v6169_v20  ;;  %v1815_v38 = vmul.f32 %v7322_v12, %v7801_v58  ;;  %v1947_v32 = vadd.f32 %v1819_v45, %v1547_v39  ;;  %p6374_p6 = pnand %p6373_p13, %p8789_p1  ;;  %p6381_p0 = por %p6380_p10, %p6379_p5 }
 0x233   : > { %v2080_v35 = vadd.f32 %v7362_v41, %v2008_v2  ;;  %v2010_v27 = vadd.f32 %v1932_v25, %v1029_v29  ;;  %2533 = vmatprep.mubr.bf16.mxu0 %v2182_v52  ;;  %v1543_v2 = vmul.f32 %v7319_v51, %v7777_v62 }
 0x234   : > { %v2081_v36 = vadd.f32 %v7359_v19, %v2009_v9  ;;  %2534 = vmatmul.mubr.bf16.gmra.mrb[108].mxu0 %v2181_v63  ;;  %v2143_v40 = vmax.f32 %v2079_v54, 0.0  ;;  %v1544_v54 = vmul.f32 %v7329_v59, %v7777_v62  ;;  %v1816_v9 = vmul.f32 %v7332_v61, %v7801_v58  ;;  %p6375_p9 = pneg %p6374_p6 }
 0x235   : > { %v2082_v0 = vadd.f32 %v7362_v41, %v2010_v27  ;;  %v2144_v1 = vmax.f32 %v2080_v35, 0.0  ;;  %v1820_v62 = vmul.f32 %v7332_v61, %v7816_v50  ;;  %v1943_v58 = vadd.f32 %v1815_v38, %v1543_v2 }
 0x236   : > { %v2145_v16 = vmax.f32 %v2081_v36, 0.0  ;;  %v1944_v36 = vadd.f32 %v1816_v9, %v1544_v54  ;;  %p6382_p2 = pnand %p6381_p0, %p6375_p9 }
 0x237   : > { %v2146_v10 = vmax.f32 %v2082_v0, 0.0  ;;  %v1033_v56 = vpop.f32.mrb[52].mxu0  ;;  %v1948_v6 = vadd.f32 %v1820_v62, %v1548_v4 }
 0x238   : > { %v2011_v44 = vadd.f32 %v1935_v49, %v1033_v56  ;;  %v1035_v13 = vpop.f32.mrb[53].mxu0  ;;  %v2183_v46 = vpack.c.bf16 %v2145_v16, %v2143_v40  ;;  %v8730_v16 = vld [vmem:[#allocation88_spill] sm:$0xff] }
 0x239   : > { %v2012_v43 = vadd.f32 %v1936_v24, %v1035_v13  ;;  %v1037_v11 = vpop.f32.mrb[54].mxu0  ;;  %v2184_v26 = vpack.c.bf16 %v2146_v10, %v2144_v1  ;;  %v1823_v33 = vmul.f32 %v7322_v12, %v8730_v16  ;;  %v8731_v10 = vld [vmem:[#allocation87_spill] sm:$0xff]  ;;  %v1824_v24 = vmul.f32 %v7332_v61, %v8730_v16  ;;  %v7994_v16 = vld [vmem:[#allocation13 + $0x8] sm:$0xff] }
 0x23a   : > { %v2083_v17 = vadd.f32 %v7359_v19, %v2011_v44  ;;  %v2013_v37 = vadd.f32 %v1939_v22, %v1037_v11  ;;  %v1039_v63 = vpop.f32.mrb[55].mxu0  ;;  %v1551_v56 = vmul.f32 %v7319_v51, %v8731_v10  ;;  %v1552_v22 = vmul.f32 %v7329_v59, %v8731_v10 }
 0x23b   : > { %v2084_v25 = vadd.f32 %v7362_v41, %v2012_v43  ;;  %v2014_v52 = vadd.f32 %v1940_v34, %v1039_v63  ;;  %2543 = vmatprep.mubr.bf16.mxu0 %v2184_v26  ;;  %v1555_v11 = vmul.f32 %v7319_v51, %v7843_v60  ;;  %v1828_v34 = vmul.f32 %v7332_v61, %v7860_v47 }
 0x23c   : > { %v2085_v29 = vadd.f32 %v7359_v19, %v2013_v37  ;;  %2544 = vmatmul.mubr.bf16.gmra.mrb[112].mxu0 %v2183_v46  ;;  %v2147_v20 = vmax.f32 %v2083_v17, 0.0  ;;  %v1827_v46 = vmul.f32 %v7322_v12, %v7860_v47  ;;  %v1556_v17 = vmul.f32 %v7329_v59, %v7843_v60 }
 0x23d   : > { %v2086_v7 = vadd.f32 %v7362_v41, %v2014_v52  ;;  %v2148_v27 = vmax.f32 %v2084_v25, 0.0  ;;  %v1951_v2 = vadd.f32 %v1823_v33, %v1551_v56  ;;  %v1952_v52 = vadd.f32 %v1824_v24, %v1552_v22 }
 0x23e   : > { %v2149_v35 = vmax.f32 %v2085_v29, 0.0  ;;  %v1955_v29 = vadd.f32 %v1827_v46, %v1555_v11  ;;  %v6006_v46 = vld [vmem:[#allocation7 + $0x40] ss:$8 sps:$4 sm:$0xff]  }
 0x23f   : > { %v2150_v31 = vmax.f32 %v2086_v7, 0.0  ;;  %v1043_v23 = vpop.f32.mrb[56].mxu0  ;;  %v1956_v7 = vadd.f32 %v1828_v34, %v1556_v17  ;;  %v6011_v34 = vld [vmem:[#allocation7 + $0x54] ss:$8 sps:$4 sm:$0xff]  }
 0x240   : > { %v2015_v21 = vadd.f32 %v1943_v58, %v1043_v23  ;;  %v1045_v42 = vpop.f32.mrb[57].mxu0  ;;  %v2185_v0 = vpack.c.bf16 %v2149_v35, %v2147_v20 }
 0x241   : > { %v2016_v57 = vadd.f32 %v1944_v36, %v1045_v42  ;;  %v1047_v53 = vpop.f32.mrb[58].mxu0  ;;  %v2186_v40 = vpack.c.bf16 %v2150_v31, %v2148_v27  ;;  %v5994_v42 = vld [vmem:[#allocation7] ss:$8 sps:$4 sm:$0xff]  }
 0x242   : > { %v2087_v50 = vadd.f32 %v7359_v19, %v2015_v21  ;;  %v2017_v49 = vadd.f32 %v1947_v32, %v1047_v53  ;;  %v1049_v1 = vpop.f32.mrb[59].mxu0  ;;  %v5996_v32 = vld [vmem:[#allocation7 + $0x4] ss:$8 sps:$4 sm:$0xff]  }
 0x243   : > { %v2088_v44 = vadd.f32 %v7362_v41, %v2016_v57  ;;  %v2018_v13 = vadd.f32 %v1948_v6, %v1049_v1  ;;  %2553 = vmatprep.mubr.bf16.mxu0 %v2186_v40  ;;  %3369 = vmatprep.subr.bf16.mxu0 %v5996_v32  ;;  %v5999_v57 = vld [vmem:[#allocation7 + $0x14] ss:$8 sps:$4 sm:$0xff]   ;;  %v6002_v53 = vld [vmem:[#allocation7 + $0x24] ss:$8 sps:$4 sm:$0xff]  }
 0x244   : > { %v2089_v43 = vadd.f32 %v7359_v19, %v2017_v49  ;;  %2554 = vmatmul.mubr.bf16.gmra.mrb[116].mxu0 %v2185_v0  ;;  %v2151_v37 = vmax.f32 %v2087_v50, 0.0  ;;  %v5997_v0 = vld [vmem:[#allocation7 + $0x10] ss:$8 sps:$4 sm:$0xff]   ;;  %v7988_v6 = vld [vmem:[#allocation13] sm:$0xff]  ;;  %v6005_v1 = vld [vmem:[#allocation7 + $0x34] ss:$8 sps:$4 sm:$0xff]  }
 0x245   : > { %v2090_v26 = vadd.f32 %v7362_v41, %v2018_v13  ;;  %v2152_v38 = vmax.f32 %v2088_v44, 0.0  ;;  %3370 = vmatpush1.bf16.msra.mxu0 %v5994_v42  ;;  %v6003_v49 = vld [vmem:[#allocation7 + $0x30] ss:$8 sps:$4 sm:$0xff]  }
 0x246   : > { %v2153_v63 = vmax.f32 %v2089_v43, 0.0  ;;  %3371 = vmatprep.subr.bf16.mxu0 %v5999_v57  ;;  %v6008_v43 = vld [vmem:[#allocation7 + $0x44] ss:$8 sps:$4 sm:$0xff]   ;;  %v6018_v57 = vld [vmem:[#allocation7 + $0x80] ss:$8 sps:$4 sm:$0xff]  }
 0x247   : > { %v2154_v25 = vmax.f32 %v2090_v26, 0.0  ;;  %v1053_v12 = vpop.f32.mrb[60].mxu0 }
 0x248   : > { %v2019_v54 = vadd.f32 %v1951_v2, %v1053_v12  ;;  %v1055_v9 = vpop.f32.mrb[61].mxu0  ;;  %v2187_v39 = vpack.c.bf16 %v2153_v63, %v2151_v37 }
 0x249   : > { %v2020_v51 = vadd.f32 %v1952_v52, %v1055_v9  ;;  %v1057_v45 = vpop.f32.mrb[62].mxu0  ;;  %v2188_v61 = vpack.c.bf16 %v2154_v25, %v2152_v38  ;;  %3372 = vmatpush1.bf16.msra.mxu0 %v5997_v0  ;;  %v6009_v38 = vld [vmem:[#allocation7 + $0x50] ss:$8 sps:$4 sm:$0xff]   ;;  %v6014_v52 = vld [vmem:[#allocation7 + $0x64] ss:$8 sps:$4 sm:$0xff]  }
 0x24a   : > { %v2091_v47 = vadd.f32 %v7359_v19, %v2019_v54  ;;  %v2021_v4 = vadd.f32 %v1955_v29, %v1057_v45  ;;  %v1059_v62 = vpop.f32.mrb[63].mxu0  ;;  %3373 = vmatprep.subr.bf16.mxu0 %v6002_v53  ;;  %v6023_v53 = vld [vmem:[#allocation7 + $0x94] ss:$8 sps:$4 sm:$0xff]  }
 0x24b   : > { %v2092_v59 = vadd.f32 %v7362_v41, %v2020_v51  ;;  %v2022_v60 = vadd.f32 %v1956_v7, %v1059_v62  ;;  %2563 = vmatprep.mubr.bf16.mxu0 %v2188_v61  ;;  %v6012_v7 = vld [vmem:[#allocation7 + $0x60] ss:$8 sps:$4 sm:$0xff]  }
 0x24c   : > { %v2093_v20 = vadd.f32 %v7359_v19, %v2021_v4  ;;  %2564 = vmatmul.mubr.bf16.gmra.mrb[120].mxu0 %v2187_v39  ;;  %v2155_v58 = vmax.f32 %v2091_v47, 0.0  ;;  %v6000_v19 = vld [vmem:[#allocation7 + $0x20] ss:$8 sps:$4 sm:$0xff]   ;;  %v6017_v47 = vld [vmem:[#allocation7 + $0x74] ss:$8 sps:$4 sm:$0xff]  }
 0x24d   : > { %v2094_v35 = vadd.f32 %v7362_v41, %v2022_v60  ;;  %v2156_v31 = vmax.f32 %v2092_v59, 0.0  ;;  %v8732_v41 = vld [vmem:[#allocation27_spill] sm:$0xff]  ;;  %3374 = vmatpush1.bf16.msra.mxu0 %v6000_v19 }
 0x24e   : > { %v2157_v27 = vmax.f32 %v2093_v20, 0.0  ;;  %v7992_v40 = vrot.slane %v7988_v6, %v8732_v41  ;;  %v7998_v33 = vrot.slane %v7994_v16, %v8732_v41  ;;  %3375 = vmatprep.subr.bf16.mxu0 %v6005_v1 }
 0x24f   : > { %v2158_v23 = vmax.f32 %v2094_v35, 0.0  ;;  %v6015_v35 = vld [vmem:[#allocation7 + $0x70] ss:$8 sps:$4 sm:$0xff]  }
 0x250   : > { %v2189_v36 = vpack.c.bf16 %v2157_v27, %v2155_v58 }
 0x251   : > { %v2190_v21 = vpack.c.bf16 %v2158_v23, %v2156_v31  ;;  %3376 = vmatpush1.bf16.msra.mxu0 %v6003_v49  ;;  %v6020_v31 = vld [vmem:[#allocation7 + $0x84] ss:$8 sps:$4 sm:$0xff]  }
 0x252   : > { %3377 = vmatprep.subr.bf16.mxu0 %v6008_v43 }
 0x253   : > { %2573 = vmatprep.mubr.bf16.mxu0 %v2190_v21 }
 0x254   : > { %2574 = vmatmul.mubr.bf16.gmra.mrb[124].mxu0 %v2189_v36 }
 0x255   : > { %3378 = vmatpush1.bf16.msra.mxu0 %v6006_v46 }
 0x256   : > { %3379 = vmatprep.subr.bf16.mxu0 %v6011_v34 }
 0x259   : > { %3380 = vmatpush1.bf16.msra.mxu0 %v6009_v38 }
 0x25a   : > { %3381 = vmatprep.subr.bf16.mxu0 %v6014_v52 }
 0x25d   : > { %3382 = vmatpush1.bf16.msra.mxu0 %v6012_v7 }
 0x25e   : > { %3383 = vmatprep.subr.bf16.mxu0 %v6017_v47 }
 0x261   : > { %3384 = vmatpush1.bf16.msra.mxu0 %v6015_v35 }
 0x262   : > { %3385 = vmatprep.subr.bf16.mxu0 %v6020_v31 }
 0x265   : > { %3386 = vmatpush1.bf16.msra.mxu0 %v6018_v57 }
 0x266   : > { %3387 = vmatprep.subr.bf16.mxu0 %v6023_v53 }
 0x2af   : > { %v2425_v50 = vpop.f32.mrb[64].mxu0 }
 0x2b0   : > { %v2426_v10 = vadd.f32 %v2425_v50, %v7992_v40  ;;  %v2427_v56 = vpop.f32.mrb[65].mxu0 }
 0x2b1   : > { %v2428_v24 = vadd.f32 %v2427_v56, %v7998_v33  ;;  %v2429_v44 = vpop.f32.mrb[66].mxu0  ;;  %v6021_v56 = vld [vmem:[#allocation7 + $0x90] ss:$8 sps:$4 sm:$0xff]  }
 0x2b2   : > { %v2430_v13 = vadd.f32 %v2429_v44, %v7992_v40  ;;  %v2431_v22 = vpop.f32.mrb[67].mxu0  ;;  %v2584_v26 = vmax.f32 %v2426_v10, 0.0  ;;  %3388 = vmatpush1.bf16.msra.mxu0 %v6021_v56 }
 0x2b3   : > { %v2432_v11 = vadd.f32 %v2431_v22, %v7998_v33  ;;  %v2585_v37 = vmax.f32 %v2428_v24, 0.0 }
 0x2b4   : > { %v2586_v17 = vmax.f32 %v2430_v13, 0.0  ;;  %v6026_v13 = vld [vmem:[#allocation7 + $0xa4] ss:$8 sps:$4 sm:$0xff]  }
 0x2b5   : > { %v2587_v63 = vmax.f32 %v2432_v11, 0.0  ;;  %3389 = vmatprep.subr.bf16.mxu0 %v6026_v13 }
 0x2b6   : > { %v2648_v2 = vpack.c.bf16 %v2586_v17, %v2584_v26  ;;  %v6024_v17 = vld [vmem:[#allocation7 + $0xa0] ss:$8 sps:$4 sm:$0xff]  }
 0x2b7   : > { %v2649_v25 = vpack.c.bf16 %v2587_v63, %v2585_v37  ;;  %v2435_v12 = vpop.f32.mrb[68].mxu0  ;;  %v6029_v63 = vld [vmem:[#allocation7 + $0xb4] ss:$8 sps:$4 sm:$0xff]   ;;  %3390 = vmatpush1.bf16.msra.mxu0 %v6024_v17 }
 0x2b8   : > { %v2436_v54 = vadd.f32 %v2435_v12, %v7992_v40  ;;  %v2437_v9 = vpop.f32.mrb[69].mxu0  ;;  %3391 = vmatprep.subr.bf16.mxu0 %v6029_v63 }
 0x2b9   : > { %v2438_v29 = vadd.f32 %v2437_v9, %v7998_v33  ;;  %v2439_v39 = vpop.f32.mrb[70].mxu0  ;;  %2912 = vmatprep.mubr.bf16.mxu1 %v2649_v25 }
 0x2ba   : > { %v2440_v51 = vadd.f32 %v2439_v39, %v7992_v40  ;;  %v2441_v45 = vpop.f32.mrb[71].mxu0  ;;  %2913 = vmatmul.mubr.bf16.vlgmr.msra.gmra.mrb[64].mxu1 %v2648_v2  ;;  %v2588_v4 = vmax.f32 %v2436_v54, 0.0  ;;  %v6027_v54 = vld [vmem:[#allocation7 + $0xb0] ss:$8 sps:$4 sm:$0xff]   ;;  %v6032_v39 = vld [vmem:[#allocation7 + $0xc4] ss:$8 sps:$4 sm:$0xff]  }
 0x2bb   : > { %v2442_v61 = vadd.f32 %v2441_v45, %v7998_v33  ;;  %v2589_v59 = vmax.f32 %v2438_v29, 0.0  ;;  %3392 = vmatpush1.bf16.msra.mxu0 %v6027_v54 }
 0x2bc   : > { %v2590_v62 = vmax.f32 %v2440_v51, 0.0  ;;  %3393 = vmatprep.subr.bf16.mxu0 %v6032_v39 }
 0x2bd   : > { %v2591_v60 = vmax.f32 %v2442_v61, 0.0 }
 0x2be   : > { %v2650_v20 = vpack.c.bf16 %v2590_v62, %v2588_v4  ;;  %v6030_v62 = vld [vmem:[#allocation7 + $0xc0] ss:$8 sps:$4 sm:$0xff]  }
 0x2bf   : > { %v2651_v58 = vpack.c.bf16 %v2591_v60, %v2589_v59  ;;  %v2445_v27 = vpop.f32.mrb[72].mxu0  ;;  %v6035_v60 = vld [vmem:[#allocation7 + $0xd4] ss:$8 sps:$4 sm:$0xff]   ;;  %3394 = vmatpush1.bf16.msra.mxu0 %v6030_v62 }
 0x2c0   : > { %v2446_v23 = vadd.f32 %v2445_v27, %v7992_v40  ;;  %v2447_v36 = vpop.f32.mrb[73].mxu0  ;;  %3395 = vmatprep.subr.bf16.mxu0 %v6035_v60 }
 0x2c1   : > { %v2448_v21 = vadd.f32 %v2447_v36, %v7998_v33  ;;  %v2449_v42 = vpop.f32.mrb[74].mxu0  ;;  %2922 = vmatprep.mubr.bf16.mxu1 %v2651_v58 }
 0x2c2   : > { %v2450_v32 = vadd.f32 %v2449_v42, %v7992_v40  ;;  %v2451_v0 = vpop.f32.mrb[75].mxu0  ;;  %2923 = vmatmul.mubr.bf16.gmra.mrb[68].mxu1 %v2650_v20  ;;  %v2592_v41 = vmax.f32 %v2446_v23, 0.0  ;;  %v6033_v23 = vld [vmem:[#allocation7 + $0xd0] ss:$8 sps:$4 sm:$0xff]   ;;  %v6038_v42 = vld [vmem:[#allocation7 + $0xe4] ss:$8 sps:$4 sm:$0xff]  }
 0x2c3   : > { %v2452_v19 = vadd.f32 %v2451_v0, %v7998_v33  ;;  %v2593_v49 = vmax.f32 %v2448_v21, 0.0  ;;  %3396 = vmatpush1.bf16.msra.mxu0 %v6033_v23 }
 0x2c4   : > { %v2594_v50 = vmax.f32 %v2450_v32, 0.0  ;;  %3397 = vmatprep.subr.bf16.mxu0 %v6038_v42 }
 0x2c5   : > { %v2595_v1 = vmax.f32 %v2452_v19, 0.0 }
 0x2c6   : > { %v2652_v10 = vpack.c.bf16 %v2594_v50, %v2592_v41  ;;  %v6036_v50 = vld [vmem:[#allocation7 + $0xe0] ss:$8 sps:$4 sm:$0xff]  }
 0x2c7   : > { %v2653_v24 = vpack.c.bf16 %v2595_v1, %v2593_v49  ;;  %v2455_v44 = vpop.f32.mrb[76].mxu0  ;;  %3398 = vmatpush1.bf16.msra.mxu0 %v6036_v50 }
 0x2c8   : > { %v2456_v22 = vadd.f32 %v2455_v44, %v7992_v40  ;;  %v2457_v46 = vpop.f32.mrb[77].mxu0 }
 0x2c9   : > { %v2458_v43 = vadd.f32 %v2457_v46, %v7998_v33  ;;  %v2459_v11 = vpop.f32.mrb[78].mxu0  ;;  %2932 = vmatprep.mubr.bf16.mxu1 %v2653_v24 }
 0x2ca   : > { %v2460_v34 = vadd.f32 %v2459_v11, %v7992_v40  ;;  %v2461_v26 = vpop.f32.mrb[79].mxu0  ;;  %2933 = vmatmul.mubr.bf16.gmra.mrb[72].mxu1 %v2652_v10  ;;  %v2596_v2 = vmax.f32 %v2456_v22, 0.0 }
 0x2cb   : > { %v2462_v37 = vadd.f32 %v2461_v26, %v7998_v33  ;;  %v2597_v25 = vmax.f32 %v2458_v43, 0.0 }
 0x2cc   : > { %v2598_v38 = vmax.f32 %v2460_v34, 0.0 }
 0x2cd   : > { %v2599_v12 = vmax.f32 %v2462_v37, 0.0 }
 0x2ce   : > { %v2654_v52 = vpack.c.bf16 %v2598_v38, %v2596_v2 }
 0x2cf   : > { %v2655_v9 = vpack.c.bf16 %v2599_v12, %v2597_v25  ;;  %v2465_v29 = vpop.f32.mrb[80].mxu0 }
 0x2d0   : > { %v2466_v51 = vadd.f32 %v2465_v29, %v7992_v40  ;;  %v2467_v45 = vpop.f32.mrb[81].mxu0 }
 0x2d1   : > { %v2468_v7 = vadd.f32 %v2467_v45, %v7998_v33  ;;  %v2469_v61 = vpop.f32.mrb[82].mxu0  ;;  %2942 = vmatprep.mubr.bf16.mxu1 %v2655_v9 }
 0x2d2   : > { %v2470_v47 = vadd.f32 %v2469_v61, %v7992_v40  ;;  %v2471_v4 = vpop.f32.mrb[83].mxu0  ;;  %2943 = vmatmul.mubr.bf16.gmra.mrb[76].mxu1 %v2654_v52  ;;  %v2600_v20 = vmax.f32 %v2466_v51, 0.0 }
 0x2d3   : > { %v2472_v59 = vadd.f32 %v2471_v4, %v7998_v33  ;;  %v2601_v58 = vmax.f32 %v2468_v7, 0.0 }
 0x2d4   : > { %v2602_v35 = vmax.f32 %v2470_v47, 0.0 }
 0x2d5   : > { %v2603_v27 = vmax.f32 %v2472_v59, 0.0 }
 0x2d6   : > { %v2656_v31 = vpack.c.bf16 %v2602_v35, %v2600_v20 }
 0x2d7   : > { %v2657_v36 = vpack.c.bf16 %v2603_v27, %v2601_v58  ;;  %v2475_v21 = vpop.f32.mrb[84].mxu0 }
 0x2d8   : > { %v2476_v32 = vadd.f32 %v2475_v21, %v7992_v40  ;;  %v2477_v0 = vpop.f32.mrb[85].mxu0 }
 0x2d9   : > { %v2478_v57 = vadd.f32 %v2477_v0, %v7998_v33  ;;  %v2479_v19 = vpop.f32.mrb[86].mxu0  ;;  %2952 = vmatprep.mubr.bf16.mxu1 %v2657_v36 }
 0x2da   : > { %v2480_v53 = vadd.f32 %v2479_v19, %v7992_v40  ;;  %v2481_v41 = vpop.f32.mrb[87].mxu0  ;;  %2953 = vmatmul.mubr.bf16.gmra.mrb[80].mxu1 %v2656_v31  ;;  %v2604_v1 = vmax.f32 %v2476_v32, 0.0 }
 0x2db   : > { %v2482_v49 = vadd.f32 %v2481_v41, %v7998_v33  ;;  %v2605_v56 = vmax.f32 %v2478_v57, 0.0 }
 0x2dc   : > { %v2606_v10 = vmax.f32 %v2480_v53, 0.0 }
 0x2dd   : > { %v2607_v24 = vmax.f32 %v2482_v49, 0.0 }
 0x2de   : > { %v2658_v44 = vpack.c.bf16 %v2606_v10, %v2604_v1 }
 0x2df   : > { %v2659_v13 = vpack.c.bf16 %v2607_v24, %v2605_v56  ;;  %v2485_v22 = vpop.f32.mrb[88].mxu0 }
 0x2e0   : > { %v2486_v46 = vadd.f32 %v2485_v22, %v7992_v40  ;;  %v2487_v43 = vpop.f32.mrb[89].mxu0 }
 0x2e1   : > { %v2488_v11 = vadd.f32 %v2487_v43, %v7998_v33  ;;  %v2489_v34 = vpop.f32.mrb[90].mxu0  ;;  %2962 = vmatprep.mubr.bf16.mxu1 %v2659_v13 }
 0x2e2   : > { %v2490_v26 = vadd.f32 %v2489_v34, %v7992_v40  ;;  %v2491_v17 = vpop.f32.mrb[91].mxu0  ;;  %2963 = vmatmul.mubr.bf16.gmra.mrb[84].mxu1 %v2658_v44  ;;  %v2608_v63 = vmax.f32 %v2486_v46, 0.0 }
 0x2e3   : > { %v2492_v37 = vadd.f32 %v2491_v17, %v7998_v33  ;;  %v2609_v38 = vmax.f32 %v2488_v11, 0.0 }
 0x2e4   : > { %v2610_v2 = vmax.f32 %v2490_v26, 0.0 }
 0x2e5   : > { %v2611_v25 = vmax.f32 %v2492_v37, 0.0 }
 0x2e6   : > { %v2660_v12 = vpack.c.bf16 %v2610_v2, %v2608_v63 }
 0x2e7   : > { %v2661_v52 = vpack.c.bf16 %v2611_v25, %v2609_v38  ;;  %v2495_v54 = vpop.f32.mrb[92].mxu0 }
 0x2e8   : > { %v2496_v9 = vadd.f32 %v2495_v54, %v7992_v40  ;;  %v2497_v29 = vpop.f32.mrb[93].mxu0 }
 0x2e9   : > { %v2498_v39 = vadd.f32 %v2497_v29, %v7998_v33  ;;  %v2499_v51 = vpop.f32.mrb[94].mxu0  ;;  %2972 = vmatprep.mubr.bf16.mxu1 %v2661_v52 }
 0x2ea   : > { %v2500_v45 = vadd.f32 %v2499_v51, %v7992_v40  ;;  %v2501_v7 = vpop.f32.mrb[95].mxu0  ;;  %2973 = vmatmul.mubr.bf16.gmra.mrb[88].mxu1 %v2660_v12  ;;  %v2612_v47 = vmax.f32 %v2496_v9, 0.0 }
 0x2eb   : > { %v2502_v61 = vadd.f32 %v2501_v7, %v7998_v33  ;;  %v2613_v62 = vmax.f32 %v2498_v39, 0.0 }
 0x2ec   : > { %v2614_v4 = vmax.f32 %v2500_v45, 0.0 }
 0x2ed   : > { %v2615_v59 = vmax.f32 %v2502_v61, 0.0 }
 0x2ee   : > { %v2662_v60 = vpack.c.bf16 %v2614_v4, %v2612_v47 }
 0x2ef   : > { %v2663_v20 = vpack.c.bf16 %v2615_v59, %v2613_v62  ;;  %v2505_v35 = vpop.f32.mrb[96].mxu0 }
 0x2f0   : > { %v2506_v58 = vadd.f32 %v2505_v35, %v7992_v40  ;;  %v2507_v27 = vpop.f32.mrb[97].mxu0 }
 0x2f1   : > { %v2508_v31 = vadd.f32 %v2507_v27, %v7998_v33  ;;  %v2509_v23 = vpop.f32.mrb[98].mxu0  ;;  %2982 = vmatprep.mubr.bf16.mxu1 %v2663_v20 }
 0x2f2   : > { %v2510_v36 = vadd.f32 %v2509_v23, %v7992_v40  ;;  %v2511_v21 = vpop.f32.mrb[99].mxu0  ;;  %2983 = vmatmul.mubr.bf16.gmra.mrb[92].mxu1 %v2662_v60  ;;  %v2616_v32 = vmax.f32 %v2506_v58, 0.0 }
 0x2f3   : > { %v2512_v42 = vadd.f32 %v2511_v21, %v7998_v33  ;;  %v2617_v57 = vmax.f32 %v2508_v31, 0.0 }
 0x2f4   : > { %v2618_v0 = vmax.f32 %v2510_v36, 0.0 }
 0x2f5   : > { %v2619_v19 = vmax.f32 %v2512_v42, 0.0 }
 0x2f6   : > { %v2664_v53 = vpack.c.bf16 %v2618_v0, %v2616_v32 }
 0x2f7   : > { %v2665_v41 = vpack.c.bf16 %v2619_v19, %v2617_v57  ;;  %v2515_v50 = vpop.f32.mrb[100].mxu0 }
 0x2f8   : > { %v2516_v49 = vadd.f32 %v2515_v50, %v7992_v40  ;;  %v2517_v1 = vpop.f32.mrb[101].mxu0 }
 0x2f9   : > { %v2518_v10 = vadd.f32 %v2517_v1, %v7998_v33  ;;  %v2519_v56 = vpop.f32.mrb[102].mxu0  ;;  %2992 = vmatprep.mubr.bf16.mxu1 %v2665_v41  ;;  %v6041_v41 = vld [vmem:[#allocation7 + $0xf4] ss:$8 sps:$4 sm:$0xff]  }
 0x2fa   : > { %v2520_v24 = vadd.f32 %v2519_v56, %v7992_v40  ;;  %v2521_v44 = vpop.f32.mrb[103].mxu0  ;;  %2993 = vmatmul.mubr.bf16.gmra.mrb[96].mxu1 %v2664_v53  ;;  %v2620_v22 = vmax.f32 %v2516_v49, 0.0  ;;  %v6039_v49 = vld [vmem:[#allocation7 + $0xf0] ss:$8 sps:$4 sm:$0xff]   ;;  %3399 = vmatprep.subr.bf16.mxu0 %v6041_v41 }
 0x2fb   : > { %v2522_v13 = vadd.f32 %v2521_v44, %v7998_v33  ;;  %v2621_v43 = vmax.f32 %v2518_v10, 0.0  ;;  %3400 = vmatpush1.bf16.msra.mxu0 %v6039_v49  ;;  %v6044_v49 = vld [vmem:[#allocation8 + $0x4] ss:$8 sps:$4 sm:$0xff]  }
 0x2fc   : > { %v2622_v46 = vmax.f32 %v2520_v24, 0.0  ;;  %3850 = vmatprep.subr.bf16.mxu1 %v6044_v49 }
 0x2fd   : > { %v2623_v11 = vmax.f32 %v2522_v13, 0.0 }
 0x2fe   : > { %v2666_v34 = vpack.c.bf16 %v2622_v46, %v2620_v22 }
 0x2ff   : > { %v2667_v26 = vpack.c.bf16 %v2623_v11, %v2621_v43  ;;  %v2525_v17 = vpop.f32.mrb[104].mxu0 }
 0x300   : > { %v2526_v37 = vadd.f32 %v2525_v17, %v7992_v40  ;;  %v2527_v63 = vpop.f32.mrb[105].mxu0 }
 0x301   : > { %v2528_v2 = vadd.f32 %v2527_v63, %v7998_v33  ;;  %v2529_v38 = vpop.f32.mrb[106].mxu0  ;;  %3002 = vmatprep.mubr.bf16.mxu1 %v2667_v26 }
 0x302   : > { %v2530_v25 = vadd.f32 %v2529_v38, %v7992_v40  ;;  %v2531_v12 = vpop.f32.mrb[107].mxu0  ;;  %3003 = vmatmul.mubr.bf16.gmra.mrb[100].mxu1 %v2666_v34  ;;  %v2624_v54 = vmax.f32 %v2526_v37, 0.0 }
 0x303   : > { %v2532_v52 = vadd.f32 %v2531_v12, %v7998_v33  ;;  %v2625_v29 = vmax.f32 %v2528_v2, 0.0 }
 0x304   : > { %v2626_v9 = vmax.f32 %v2530_v25, 0.0 }
 0x305   : > { %v2627_v39 = vmax.f32 %v2532_v52, 0.0 }
 0x306   : > { %v2668_v51 = vpack.c.bf16 %v2626_v9, %v2624_v54 }
 0x307   : > { %v2669_v45 = vpack.c.bf16 %v2627_v39, %v2625_v29  ;;  %v2535_v7 = vpop.f32.mrb[108].mxu0 }
 0x308   : > { %v2536_v61 = vadd.f32 %v2535_v7, %v7992_v40  ;;  %v2537_v47 = vpop.f32.mrb[109].mxu0 }
 0x309   : > { %v2538_v4 = vadd.f32 %v2537_v47, %v7998_v33  ;;  %v2539_v62 = vpop.f32.mrb[110].mxu0  ;;  %3012 = vmatprep.mubr.bf16.mxu1 %v2669_v45 }
 0x30a   : > { %v2540_v59 = vadd.f32 %v2539_v62, %v7992_v40  ;;  %v2541_v60 = vpop.f32.mrb[111].mxu0  ;;  %3013 = vmatmul.mubr.bf16.gmra.mrb[104].mxu1 %v2668_v51  ;;  %v2628_v35 = vmax.f32 %v2536_v61, 0.0 }
 0x30b   : > { %v2542_v20 = vadd.f32 %v2541_v60, %v7998_v33  ;;  %v2629_v27 = vmax.f32 %v2538_v4, 0.0 }
 0x30c   : > { %v2630_v58 = vmax.f32 %v2540_v59, 0.0 }
 0x30d   : > { %v2631_v31 = vmax.f32 %v2542_v20, 0.0 }
 0x30e   : > { %v2670_v23 = vpack.c.bf16 %v2630_v58, %v2628_v35 }
 0x30f   : > { %v2671_v36 = vpack.c.bf16 %v2631_v31, %v2629_v27  ;;  %v2545_v21 = vpop.f32.mrb[112].mxu0 }
 0x310   : > { %v2546_v42 = vadd.f32 %v2545_v21, %v7992_v40  ;;  %v2547_v32 = vpop.f32.mrb[113].mxu0 }
 0x311   : > { %v2548_v0 = vadd.f32 %v2547_v32, %v7998_v33  ;;  %v2549_v57 = vpop.f32.mrb[114].mxu0  ;;  %3022 = vmatprep.mubr.bf16.mxu1 %v2671_v36 }
 0x312   : > { %v2550_v19 = vadd.f32 %v2549_v57, %v7992_v40  ;;  %v2551_v53 = vpop.f32.mrb[115].mxu0  ;;  %3023 = vmatmul.mubr.bf16.gmra.mrb[108].mxu1 %v2670_v23  ;;  %v2632_v1 = vmax.f32 %v2546_v42, 0.0 }
 0x313   : > { %v2552_v50 = vadd.f32 %v2551_v53, %v7998_v33  ;;  %v2633_v56 = vmax.f32 %v2548_v0, 0.0 }
 0x314   : > { %v2634_v10 = vmax.f32 %v2550_v19, 0.0 }
 0x315   : > { %v2635_v24 = vmax.f32 %v2552_v50, 0.0  ;;  %v6042_v50 = vld [vmem:[#allocation8] ss:$8 sps:$4 sm:$0xff]  }
 0x316   : > { %v2672_v44 = vpack.c.bf16 %v2634_v10, %v2632_v1  ;;  %3851 = vmatpush1.bf16.msra.mxu1 %v6042_v50  ;;  %v6045_v1 = vld [vmem:[#allocation8 + $0x10] ss:$8 sps:$4 sm:$0xff]   ;;  %v6047_v10 = vld [vmem:[#allocation8 + $0x14] ss:$8 sps:$4 sm:$0xff]  }
 0x317   : > { %v2673_v13 = vpack.c.bf16 %v2635_v24, %v2633_v56  ;;  %v2555_v22 = vpop.f32.mrb[116].mxu0  ;;  %3852 = vmatprep.subr.bf16.mxu1 %v6047_v10  ;;  %v6048_v24 = vld [vmem:[#allocation8 + $0x20] ss:$8 sps:$4 sm:$0xff]  }
 0x318   : > { %v2556_v46 = vadd.f32 %v2555_v22, %v7992_v40  ;;  %v2557_v43 = vpop.f32.mrb[117].mxu0 }
 0x319   : > { %v2558_v11 = vadd.f32 %v2557_v43, %v7998_v33  ;;  %v2559_v34 = vpop.f32.mrb[118].mxu0  ;;  %3032 = vmatprep.mubr.bf16.mxu1 %v2673_v13  ;;  %v6053_v43 = vld [vmem:[#allocation8 + $0x34] ss:$8 sps:$4 sm:$0xff]  }
 0x31a   : > { %v2560_v26 = vadd.f32 %v2559_v34, %v7992_v40  ;;  %v2561_v17 = vpop.f32.mrb[119].mxu0  ;;  %3033 = vmatmul.mubr.bf16.gmra.mrb[112].mxu1 %v2672_v44  ;;  %v2636_v63 = vmax.f32 %v2556_v46, 0.0  ;;  %v6051_v46 = vld [vmem:[#allocation8 + $0x30] ss:$8 sps:$4 sm:$0xff]  }
 0x31b   : > { %v2562_v37 = vadd.f32 %v2561_v17, %v7998_v33  ;;  %v2637_v38 = vmax.f32 %v2558_v11, 0.0  ;;  %3853 = vmatpush1.bf16.msra.mxu1 %v6045_v1  ;;  %v6066_v1 = vld [vmem:[#allocation8 + $0x80] ss:$8 sps:$4 sm:$0xff]  }
 0x31c   : > { %v2638_v2 = vmax.f32 %v2560_v26, 0.0 }
 0x31d   : > { %v2639_v25 = vmax.f32 %v2562_v37, 0.0 }
 0x31e   : > { %v2674_v12 = vpack.c.bf16 %v2638_v2, %v2636_v63  ;;  %v6056_v2 = vld [vmem:[#allocation8 + $0x44] ss:$8 sps:$4 sm:$0xff]  }
 0x31f   : > { %v2675_v52 = vpack.c.bf16 %v2639_v25, %v2637_v38  ;;  %v2565_v54 = vpop.f32.mrb[120].mxu0  ;;  %v6059_v38 = vld [vmem:[#allocation8 + $0x54] ss:$8 sps:$4 sm:$0xff]  }
 0x320   : > { %v2566_v9 = vadd.f32 %v2565_v54, %v7992_v40  ;;  %v2567_v29 = vpop.f32.mrb[121].mxu0 }
 0x321   : > { %v2568_v39 = vadd.f32 %v2567_v29, %v7998_v33  ;;  %v2569_v51 = vpop.f32.mrb[122].mxu0  ;;  %3042 = vmatprep.mubr.bf16.mxu1 %v2675_v52  ;;  %v6057_v29 = vld [vmem:[#allocation8 + $0x50] ss:$8 sps:$4 sm:$0xff]  }
 0x322   : > { %v2570_v45 = vadd.f32 %v2569_v51, %v7992_v40  ;;  %v2571_v7 = vpop.f32.mrb[123].mxu0  ;;  %3043 = vmatmul.mubr.bf16.gmra.mrb[116].mxu1 %v2674_v12  ;;  %v2640_v47 = vmax.f32 %v2566_v9, 0.0 }
 0x323   : > { %v2572_v61 = vadd.f32 %v2571_v7, %v7998_v33  ;;  %v2641_v62 = vmax.f32 %v2568_v39, 0.0 }
 0x324   : > { %v2642_v4 = vmax.f32 %v2570_v45, 0.0  ;;  %v6062_v45 = vld [vmem:[#allocation8 + $0x64] ss:$8 sps:$4 sm:$0xff]  }
 0x325   : > { %v2643_v59 = vmax.f32 %v2572_v61, 0.0 }
 0x326   : > { %v2676_v60 = vpack.c.bf16 %v2642_v4, %v2640_v47 }
 0x327   : > { %v2677_v20 = vpack.c.bf16 %v2643_v59, %v2641_v62  ;;  %v2575_v35 = vpop.f32.mrb[124].mxu0 }
 0x328   : > { %v2576_v58 = vadd.f32 %v2575_v35, %v7992_v40  ;;  %v2577_v27 = vpop.f32.mrb[125].mxu0  ;;  %v6065_v35 = vld [vmem:[#allocation8 + $0x74] ss:$8 sps:$4 sm:$0xff]  }
 0x329   : > { %v2578_v31 = vadd.f32 %v2577_v27, %v7998_v33  ;;  %v2579_v23 = vpop.f32.mrb[126].mxu0  ;;  %3052 = vmatprep.mubr.bf16.mxu1 %v2677_v20 }
 0x32a   : > { %v2580_v36 = vadd.f32 %v2579_v23, %v7992_v40  ;;  %v2581_v21 = vpop.f32.mrb[127].mxu0  ;;  %3053 = vmatmul.mubr.bf16.gmra.mrb[120].mxu1 %v2676_v60  ;;  %v2644_v32 = vmax.f32 %v2576_v58, 0.0  ;;  %v8733_v40 = vld [vmem:[#allocation26_spill] sm:$0xff]  ;;  %v6060_v60 = vld [vmem:[#allocation8 + $0x60] ss:$8 sps:$4 sm:$0xff]  }
 0x32b   : > { %v2582_v42 = vadd.f32 %v2581_v21, %v7998_v33  ;;  %v2645_v57 = vmax.f32 %v2578_v31, 0.0  ;;  %v2714_v56 = vsub.s32 2, %v8733_v40  ;;  %v6050_v33 = vld [vmem:[#allocation8 + $0x24] ss:$8 sps:$4 sm:$0xff]   ;;  %v6063_v21 = vld [vmem:[#allocation8 + $0x70] ss:$8 sps:$4 sm:$0xff]  }
 0x32c   : > { %v2646_v0 = vmax.f32 %v2580_v36, 0.0  ;;  %3854 = vmatprep.subr.bf16.mxu1 %v6050_v33 }
 0x32d   : > { %v2647_v19 = vmax.f32 %v2582_v42, 0.0  ;;  %v8066_v44 = vrot.slane %v7988_v6, %v2714_v56  ;;  %v8069_v13 = vrot.slane %v7994_v16, %v2714_v56  ;;  %3855 = vmatpush1.bf16.msra.mxu1 %v6048_v24  ;;  %v6054_v6 = vld [vmem:[#allocation8 + $0x40] ss:$8 sps:$4 sm:$0xff]   ;;  %v6071_v56 = vld [vmem:[#allocation8 + $0x94] ss:$8 sps:$4 sm:$0xff]  }
 0x32e   : > { %v2678_v53 = vpack.c.bf16 %v2646_v0, %v2644_v32  ;;  %3856 = vmatprep.subr.bf16.mxu1 %v6053_v43  ;;  %v6068_v0 = vld [vmem:[#allocation8 + $0x84] ss:$8 sps:$4 sm:$0xff]  }
 0x32f   : > { %v2679_v41 = vpack.c.bf16 %v2647_v19, %v2645_v57 }
 0x331   : > { %3062 = vmatprep.mubr.bf16.mxu1 %v2679_v41  ;;  %3857 = vmatpush1.bf16.msra.mxu1 %v6051_v46 }
 0x332   : > { %3063 = vmatmul.mubr.bf16.gmra.mrb[124].mxu1 %v2678_v53  ;;  %3858 = vmatprep.subr.bf16.mxu1 %v6056_v2 }
 0x335   : > { %3859 = vmatpush1.bf16.msra.mxu1 %v6054_v6 }
 0x336   : > { %3860 = vmatprep.subr.bf16.mxu1 %v6059_v38 }
 0x339   : > { %3861 = vmatpush1.bf16.msra.mxu1 %v6057_v29 }
 0x33a   : > { %3862 = vmatprep.subr.bf16.mxu1 %v6062_v45  ;;  %v6075_v45 = vld [vmem:[#allocation8 + $0xb0] ss:$8 sps:$4 sm:$0xff]  }
 0x33d   : > { %3863 = vmatpush1.bf16.msra.mxu1 %v6060_v60 }
 0x33e   : > { %3864 = vmatprep.subr.bf16.mxu1 %v6065_v35 }
 0x341   : > { %3865 = vmatpush1.bf16.msra.mxu1 %v6063_v21 }
 0x342   : > { %3866 = vmatprep.subr.bf16.mxu1 %v6068_v0  ;;  %v6081_v0 = vld [vmem:[#allocation8 + $0xd0] ss:$8 sps:$4 sm:$0xff]  }
 0x345   : > { %3867 = vmatpush1.bf16.msra.mxu1 %v6066_v1 }
 0x346   : > { %3868 = vmatprep.subr.bf16.mxu1 %v6071_v56 }
 0x38d   : > { %v2914_v22 = vpop.f32.mrb[64].mxu1 }
 0x38e   : > { %v2915_v11 = vadd.f32 %v2914_v22, %v8066_v44  ;;  %v2916_v34 = vpop.f32.mrb[65].mxu1 }
 0x38f   : > { %v2917_v26 = vadd.f32 %v2916_v34, %v8069_v13  ;;  %v2918_v17 = vpop.f32.mrb[66].mxu1 }
 0x390   : > { %v2919_v37 = vadd.f32 %v2918_v17, %v8066_v44  ;;  %v2920_v63 = vpop.f32.mrb[67].mxu1  ;;  %v3073_v25 = vmax.f32 %v2915_v11, 0.0  ;;  %v6069_v11 = vld [vmem:[#allocation8 + $0x90] ss:$8 sps:$4 sm:$0xff]   ;;  %v6074_v17 = vld [vmem:[#allocation8 + $0xa4] ss:$8 sps:$4 sm:$0xff]  }
 0x391   : > { %v2921_v16 = vadd.f32 %v2920_v63, %v8069_v13  ;;  %v3074_v52 = vmax.f32 %v2917_v26, 0.0  ;;  %3869 = vmatpush1.bf16.msra.mxu1 %v6069_v11 }
 0x392   : > { %v3075_v12 = vmax.f32 %v2919_v37, 0.0  ;;  %3870 = vmatprep.subr.bf16.mxu1 %v6074_v17 }
 0x393   : > { %v3076_v54 = vmax.f32 %v2921_v16, 0.0 }
 0x394   : > { %v3137_v9 = vpack.c.bf16 %v3075_v12, %v3073_v25  ;;  %v6072_v25 = vld [vmem:[#allocation8 + $0xa0] ss:$8 sps:$4 sm:$0xff]  }
 0x395   : > { %v3138_v39 = vpack.c.bf16 %v3076_v54, %v3074_v52  ;;  %v2924_v51 = vpop.f32.mrb[68].mxu1  ;;  %v6077_v52 = vld [vmem:[#allocation8 + $0xb4] ss:$8 sps:$4 sm:$0xff]   ;;  %3871 = vmatpush1.bf16.msra.mxu1 %v6072_v25 }
 0x396   : > { %v2925_v7 = vadd.f32 %v2924_v51, %v8066_v44  ;;  %v2926_v61 = vpop.f32.mrb[69].mxu1  ;;  %3872 = vmatprep.subr.bf16.mxu1 %v6077_v52 }
 0x397   : > { %v2927_v47 = vadd.f32 %v2926_v61, %v8069_v13  ;;  %v2928_v4 = vpop.f32.mrb[70].mxu1  ;;  %3401 = vmatprep.mubr.bf16.mxu0 %v3138_v39 }
 0x398   : > { %v2929_v62 = vadd.f32 %v2928_v4, %v8066_v44  ;;  %v2930_v59 = vpop.f32.mrb[71].mxu1  ;;  %3402 = vmatmul.mubr.bf16.vlgmr.msra.gmra.mrb[128].mxu0 %v3137_v9  ;;  %v3077_v58 = vmax.f32 %v2925_v7, 0.0 }
 0x399   : > { %v2931_v20 = vadd.f32 %v2930_v59, %v8069_v13  ;;  %v3078_v31 = vmax.f32 %v2927_v47, 0.0  ;;  %v6080_v47 = vld [vmem:[#allocation8 + $0xc4] ss:$8 sps:$4 sm:$0xff]   ;;  %3873 = vmatpush1.bf16.msra.mxu1 %v6075_v45 }
 0x39a   : > { %v3079_v27 = vmax.f32 %v2929_v62, 0.0  ;;  %3874 = vmatprep.subr.bf16.mxu1 %v6080_v47 }
 0x39b   : > { %v3080_v23 = vmax.f32 %v2931_v20, 0.0 }
 0x39c   : > { %v3139_v36 = vpack.c.bf16 %v3079_v27, %v3077_v58  ;;  %v6078_v58 = vld [vmem:[#allocation8 + $0xc0] ss:$8 sps:$4 sm:$0xff]  }
 0x39d   : > { %v3140_v42 = vpack.c.bf16 %v3080_v23, %v3078_v31  ;;  %v2934_v32 = vpop.f32.mrb[72].mxu1  ;;  %v6083_v31 = vld [vmem:[#allocation8 + $0xd4] ss:$8 sps:$4 sm:$0xff]   ;;  %3875 = vmatpush1.bf16.msra.mxu1 %v6078_v58 }
 0x39e   : > { %v2935_v57 = vadd.f32 %v2934_v32, %v8066_v44  ;;  %v2936_v19 = vpop.f32.mrb[73].mxu1  ;;  %3876 = vmatprep.subr.bf16.mxu1 %v6083_v31 }
 0x39f   : > { %v2937_v53 = vadd.f32 %v2936_v19, %v8069_v13  ;;  %v2938_v41 = vpop.f32.mrb[74].mxu1  ;;  %3411 = vmatprep.mubr.bf16.mxu0 %v3140_v42 }
 0x3a0   : > { %v2939_v50 = vadd.f32 %v2938_v41, %v8066_v44  ;;  %v2940_v49 = vpop.f32.mrb[75].mxu1  ;;  %3412 = vmatmul.mubr.bf16.gmra.mrb[132].mxu0 %v3139_v36  ;;  %v3081_v24 = vmax.f32 %v2935_v57, 0.0 }
 0x3a1   : > { %v2941_v10 = vadd.f32 %v2940_v49, %v8069_v13  ;;  %v3082_v22 = vmax.f32 %v2937_v53, 0.0  ;;  %v6086_v53 = vld [vmem:[#allocation8 + $0xe4] ss:$8 sps:$4 sm:$0xff]   ;;  %3877 = vmatpush1.bf16.msra.mxu1 %v6081_v0 }
 0x3a2   : > { %v3083_v33 = vmax.f32 %v2939_v50, 0.0  ;;  %3878 = vmatprep.subr.bf16.mxu1 %v6086_v53 }
 0x3a3   : > { %v3084_v46 = vmax.f32 %v2941_v10, 0.0 }
 0x3a4   : > { %v3141_v43 = vpack.c.bf16 %v3083_v33, %v3081_v24  ;;  %v6084_v24 = vld [vmem:[#allocation8 + $0xe0] ss:$8 sps:$4 sm:$0xff]  }
 0x3a5   : > { %v3142_v34 = vpack.c.bf16 %v3084_v46, %v3082_v22  ;;  %v2944_v26 = vpop.f32.mrb[76].mxu1  ;;  %3879 = vmatpush1.bf16.msra.mxu1 %v6084_v24 }
 0x3a6   : > { %v2945_v37 = vadd.f32 %v2944_v26, %v8066_v44  ;;  %v2946_v63 = vpop.f32.mrb[77].mxu1 }
 0x3a7   : > { %v2947_v6 = vadd.f32 %v2946_v63, %v8069_v13  ;;  %v2948_v2 = vpop.f32.mrb[78].mxu1  ;;  %3421 = vmatprep.mubr.bf16.mxu0 %v3142_v34 }
 0x3a8   : > { %v2949_v16 = vadd.f32 %v2948_v2, %v8066_v44  ;;  %v2950_v38 = vpop.f32.mrb[79].mxu1  ;;  %3422 = vmatmul.mubr.bf16.gmra.mrb[136].mxu0 %v3141_v43  ;;  %v3085_v54 = vmax.f32 %v2945_v37, 0.0 }
 0x3a9   : > { %v2951_v12 = vadd.f32 %v2950_v38, %v8069_v13  ;;  %v3086_v29 = vmax.f32 %v2947_v6, 0.0 }
 0x3aa   : > { %v3087_v9 = vmax.f32 %v2949_v16, 0.0 }
 0x3ab   : > { %v3088_v39 = vmax.f32 %v2951_v12, 0.0 }
 0x3ac   : > { %v3143_v51 = vpack.c.bf16 %v3087_v9, %v3085_v54 }
 0x3ad   : > { %v3144_v7 = vpack.c.bf16 %v3088_v39, %v3086_v29  ;;  %v2954_v61 = vpop.f32.mrb[80].mxu1 }
 0x3ae   : > { %v2955_v4 = vadd.f32 %v2954_v61, %v8066_v44  ;;  %v2956_v62 = vpop.f32.mrb[81].mxu1 }
 0x3af   : > { %v2957_v59 = vadd.f32 %v2956_v62, %v8069_v13  ;;  %v2958_v60 = vpop.f32.mrb[82].mxu1  ;;  %3431 = vmatprep.mubr.bf16.mxu0 %v3144_v7 }
 0x3b0   : > { %v2959_v20 = vadd.f32 %v2958_v60, %v8066_v44  ;;  %v2960_v35 = vpop.f32.mrb[83].mxu1  ;;  %3432 = vmatmul.mubr.bf16.gmra.mrb[140].mxu0 %v3143_v51  ;;  %v3089_v23 = vmax.f32 %v2955_v4, 0.0 }
 0x3b1   : > { %v2961_v27 = vadd.f32 %v2960_v35, %v8069_v13  ;;  %v3090_v21 = vmax.f32 %v2957_v59, 0.0 }
 0x3b2   : > { %v3091_v36 = vmax.f32 %v2959_v20, 0.0 }
 0x3b3   : > { %v3092_v42 = vmax.f32 %v2961_v27, 0.0 }
 0x3b4   : > { %v3145_v32 = vpack.c.bf16 %v3091_v36, %v3089_v23 }
 0x3b5   : > { %v3146_v57 = vpack.c.bf16 %v3092_v42, %v3090_v21  ;;  %v2964_v19 = vpop.f32.mrb[84].mxu1 }
 0x3b6   : > { %v2965_v41 = vadd.f32 %v2964_v19, %v8066_v44  ;;  %v2966_v50 = vpop.f32.mrb[85].mxu1 }
 0x3b7   : > { %v2967_v49 = vadd.f32 %v2966_v50, %v8069_v13  ;;  %v2968_v1 = vpop.f32.mrb[86].mxu1  ;;  %3441 = vmatprep.mubr.bf16.mxu0 %v3146_v57 }
 0x3b8   : > { %v2969_v10 = vadd.f32 %v2968_v1, %v8066_v44  ;;  %v2970_v56 = vpop.f32.mrb[87].mxu1  ;;  %3442 = vmatmul.mubr.bf16.gmra.mrb[144].mxu0 %v3145_v32  ;;  %v3093_v22 = vmax.f32 %v2965_v41, 0.0 }
 0x3b9   : > { %v2971_v33 = vadd.f32 %v2970_v56, %v8069_v13  ;;  %v3094_v43 = vmax.f32 %v2967_v49, 0.0 }
 0x3ba   : > { %v3095_v46 = vmax.f32 %v2969_v10, 0.0 }
 0x3bb   : > { %v3096_v11 = vmax.f32 %v2971_v33, 0.0 }
 0x3bc   : > { %v3147_v34 = vpack.c.bf16 %v3095_v46, %v3093_v22 }
 0x3bd   : > { %v3148_v26 = vpack.c.bf16 %v3096_v11, %v3094_v43  ;;  %v2974_v17 = vpop.f32.mrb[88].mxu1 }
 0x3be   : > { %v2975_v37 = vadd.f32 %v2974_v17, %v8066_v44  ;;  %v2976_v63 = vpop.f32.mrb[89].mxu1 }
 0x3bf   : > { %v2977_v6 = vadd.f32 %v2976_v63, %v8069_v13  ;;  %v2978_v2 = vpop.f32.mrb[90].mxu1  ;;  %3451 = vmatprep.mubr.bf16.mxu0 %v3148_v26 }
 0x3c0   : > { %v2979_v16 = vadd.f32 %v2978_v2, %v8066_v44  ;;  %v2980_v38 = vpop.f32.mrb[91].mxu1  ;;  %3452 = vmatmul.mubr.bf16.gmra.mrb[148].mxu0 %v3147_v34  ;;  %v3097_v12 = vmax.f32 %v2975_v37, 0.0 }
 0x3c1   : > { %v2981_v25 = vadd.f32 %v2980_v38, %v8069_v13  ;;  %v3098_v54 = vmax.f32 %v2977_v6, 0.0 }
 0x3c2   : > { %v3099_v52 = vmax.f32 %v2979_v16, 0.0 }
 0x3c3   : > { %v3100_v9 = vmax.f32 %v2981_v25, 0.0 }
 0x3c4   : > { %v3149_v29 = vpack.c.bf16 %v3099_v52, %v3097_v12 }
 0x3c5   : > { %v3150_v39 = vpack.c.bf16 %v3100_v9, %v3098_v54  ;;  %v2984_v51 = vpop.f32.mrb[92].mxu1 }
 0x3c6   : > { %v2985_v45 = vadd.f32 %v2984_v51, %v8066_v44  ;;  %v2986_v7 = vpop.f32.mrb[93].mxu1 }
 0x3c7   : > { %v2987_v61 = vadd.f32 %v2986_v7, %v8069_v13  ;;  %v2988_v47 = vpop.f32.mrb[94].mxu1  ;;  %3461 = vmatprep.mubr.bf16.mxu0 %v3150_v39 }
 0x3c8   : > { %v2989_v4 = vadd.f32 %v2988_v47, %v8066_v44  ;;  %v2990_v62 = vpop.f32.mrb[95].mxu1  ;;  %3462 = vmatmul.mubr.bf16.gmra.mrb[152].mxu0 %v3149_v29  ;;  %v3101_v60 = vmax.f32 %v2985_v45, 0.0 }
 0x3c9   : > { %v2991_v59 = vadd.f32 %v2990_v62, %v8069_v13  ;;  %v3102_v35 = vmax.f32 %v2987_v61, 0.0 }
 0x3ca   : > { %v3103_v20 = vmax.f32 %v2989_v4, 0.0 }
 0x3cb   : > { %v3104_v58 = vmax.f32 %v2991_v59, 0.0 }
 0x3cc   : > { %v3151_v27 = vpack.c.bf16 %v3103_v20, %v3101_v60 }
 0x3cd   : > { %v3152_v31 = vpack.c.bf16 %v3104_v58, %v3102_v35  ;;  %v2994_v23 = vpop.f32.mrb[96].mxu1 }
 0x3ce   : > { %v2995_v36 = vadd.f32 %v2994_v23, %v8066_v44  ;;  %v2996_v21 = vpop.f32.mrb[97].mxu1 }
 0x3cf   : > { %v2997_v42 = vadd.f32 %v2996_v21, %v8069_v13  ;;  %v2998_v32 = vpop.f32.mrb[98].mxu1  ;;  %3471 = vmatprep.mubr.bf16.mxu0 %v3152_v31 }
 0x3d0   : > { %v2999_v0 = vadd.f32 %v2998_v32, %v8066_v44  ;;  %v3000_v57 = vpop.f32.mrb[99].mxu1  ;;  %3472 = vmatmul.mubr.bf16.gmra.mrb[156].mxu0 %v3151_v27  ;;  %v3105_v53 = vmax.f32 %v2995_v36, 0.0 }
 0x3d1   : > { %v3001_v19 = vadd.f32 %v3000_v57, %v8069_v13  ;;  %v3106_v50 = vmax.f32 %v2997_v42, 0.0 }
 0x3d2   : > { %v3107_v41 = vmax.f32 %v2999_v0, 0.0 }
 0x3d3   : > { %v3108_v49 = vmax.f32 %v3001_v19, 0.0 }
 0x3d4   : > { %v3153_v1 = vpack.c.bf16 %v3107_v41, %v3105_v53 }
 0x3d5   : > { %v3154_v10 = vpack.c.bf16 %v3108_v49, %v3106_v50  ;;  %v3004_v56 = vpop.f32.mrb[100].mxu1 }
 0x3d6   : > { %v3005_v24 = vadd.f32 %v3004_v56, %v8066_v44  ;;  %v3006_v33 = vpop.f32.mrb[101].mxu1  ;;  %v6087_v56 = vld [vmem:[#allocation8 + $0xf0] ss:$8 sps:$4 sm:$0xff]  }
 0x3d7   : > { %v3007_v22 = vadd.f32 %v3006_v33, %v8069_v13  ;;  %v3008_v46 = vpop.f32.mrb[102].mxu1  ;;  %3481 = vmatprep.mubr.bf16.mxu0 %v3154_v10 }
 0x3d8   : > { %v3009_v43 = vadd.f32 %v3008_v46, %v8066_v44  ;;  %v3010_v11 = vpop.f32.mrb[103].mxu1  ;;  %3482 = vmatmul.mubr.bf16.gmra.mrb[160].mxu0 %v3153_v1  ;;  %v3109_v26 = vmax.f32 %v3005_v24, 0.0  ;;  %v6089_v1 = vld [vmem:[#allocation8 + $0xf4] ss:$8 sps:$4 sm:$0xff]  }
 0x3d9   : > { %v3011_v34 = vadd.f32 %v3010_v11, %v8069_v13  ;;  %v3110_v37 = vmax.f32 %v3007_v22, 0.0  ;;  %3880 = vmatprep.subr.bf16.mxu1 %v6089_v1  ;;  %v6090_v1 = vld [vmem:[#allocation10] ss:$8 sps:$4 sm:$0xff]  }
 0x3da   : > { %v3111_v17 = vmax.f32 %v3009_v43, 0.0  ;;  %3881 = vmatpush1.bf16.msra.mxu1 %v6087_v56  ;;  %v6093_v56 = vld [vmem:[#allocation10 + $0x10] ss:$8 sps:$4 sm:$0xff]  }
 0x3db   : > { %v3112_v63 = vmax.f32 %v3011_v34, 0.0 }
 0x3dc   : > { %v3155_v6 = vpack.c.bf16 %v3111_v17, %v3109_v26 }
 0x3dd   : > { %v3156_v2 = vpack.c.bf16 %v3112_v63, %v3110_v37  ;;  %v3014_v16 = vpop.f32.mrb[104].mxu1 }
 0x3de   : > { %v3015_v38 = vadd.f32 %v3014_v16, %v8066_v44  ;;  %v3016_v25 = vpop.f32.mrb[105].mxu1 }
 0x3df   : > { %v3017_v12 = vadd.f32 %v3016_v25, %v8069_v13  ;;  %v3018_v52 = vpop.f32.mrb[106].mxu1  ;;  %3491 = vmatprep.mubr.bf16.mxu0 %v3156_v2 }
 0x3e0   : > { %v3019_v54 = vadd.f32 %v3018_v52, %v8066_v44  ;;  %v3020_v9 = vpop.f32.mrb[107].mxu1  ;;  %3492 = vmatmul.mubr.bf16.gmra.mrb[164].mxu0 %v3155_v6  ;;  %v3113_v39 = vmax.f32 %v3015_v38, 0.0 }
 0x3e1   : > { %v3021_v29 = vadd.f32 %v3020_v9, %v8069_v13  ;;  %v3114_v45 = vmax.f32 %v3017_v12, 0.0 }
 0x3e2   : > { %v3115_v51 = vmax.f32 %v3019_v54, 0.0 }
 0x3e3   : > { %v3116_v7 = vmax.f32 %v3021_v29, 0.0 }
 0x3e4   : > { %v3157_v61 = vpack.c.bf16 %v3115_v51, %v3113_v39 }
 0x3e5   : > { %v3158_v47 = vpack.c.bf16 %v3116_v7, %v3114_v45  ;;  %v3024_v4 = vpop.f32.mrb[108].mxu1 }
 0x3e6   : > { %v3025_v62 = vadd.f32 %v3024_v4, %v8066_v44  ;;  %v3026_v59 = vpop.f32.mrb[109].mxu1 }
 0x3e7   : > { %v3027_v60 = vadd.f32 %v3026_v59, %v8069_v13  ;;  %v3028_v20 = vpop.f32.mrb[110].mxu1  ;;  %3501 = vmatprep.mubr.bf16.mxu0 %v3158_v47 }
 0x3e8   : > { %v3029_v35 = vadd.f32 %v3028_v20, %v8066_v44  ;;  %v3030_v58 = vpop.f32.mrb[111].mxu1  ;;  %3502 = vmatmul.mubr.bf16.gmra.mrb[168].mxu0 %v3157_v61  ;;  %v3117_v31 = vmax.f32 %v3025_v62, 0.0 }
 0x3e9   : > { %v3031_v27 = vadd.f32 %v3030_v58, %v8069_v13  ;;  %v3118_v36 = vmax.f32 %v3027_v60, 0.0 }
 0x3ea   : > { %v3119_v23 = vmax.f32 %v3029_v35, 0.0 }
 0x3eb   : > { %v3120_v21 = vmax.f32 %v3031_v27, 0.0 }
 0x3ec   : > { %v3159_v42 = vpack.c.bf16 %v3119_v23, %v3117_v31 }
 0x3ed   : > { %v3160_v32 = vpack.c.bf16 %v3120_v21, %v3118_v36  ;;  %v3034_v0 = vpop.f32.mrb[112].mxu1 }
 0x3ee   : > { %v3035_v57 = vadd.f32 %v3034_v0, %v8066_v44  ;;  %v3036_v19 = vpop.f32.mrb[113].mxu1 }
 0x3ef   : > { %v3037_v53 = vadd.f32 %v3036_v19, %v8069_v13  ;;  %v3038_v41 = vpop.f32.mrb[114].mxu1  ;;  %3511 = vmatprep.mubr.bf16.mxu0 %v3160_v32 }
 0x3f0   : > { %v3039_v50 = vadd.f32 %v3038_v41, %v8066_v44  ;;  %v3040_v49 = vpop.f32.mrb[115].mxu1  ;;  %3512 = vmatmul.mubr.bf16.gmra.mrb[172].mxu0 %v3159_v42  ;;  %v3121_v24 = vmax.f32 %v3035_v57, 0.0 }
 0x3f1   : > { %v3041_v10 = vadd.f32 %v3040_v49, %v8069_v13  ;;  %v3122_v22 = vmax.f32 %v3037_v53, 0.0 }
 0x3f2   : > { %v3123_v33 = vmax.f32 %v3039_v50, 0.0 }
 0x3f3   : > { %v3124_v46 = vmax.f32 %v3041_v10, 0.0  ;;  %v6092_v10 = vld [vmem:[#allocation10 + $0x4] ss:$8 sps:$4 sm:$0xff]  }
 0x3f4   : > { %v3161_v43 = vpack.c.bf16 %v3123_v33, %v3121_v24  ;;  %4475 = vmatprep.subr.bf16.mxu0 %v6092_v10  ;;  %v6095_v24 = vld [vmem:[#allocation10 + $0x14] ss:$8 sps:$4 sm:$0xff]   ;;  %v8136_v33 = vld [vmem:[#allocation13] sm:$0xff] }
 0x3f5   : > { %v3162_v11 = vpack.c.bf16 %v3124_v46, %v3122_v22  ;;  %v3044_v34 = vpop.f32.mrb[116].mxu1  ;;  %4476 = vmatpush1.bf16.msra.mxu0 %v6090_v1  ;;  %v8141_v22 = vld [vmem:[#allocation13 + $0x8] sm:$0xff]  ;;  %v6111_v1 = vld [vmem:[#allocation10 + $0x70] ss:$8 sps:$4 sm:$0xff]  }
 0x3f6   : > { %v3045_v26 = vadd.f32 %v3044_v34, %v8066_v44  ;;  %v3046_v17 = vpop.f32.mrb[117].mxu1  ;;  %4477 = vmatprep.subr.bf16.mxu0 %v6095_v24  ;;  %v6116_v24 = vld [vmem:[#allocation10 + $0x84] ss:$8 sps:$4 sm:$0xff]  }
 0x3f7   : > { %v3047_v37 = vadd.f32 %v3046_v17, %v8069_v13  ;;  %v3048_v63 = vpop.f32.mrb[118].mxu1  ;;  %3521 = vmatprep.mubr.bf16.mxu0 %v3162_v11  ;;  %v6098_v11 = vld [vmem:[#allocation10 + $0x24] ss:$8 sps:$4 sm:$0xff]  }
 0x3f8   : > { %v3049_v6 = vadd.f32 %v3048_v63, %v8066_v44  ;;  %v3050_v2 = vpop.f32.mrb[119].mxu1  ;;  %3522 = vmatmul.mubr.bf16.gmra.mrb[176].mxu0 %v3161_v43  ;;  %v3125_v38 = vmax.f32 %v3045_v26, 0.0  ;;  %v6096_v43 = vld [vmem:[#allocation10 + $0x20] ss:$8 sps:$4 sm:$0xff]  }
 0x3f9   : > { %v3051_v16 = vadd.f32 %v3050_v2, %v8069_v13  ;;  %v3126_v12 = vmax.f32 %v3047_v37, 0.0  ;;  %4478 = vmatpush1.bf16.msra.mxu0 %v6093_v56  ;;  %v6101_v2 = vld [vmem:[#allocation10 + $0x34] ss:$8 sps:$4 sm:$0xff]  }
 0x3fa   : > { %v3127_v25 = vmax.f32 %v3049_v6, 0.0  ;;  %4479 = vmatprep.subr.bf16.mxu0 %v6098_v11  ;;  %v6099_v6 = vld [vmem:[#allocation10 + $0x30] ss:$8 sps:$4 sm:$0xff]  }
 0x3fb   : > { %v3128_v52 = vmax.f32 %v3051_v16, 0.0 }
 0x3fc   : > { %v3163_v54 = vpack.c.bf16 %v3127_v25, %v3125_v38  ;;  %v6104_v25 = vld [vmem:[#allocation10 + $0x44] ss:$8 sps:$4 sm:$0xff]  }
 0x3fd   : > { %v3164_v9 = vpack.c.bf16 %v3128_v52, %v3126_v12  ;;  %v3054_v29 = vpop.f32.mrb[120].mxu1  ;;  %4480 = vmatpush1.bf16.msra.mxu0 %v6096_v43 }
 0x3fe   : > { %v3055_v39 = vadd.f32 %v3054_v29, %v8066_v44  ;;  %v3056_v51 = vpop.f32.mrb[121].mxu1  ;;  %4481 = vmatprep.subr.bf16.mxu0 %v6101_v2 }
 0x3ff   : > { %v3057_v45 = vadd.f32 %v3056_v51, %v8069_v13  ;;  %v3058_v7 = vpop.f32.mrb[122].mxu1  ;;  %3531 = vmatprep.mubr.bf16.mxu0 %v3164_v9 }
 0x400   : > { %v3059_v61 = vadd.f32 %v3058_v7, %v8066_v44  ;;  %v3060_v47 = vpop.f32.mrb[123].mxu1  ;;  %3532 = vmatmul.mubr.bf16.gmra.mrb[180].mxu0 %v3163_v54  ;;  %v3129_v62 = vmax.f32 %v3055_v39, 0.0  ;;  %v6102_v39 = vld [vmem:[#allocation10 + $0x40] ss:$8 sps:$4 sm:$0xff]  }
 0x401   : > { %v3061_v4 = vadd.f32 %v3060_v47, %v8069_v13  ;;  %v3130_v60 = vmax.f32 %v3057_v45, 0.0  ;;  %4482 = vmatpush1.bf16.msra.mxu0 %v6099_v6  ;;  %v6107_v45 = vld [vmem:[#allocation10 + $0x54] ss:$8 sps:$4 sm:$0xff]  }
 0x402   : > { %v3131_v59 = vmax.f32 %v3059_v61, 0.0  ;;  %4483 = vmatprep.subr.bf16.mxu0 %v6104_v25 }
 0x403   : > { %v3132_v20 = vmax.f32 %v3061_v4, 0.0 }
 0x404   : > { %v3165_v35 = vpack.c.bf16 %v3131_v59, %v3129_v62 }
 0x405   : > { %v3166_v58 = vpack.c.bf16 %v3132_v20, %v3130_v60  ;;  %v3064_v27 = vpop.f32.mrb[124].mxu1  ;;  %4484 = vmatpush1.bf16.msra.mxu0 %v6102_v39  ;;  %v6105_v60 = vld [vmem:[#allocation10 + $0x50] ss:$8 sps:$4 sm:$0xff]  }
 0x406   : > { %v3065_v31 = vadd.f32 %v3064_v27, %v8066_v44  ;;  %v3066_v23 = vpop.f32.mrb[125].mxu1  ;;  %4485 = vmatprep.subr.bf16.mxu0 %v6107_v45 }
 0x407   : > { %v3067_v36 = vadd.f32 %v3066_v23, %v8069_v13  ;;  %v3068_v21 = vpop.f32.mrb[126].mxu1  ;;  %3541 = vmatprep.mubr.bf16.mxu0 %v3166_v58  ;;  %v6110_v58 = vld [vmem:[#allocation10 + $0x64] ss:$8 sps:$4 sm:$0xff]  }
 0x408   : > { %v3069_v42 = vadd.f32 %v3068_v21, %v8066_v44  ;;  %v3070_v32 = vpop.f32.mrb[127].mxu1  ;;  %3542 = vmatmul.mubr.bf16.gmra.mrb[184].mxu0 %v3165_v35  ;;  %v3133_v57 = vmax.f32 %v3065_v31, 0.0  ;;  %v3203_v44 = vsub.s32 3, %v8733_v40 }
 0x409   : > { %v3071_v0 = vadd.f32 %v3070_v32, %v8069_v13  ;;  %v3134_v53 = vmax.f32 %v3067_v36, 0.0  ;;  %4486 = vmatpush1.bf16.msra.mxu0 %v6105_v60 }
 0x40a   : > { %v3135_v19 = vmax.f32 %v3069_v42, 0.0  ;;  %v8139_v13 = vrot.slane %v8136_v33, %v3203_v44  ;;  %v8144_v46 = vrot.slane %v8141_v22, %v3203_v44  ;;  %v6108_v42 = vld [vmem:[#allocation10 + $0x60] ss:$8 sps:$4 sm:$0xff]   ;;  %4487 = vmatprep.subr.bf16.mxu0 %v6110_v58 }
 0x40b   : > { %v3136_v41 = vmax.f32 %v3071_v0, 0.0  ;;  %v6113_v0 = vld [vmem:[#allocation10 + $0x74] ss:$8 sps:$4 sm:$0xff]  }
 0x40c   : > { %v3167_v50 = vpack.c.bf16 %v3135_v19, %v3133_v57 }
 0x40d   : > { %v3168_v49 = vpack.c.bf16 %v3136_v41, %v3134_v53  ;;  %4488 = vmatpush1.bf16.msra.mxu0 %v6108_v42 }
 0x40e   : > { %4489 = vmatprep.subr.bf16.mxu0 %v6113_v0 }
 0x40f   : > { %3551 = vmatprep.mubr.bf16.mxu0 %v3168_v49 }
 0x410   : > { %3552 = vmatmul.mubr.bf16.gmra.mrb[188].mxu0 %v3167_v50 }
 0x411   : > { %4490 = vmatpush1.bf16.msra.mxu0 %v6111_v1 }
 0x412   : > { %4491 = vmatprep.subr.bf16.mxu0 %v6116_v24 }
 0x46b   : > { %v3403_v34 = vpop.f32.mrb[128].mxu0 }
 0x46c   : > { %v3404_v26 = vadd.f32 %v3403_v34, %v8139_v13  ;;  %v3405_v17 = vpop.f32.mrb[129].mxu0 }
 0x46d   : > { %v3406_v37 = vadd.f32 %v3405_v17, %v8144_v46  ;;  %v3407_v63 = vpop.f32.mrb[130].mxu0  ;;  %v6114_v17 = vld [vmem:[#allocation10 + $0x80] ss:$8 sps:$4 sm:$0xff]  }
 0x46e   : > { %v3408_v16 = vadd.f32 %v3407_v63, %v8139_v13  ;;  %v3409_v38 = vpop.f32.mrb[131].mxu0  ;;  %v3562_v52 = vmax.f32 %v3404_v26, 0.0  ;;  %v6119_v63 = vld [vmem:[#allocation10 + $0x94] ss:$8 sps:$4 sm:$0xff]   ;;  %4492 = vmatpush1.bf16.msra.mxu0 %v6114_v17 }
 0x46f   : > { %v3410_v12 = vadd.f32 %v3409_v38, %v8144_v46  ;;  %v3563_v9 = vmax.f32 %v3406_v37, 0.0  ;;  %4493 = vmatprep.subr.bf16.mxu0 %v6119_v63 }
 0x470   : > { %v3564_v54 = vmax.f32 %v3408_v16, 0.0 }
 0x471   : > { %v3565_v29 = vmax.f32 %v3410_v12, 0.0 }
 0x472   : > { %v3626_v51 = vpack.c.bf16 %v3564_v54, %v3562_v52  ;;  %v6117_v52 = vld [vmem:[#allocation10 + $0x90] ss:$8 sps:$4 sm:$0xff]  }
 0x473   : > { %v3627_v7 = vpack.c.bf16 %v3565_v29, %v3563_v9  ;;  %v3413_v61 = vpop.f32.mrb[132].mxu0  ;;  %v6122_v29 = vld [vmem:[#allocation10 + $0xa4] ss:$8 sps:$4 sm:$0xff]   ;;  %4494 = vmatpush1.bf16.msra.mxu0 %v6117_v52 }
 0x474   : > { %v3414_v47 = vadd.f32 %v3413_v61, %v8139_v13  ;;  %v3415_v4 = vpop.f32.mrb[133].mxu0  ;;  %4495 = vmatprep.subr.bf16.mxu0 %v6122_v29 }
 0x475   : > { %v3416_v62 = vadd.f32 %v3415_v4, %v8144_v46  ;;  %v3417_v59 = vpop.f32.mrb[134].mxu0  ;;  %3882 = vmatprep.mubr.bf16.mxu1 %v3627_v7 }
 0x476   : > { %v3418_v20 = vadd.f32 %v3417_v59, %v8139_v13  ;;  %v3419_v35 = vpop.f32.mrb[135].mxu0  ;;  %3883 = vmatmul.mubr.bf16.vlgmr.msra.gmra.mrb[0].mxu1 %v3626_v51  ;;  %v3566_v31 = vmax.f32 %v3414_v47, 0.0  ;;  %v6120_v47 = vld [vmem:[#allocation10 + $0xa0] ss:$8 sps:$4 sm:$0xff]  }
 0x477   : > { %v3420_v27 = vadd.f32 %v3419_v35, %v8144_v46  ;;  %v3567_v36 = vmax.f32 %v3416_v62, 0.0  ;;  %v6125_v62 = vld [vmem:[#allocation10 + $0xb4] ss:$8 sps:$4 sm:$0xff]   ;;  %4496 = vmatpush1.bf16.msra.mxu0 %v6120_v47 }
 0x478   : > { %v3568_v23 = vmax.f32 %v3418_v20, 0.0  ;;  %4497 = vmatprep.subr.bf16.mxu0 %v6125_v62 }
 0x479   : > { %v3569_v21 = vmax.f32 %v3420_v27, 0.0 }
 0x47a   : > { %v3628_v32 = vpack.c.bf16 %v3568_v23, %v3566_v31  ;;  %v6123_v31 = vld [vmem:[#allocation10 + $0xb0] ss:$8 sps:$4 sm:$0xff]  }
 0x47b   : > { %v3629_v57 = vpack.c.bf16 %v3569_v21, %v3567_v36  ;;  %v3423_v19 = vpop.f32.mrb[136].mxu0  ;;  %v6128_v21 = vld [vmem:[#allocation10 + $0xc4] ss:$8 sps:$4 sm:$0xff]   ;;  %4498 = vmatpush1.bf16.msra.mxu0 %v6123_v31 }
 0x47c   : > { %v3424_v53 = vadd.f32 %v3423_v19, %v8139_v13  ;;  %v3425_v41 = vpop.f32.mrb[137].mxu0  ;;  %4499 = vmatprep.subr.bf16.mxu0 %v6128_v21 }
 0x47d   : > { %v3426_v50 = vadd.f32 %v3425_v41, %v8144_v46  ;;  %v3427_v49 = vpop.f32.mrb[138].mxu0  ;;  %3892 = vmatprep.mubr.bf16.mxu1 %v3629_v57 }
 0x47e   : > { %v3428_v10 = vadd.f32 %v3427_v49, %v8139_v13  ;;  %v3429_v56 = vpop.f32.mrb[139].mxu0  ;;  %3893 = vmatmul.mubr.bf16.gmra.mrb[4].mxu1 %v3628_v32  ;;  %v3570_v43 = vmax.f32 %v3424_v53, 0.0  ;;  %v6126_v53 = vld [vmem:[#allocation10 + $0xc0] ss:$8 sps:$4 sm:$0xff]  }
 0x47f   : > { %v3430_v44 = vadd.f32 %v3429_v56, %v8144_v46  ;;  %v3571_v34 = vmax.f32 %v3426_v50, 0.0  ;;  %v6131_v50 = vld [vmem:[#allocation10 + $0xd4] ss:$8 sps:$4 sm:$0xff]   ;;  %4500 = vmatpush1.bf16.msra.mxu0 %v6126_v53 }
 0x480   : > { %v3572_v11 = vmax.f32 %v3428_v10, 0.0  ;;  %4501 = vmatprep.subr.bf16.mxu0 %v6131_v50 }
 0x481   : > { %v3573_v26 = vmax.f32 %v3430_v44, 0.0 }
 0x482   : > { %v3630_v37 = vpack.c.bf16 %v3572_v11, %v3570_v43  ;;  %v6129_v43 = vld [vmem:[#allocation10 + $0xd0] ss:$8 sps:$4 sm:$0xff]  }
 0x483   : > { %v3631_v6 = vpack.c.bf16 %v3573_v26, %v3571_v34  ;;  %v3433_v2 = vpop.f32.mrb[140].mxu0  ;;  %v6134_v26 = vld [vmem:[#allocation10 + $0xe4] ss:$8 sps:$4 sm:$0xff]   ;;  %4502 = vmatpush1.bf16.msra.mxu0 %v6129_v43 }
 0x484   : > { %v3434_v16 = vadd.f32 %v3433_v2, %v8139_v13  ;;  %v3435_v38 = vpop.f32.mrb[141].mxu0  ;;  %4503 = vmatprep.subr.bf16.mxu0 %v6134_v26 }
 0x485   : > { %v3436_v25 = vadd.f32 %v3435_v38, %v8144_v46  ;;  %v3437_v12 = vpop.f32.mrb[142].mxu0  ;;  %3902 = vmatprep.mubr.bf16.mxu1 %v3631_v6 }
 0x486   : > { %v3438_v54 = vadd.f32 %v3437_v12, %v8139_v13  ;;  %v3439_v9 = vpop.f32.mrb[143].mxu0  ;;  %3903 = vmatmul.mubr.bf16.gmra.mrb[8].mxu1 %v3630_v37  ;;  %v3574_v51 = vmax.f32 %v3434_v16, 0.0  ;;  %v6132_v16 = vld [vmem:[#allocation10 + $0xe0] ss:$8 sps:$4 sm:$0xff]  }
 0x487   : > { %v3440_v39 = vadd.f32 %v3439_v9, %v8144_v46  ;;  %v3575_v7 = vmax.f32 %v3436_v25, 0.0  ;;  %4504 = vmatpush1.bf16.msra.mxu0 %v6132_v16 }
 0x488   : > { %v3576_v45 = vmax.f32 %v3438_v54, 0.0 }
 0x489   : > { %v3577_v61 = vmax.f32 %v3440_v39, 0.0 }
 0x48a   : > { %v3632_v4 = vpack.c.bf16 %v3576_v45, %v3574_v51 }
 0x48b   : > { %v3633_v59 = vpack.c.bf16 %v3577_v61, %v3575_v7  ;;  %v3443_v60 = vpop.f32.mrb[144].mxu0 }
 0x48c   : > { %v3444_v20 = vadd.f32 %v3443_v60, %v8139_v13  ;;  %v3445_v35 = vpop.f32.mrb[145].mxu0 }
 0x48d   : > { %v3446_v58 = vadd.f32 %v3445_v35, %v8144_v46  ;;  %v3447_v27 = vpop.f32.mrb[146].mxu0  ;;  %3912 = vmatprep.mubr.bf16.mxu1 %v3633_v59 }
 0x48e   : > { %v3448_v23 = vadd.f32 %v3447_v27, %v8139_v13  ;;  %v3449_v36 = vpop.f32.mrb[147].mxu0  ;;  %3913 = vmatmul.mubr.bf16.gmra.mrb[12].mxu1 %v3632_v4  ;;  %v3578_v32 = vmax.f32 %v3444_v20, 0.0 }
 0x48f   : > { %v3450_v42 = vadd.f32 %v3449_v36, %v8144_v46  ;;  %v3579_v57 = vmax.f32 %v3446_v58, 0.0 }
 0x490   : > { %v3580_v0 = vmax.f32 %v3448_v23, 0.0 }
 0x491   : > { %v3581_v19 = vmax.f32 %v3450_v42, 0.0 }
 0x492   : > { %v3634_v41 = vpack.c.bf16 %v3580_v0, %v3578_v32 }
 0x493   : > { %v3635_v49 = vpack.c.bf16 %v3581_v19, %v3579_v57  ;;  %v3453_v1 = vpop.f32.mrb[148].mxu0 }
 0x494   : > { %v3454_v10 = vadd.f32 %v3453_v1, %v8139_v13  ;;  %v3455_v56 = vpop.f32.mrb[149].mxu0 }
 0x495   : > { %v3456_v24 = vadd.f32 %v3455_v56, %v8144_v46  ;;  %v3457_v44 = vpop.f32.mrb[150].mxu0  ;;  %3922 = vmatprep.mubr.bf16.mxu1 %v3635_v49 }
 0x496   : > { %v3458_v11 = vadd.f32 %v3457_v44, %v8139_v13  ;;  %v3459_v34 = vpop.f32.mrb[151].mxu0  ;;  %3923 = vmatmul.mubr.bf16.gmra.mrb[16].mxu1 %v3634_v41  ;;  %v3582_v37 = vmax.f32 %v3454_v10, 0.0 }
 0x497   : > { %v3460_v17 = vadd.f32 %v3459_v34, %v8144_v46  ;;  %v3583_v6 = vmax.f32 %v3456_v24, 0.0 }
 0x498   : > { %v3584_v63 = vmax.f32 %v3458_v11, 0.0 }
 0x499   : > { %v3585_v2 = vmax.f32 %v3460_v17, 0.0 }
 0x49a   : > { %v3636_v38 = vpack.c.bf16 %v3584_v63, %v3582_v37 }
 0x49b   : > { %v3637_v25 = vpack.c.bf16 %v3585_v2, %v3583_v6  ;;  %v3463_v12 = vpop.f32.mrb[152].mxu0 }
 0x49c   : > { %v3464_v52 = vadd.f32 %v3463_v12, %v8139_v13  ;;  %v3465_v54 = vpop.f32.mrb[153].mxu0 }
 0x49d   : > { %v3466_v9 = vadd.f32 %v3465_v54, %v8144_v46  ;;  %v3467_v29 = vpop.f32.mrb[154].mxu0  ;;  %3932 = vmatprep.mubr.bf16.mxu1 %v3637_v25 }
 0x49e   : > { %v3468_v39 = vadd.f32 %v3467_v29, %v8139_v13  ;;  %v3469_v51 = vpop.f32.mrb[155].mxu0  ;;  %3933 = vmatmul.mubr.bf16.gmra.mrb[20].mxu1 %v3636_v38  ;;  %v3586_v7 = vmax.f32 %v3464_v52, 0.0 }
 0x49f   : > { %v3470_v45 = vadd.f32 %v3469_v51, %v8144_v46  ;;  %v3587_v47 = vmax.f32 %v3466_v9, 0.0 }
 0x4a0   : > { %v3588_v61 = vmax.f32 %v3468_v39, 0.0 }
 0x4a1   : > { %v3589_v4 = vmax.f32 %v3470_v45, 0.0 }
 0x4a2   : > { %v3638_v62 = vpack.c.bf16 %v3588_v61, %v3586_v7 }
 0x4a3   : > { %v3639_v59 = vpack.c.bf16 %v3589_v4, %v3587_v47  ;;  %v3473_v60 = vpop.f32.mrb[156].mxu0 }
 0x4a4   : > { %v3474_v20 = vadd.f32 %v3473_v60, %v8139_v13  ;;  %v3475_v35 = vpop.f32.mrb[157].mxu0 }
 0x4a5   : > { %v3476_v58 = vadd.f32 %v3475_v35, %v8144_v46  ;;  %v3477_v27 = vpop.f32.mrb[158].mxu0  ;;  %3942 = vmatprep.mubr.bf16.mxu1 %v3639_v59 }
 0x4a6   : > { %v3478_v31 = vadd.f32 %v3477_v27, %v8139_v13  ;;  %v3479_v23 = vpop.f32.mrb[159].mxu0  ;;  %3943 = vmatmul.mubr.bf16.gmra.mrb[24].mxu1 %v3638_v62  ;;  %v3590_v21 = vmax.f32 %v3474_v20, 0.0 }
 0x4a7   : > { %v3480_v36 = vadd.f32 %v3479_v23, %v8144_v46  ;;  %v3591_v32 = vmax.f32 %v3476_v58, 0.0 }
 0x4a8   : > { %v3592_v42 = vmax.f32 %v3478_v31, 0.0 }
 0x4a9   : > { %v3593_v0 = vmax.f32 %v3480_v36, 0.0 }
 0x4aa   : > { %v3640_v57 = vpack.c.bf16 %v3592_v42, %v3590_v21 }
 0x4ab   : > { %v3641_v19 = vpack.c.bf16 %v3593_v0, %v3591_v32  ;;  %v3483_v53 = vpop.f32.mrb[160].mxu0 }
 0x4ac   : > { %v3484_v41 = vadd.f32 %v3483_v53, %v8139_v13  ;;  %v3485_v50 = vpop.f32.mrb[161].mxu0 }
 0x4ad   : > { %v3486_v49 = vadd.f32 %v3485_v50, %v8144_v46  ;;  %v3487_v1 = vpop.f32.mrb[162].mxu0  ;;  %3952 = vmatprep.mubr.bf16.mxu1 %v3641_v19 }
 0x4ae   : > { %v3488_v10 = vadd.f32 %v3487_v1, %v8139_v13  ;;  %v3489_v56 = vpop.f32.mrb[163].mxu0  ;;  %3953 = vmatmul.mubr.bf16.gmra.mrb[28].mxu1 %v3640_v57  ;;  %v3594_v44 = vmax.f32 %v3484_v41, 0.0 }
 0x4af   : > { %v3490_v24 = vadd.f32 %v3489_v56, %v8144_v46  ;;  %v3595_v11 = vmax.f32 %v3486_v49, 0.0 }
 0x4b0   : > { %v3596_v43 = vmax.f32 %v3488_v10, 0.0 }
 0x4b1   : > { %v3597_v34 = vmax.f32 %v3490_v24, 0.0 }
 0x4b2   : > { %v3642_v26 = vpack.c.bf16 %v3596_v43, %v3594_v44 }
 0x4b3   : > { %v3643_v17 = vpack.c.bf16 %v3597_v34, %v3595_v11  ;;  %v3493_v37 = vpop.f32.mrb[164].mxu0 }
 0x4b4   : > { %v3494_v63 = vadd.f32 %v3493_v37, %v8139_v13  ;;  %v3495_v6 = vpop.f32.mrb[165].mxu0 }
 0x4b5   : > { %v3496_v2 = vadd.f32 %v3495_v6, %v8144_v46  ;;  %v3497_v16 = vpop.f32.mrb[166].mxu0  ;;  %3962 = vmatprep.mubr.bf16.mxu1 %v3643_v17 }
 0x4b6   : > { %v3498_v38 = vadd.f32 %v3497_v16, %v8139_v13  ;;  %v3499_v25 = vpop.f32.mrb[167].mxu0  ;;  %3963 = vmatmul.mubr.bf16.gmra.mrb[32].mxu1 %v3642_v26  ;;  %v3598_v52 = vmax.f32 %v3494_v63, 0.0 }
 0x4b7   : > { %v3500_v12 = vadd.f32 %v3499_v25, %v8144_v46  ;;  %v3599_v9 = vmax.f32 %v3496_v2, 0.0  ;;  %v6137_v2 = vld [vmem:[#allocation10 + $0xf4] ss:$8 sps:$4 sm:$0xff]   ;;  %v6135_v25 = vld [vmem:[#allocation10 + $0xf0] ss:$8 sps:$4 sm:$0xff]  }
 0x4b8   : > { %v3600_v54 = vmax.f32 %v3498_v38, 0.0  ;;  %4505 = vmatprep.subr.bf16.mxu0 %v6137_v2  ;;  %v6139_v2 = vld [vmem:[#allocation11] sm:$0xff]  }
 0x4b9   : > { %v3601_v29 = vmax.f32 %v3500_v12, 0.0  ;;  %4506 = vmatpush1.bf16.msra.mxu0 %v6135_v25 }
 0x4ba   : > { %v3644_v39 = vpack.c.bf16 %v3600_v54, %v3598_v52 }
 0x4bb   : > { %v3645_v51 = vpack.c.bf16 %v3601_v29, %v3599_v9  ;;  %v3503_v45 = vpop.f32.mrb[168].mxu0 }
 0x4bc   : > { %v3504_v7 = vadd.f32 %v3503_v45, %v8139_v13  ;;  %v3505_v61 = vpop.f32.mrb[169].mxu0 }
 0x4bd   : > { %v3506_v47 = vadd.f32 %v3505_v61, %v8144_v46  ;;  %v3507_v4 = vpop.f32.mrb[170].mxu0  ;;  %3972 = vmatprep.mubr.bf16.mxu1 %v3645_v51 }
 0x4be   : > { %v3508_v62 = vadd.f32 %v3507_v4, %v8139_v13  ;;  %v3509_v59 = vpop.f32.mrb[171].mxu0  ;;  %3973 = vmatmul.mubr.bf16.gmra.mrb[36].mxu1 %v3644_v39  ;;  %v3602_v20 = vmax.f32 %v3504_v7, 0.0 }
 0x4bf   : > { %v3510_v60 = vadd.f32 %v3509_v59, %v8144_v46  ;;  %v3603_v58 = vmax.f32 %v3506_v47, 0.0 }
 0x4c0   : > { %v3604_v35 = vmax.f32 %v3508_v62, 0.0 }
 0x4c1   : > { %v3605_v27 = vmax.f32 %v3510_v60, 0.0 }
 0x4c2   : > { %v3646_v31 = vpack.c.bf16 %v3604_v35, %v3602_v20 }
 0x4c3   : > { %v3647_v23 = vpack.c.bf16 %v3605_v27, %v3603_v58  ;;  %v3513_v36 = vpop.f32.mrb[172].mxu0 }
 0x4c4   : > { %v3514_v21 = vadd.f32 %v3513_v36, %v8139_v13  ;;  %v3515_v42 = vpop.f32.mrb[173].mxu0 }
 0x4c5   : > { %v3516_v32 = vadd.f32 %v3515_v42, %v8144_v46  ;;  %v3517_v0 = vpop.f32.mrb[174].mxu0  ;;  %3982 = vmatprep.mubr.bf16.mxu1 %v3647_v23 }
 0x4c6   : > { %v3518_v57 = vadd.f32 %v3517_v0, %v8139_v13  ;;  %v3519_v19 = vpop.f32.mrb[175].mxu0  ;;  %3983 = vmatmul.mubr.bf16.gmra.mrb[40].mxu1 %v3646_v31  ;;  %v3606_v41 = vmax.f32 %v3514_v21, 0.0 }
 0x4c7   : > { %v3520_v53 = vadd.f32 %v3519_v19, %v8144_v46  ;;  %v3607_v49 = vmax.f32 %v3516_v32, 0.0 }
 0x4c8   : > { %v3608_v50 = vmax.f32 %v3518_v57, 0.0 }
 0x4c9   : > { %v3609_v1 = vmax.f32 %v3520_v53, 0.0 }
 0x4ca   : > { %v3648_v10 = vpack.c.bf16 %v3608_v50, %v3606_v41 }
 0x4cb   : > { %v3649_v56 = vpack.c.bf16 %v3609_v1, %v3607_v49  ;;  %v3523_v24 = vpop.f32.mrb[176].mxu0 }
 0x4cc   : > { %v3524_v44 = vadd.f32 %v3523_v24, %v8139_v13  ;;  %v3525_v43 = vpop.f32.mrb[177].mxu0 }
 0x4cd   : > { %v3526_v11 = vadd.f32 %v3525_v43, %v8144_v46  ;;  %v3527_v34 = vpop.f32.mrb[178].mxu0  ;;  %3992 = vmatprep.mubr.bf16.mxu1 %v3649_v56 }
 0x4ce   : > { %v3528_v26 = vadd.f32 %v3527_v34, %v8139_v13  ;;  %v3529_v17 = vpop.f32.mrb[179].mxu0  ;;  %3993 = vmatmul.mubr.bf16.gmra.mrb[44].mxu1 %v3648_v10  ;;  %v3610_v63 = vmax.f32 %v3524_v44, 0.0 }
 0x4cf   : > { %v3530_v37 = vadd.f32 %v3529_v17, %v8144_v46  ;;  %v3611_v16 = vmax.f32 %v3526_v11, 0.0 }
 0x4d0   : > { %v3612_v6 = vmax.f32 %v3528_v26, 0.0 }
 0x4d1   : > { %v3613_v38 = vmax.f32 %v3530_v37, 0.0 }
 0x4d2   : > { %v3650_v12 = vpack.c.bf16 %v3612_v6, %v3610_v63  ;;  %v6138_v6 = vld [vmem:[#allocation11 + $0x40] sm:$0xff]  }
 0x4d3   : > { %v3651_v52 = vpack.c.bf16 %v3613_v38, %v3611_v16  ;;  %v3533_v54 = vpop.f32.mrb[180].mxu0  ;;  %5499 = vmatprep.subr.bf16.mxu1 %v6138_v6  ;;  %v4109_v16 = vsub.s32 4, %v8733_v40  ;;  %v6140_v38 = vld [vmem:[#allocation11 + $0x48] sm:$0xff]  }
 0x4d4   : > { %v3534_v9 = vadd.f32 %v3533_v54, %v8139_v13  ;;  %v3535_v29 = vpop.f32.mrb[181].mxu0  ;;  %5500 = vmatpush3.bf16.msra.mxu1 %v6139_v2 }
 0x4d5   : > { %v3536_v39 = vadd.f32 %v3535_v29, %v8144_v46  ;;  %v3537_v51 = vpop.f32.mrb[182].mxu0  ;;  %4002 = vmatprep.mubr.bf16.mxu1 %v3651_v52  ;;  %v8734_v52 = vld [vmem:[#allocation28_spill] sm:$0xff]  ;;  %5501 = vmatprep.subr.bf16.mxu1 %v6140_v38  ;;  %v8735_v29 = vld [vmem:[#allocation29_spill] sm:$0xff] }
 0x4d6   : > { %v3538_v45 = vadd.f32 %v3537_v51, %v8139_v13  ;;  %v3539_v7 = vpop.f32.mrb[183].mxu0  ;;  %4003 = vmatmul.mubr.bf16.gmra.mrb[48].mxu1 %v3650_v12  ;;  %v3614_v47 = vmax.f32 %v3534_v9, 0.0  ;;  %v6141_v12 = vld [vmem:[#allocation11 + $0x8] sm:$0xff]  }
 0x4d7   : > { %v3540_v61 = vadd.f32 %v3539_v7, %v8144_v46  ;;  %v3615_v62 = vmax.f32 %v3536_v39, 0.0  ;;  %v8736_v7 = vld [vmem:[#allocation30_spill] sm:$0xff] }
 0x4d8   : > { %v3616_v4 = vmax.f32 %v3538_v45, 0.0  ;;  %5502 = vmatpush3.bf16.msra.mxu1 %v6141_v12  ;;  %v8742_v12 = vld [vmem:[#allocation36_spill] sm:$0xff] }
 0x4d9   : > { %v3617_v59 = vmax.f32 %v3540_v61, 0.0 }
 0x4da   : > { %v3652_v60 = vpack.c.bf16 %v3616_v4, %v3614_v47  ;;  %v8737_v4 = vld [vmem:[#allocation31_spill] sm:$0xff] }
 0x4db   : > { %v3653_v20 = vpack.c.bf16 %v3617_v59, %v3615_v62  ;;  %v3543_v35 = vpop.f32.mrb[184].mxu0  ;;  %v6142_v59 = vld [vmem:[#allocation11 + $0x50] sm:$0xff]  }
 0x4dc   : > { %v3544_v58 = vadd.f32 %v3543_v35, %v8139_v13  ;;  %v3545_v27 = vpop.f32.mrb[185].mxu0  ;;  %5503 = vmatprep.subr.bf16.mxu1 %v6142_v59 }
 0x4dd   : > { %v3546_v31 = vadd.f32 %v3545_v27, %v8144_v46  ;;  %v3547_v23 = vpop.f32.mrb[186].mxu0  ;;  %4012 = vmatprep.mubr.bf16.mxu1 %v3653_v20  ;;  %v6144_v20 = vld [vmem:[#allocation11 + $0x58] sm:$0xff]  }
 0x4de   : > { %v3548_v36 = vadd.f32 %v3547_v23, %v8139_v13  ;;  %v3549_v21 = vpop.f32.mrb[187].mxu0  ;;  %4013 = vmatmul.mubr.bf16.gmra.mrb[52].mxu1 %v3652_v60  ;;  %v3618_v32 = vmax.f32 %v3544_v58, 0.0  ;;  %v6143_v60 = vld [vmem:[#allocation11 + $0x10] sm:$0xff]  }
 0x4df   : > { %v3550_v42 = vadd.f32 %v3549_v21, %v8144_v46  ;;  %v3619_v57 = vmax.f32 %v3546_v31, 0.0  ;;  %5504 = vmatpush3.bf16.msra.mxu1 %v6143_v60  ;;  %v6145_v21 = vld [vmem:[#allocation11 + $0x18] sm:$0xff]   ;;  %v6151_v60 = vld [vmem:[#allocation11 + $0x30] sm:$0xff]  }
 0x4e0   : > { %v3620_v0 = vmax.f32 %v3548_v36, 0.0  ;;  %5505 = vmatprep.subr.bf16.mxu1 %v6144_v20 }
 0x4e1   : > { %v3621_v19 = vmax.f32 %v3550_v42, 0.0 }
 0x4e2   : > { %v3654_v53 = vpack.c.bf16 %v3620_v0, %v3618_v32  ;;  %v8738_v32 = vld [vmem:[#allocation32_spill] sm:$0xff] }
 0x4e3   : > { %v3655_v41 = vpack.c.bf16 %v3621_v19, %v3619_v57  ;;  %v3553_v50 = vpop.f32.mrb[188].mxu0  ;;  %v6146_v19 = vld [vmem:[#allocation11 + $0x60] sm:$0xff]   ;;  %5506 = vmatpush3.bf16.msra.mxu1 %v6145_v21 }
 0x4e4   : > { %v3554_v49 = vadd.f32 %v3553_v50, %v8139_v13  ;;  %v3555_v1 = vpop.f32.mrb[189].mxu0  ;;  %5507 = vmatprep.subr.bf16.mxu1 %v6146_v19 }
 0x4e5   : > { %v3556_v10 = vadd.f32 %v3555_v1, %v8144_v46  ;;  %v3557_v56 = vpop.f32.mrb[190].mxu0  ;;  %4022 = vmatprep.mubr.bf16.mxu1 %v3655_v41 }
 0x4e6   : > { %v3558_v24 = vadd.f32 %v3557_v56, %v8139_v13  ;;  %v3559_v44 = vpop.f32.mrb[191].mxu0  ;;  %4023 = vmatmul.mubr.bf16.gmra.mrb[56].mxu1 %v3654_v53  ;;  %v3622_v11 = vmax.f32 %v3554_v49, 0.0  ;;  %v8212_v13 = vrot.slane %v8136_v33, %v4109_v16  ;;  %v8739_v53 = vld [vmem:[#allocation33_spill] sm:$0xff] }
 0x4e7   : > { %v3560_v43 = vadd.f32 %v3559_v44, %v8144_v46  ;;  %v3623_v26 = vmax.f32 %v3556_v10, 0.0  ;;  %v8215_v46 = vrot.slane %v8141_v22, %v4109_v16  ;;  %v8740_v10 = vld [vmem:[#allocation34_spill] sm:$0xff] }
 0x4e8   : > { %v3624_v34 = vmax.f32 %v3558_v24, 0.0 }
 0x4e9   : > { %v3625_v17 = vmax.f32 %v3560_v43, 0.0  ;;  %v8741_v43 = vld [vmem:[#allocation35_spill] sm:$0xff] }
 0x4ea   : > { %v3656_v37 = vpack.c.bf16 %v3624_v34, %v3622_v11  ;;  %v6147_v34 = vld [vmem:[#allocation11 + $0x20] sm:$0xff]  }
 0x4eb   : > { %v3657_v63 = vpack.c.bf16 %v3625_v17, %v3623_v26  ;;  %v6148_v17 = vld [vmem:[#allocation11 + $0x68] sm:$0xff]   ;;  %5508 = vmatpush3.bf16.msra.mxu1 %v6147_v34 }
 0x4ec   : > { %5509 = vmatprep.subr.bf16.mxu1 %v6148_v17 }
 0x4ed   : > { %4032 = vmatprep.mubr.bf16.mxu1 %v3657_v63 }
 0x4ee   : > { %4033 = vmatmul.mubr.bf16.gmra.mrb[60].mxu1 %v3656_v37 }
 0x549   : > { %v3884_v25 = vpop.f32.mrb[0].mxu1 }
 0x54a   : > { %v4043_v54 = vadd.f32 %v3884_v25, %v8734_v52  ;;  %v3886_v9 = vpop.f32.mrb[1].mxu1  ;;  %v6149_v25 = vld [vmem:[#allocation11 + $0x28] sm:$0xff]  }
 0x54b   : > { %v4044_v39 = vadd.f32 %v3886_v9, %v8735_v29  ;;  %v3888_v51 = vpop.f32.mrb[2].mxu1  ;;  %v6150_v29 = vld [vmem:[#allocation11 + $0x70] sm:$0xff]   ;;  %5510 = vmatpush3.bf16.msra.mxu1 %v6149_v25 }
 0x54c   : > { %v4115_v45 = vadd.f32 %v8212_v13, %v4043_v54  ;;  %v4045_v61 = vadd.f32 %v3888_v51, %v8736_v7  ;;  %v3890_v33 = vpop.f32.mrb[3].mxu1  ;;  %5511 = vmatprep.subr.bf16.mxu1 %v6150_v29 }
 0x54d   : > { %v4116_v47 = vadd.f32 %v8215_v46, %v4044_v39  ;;  %v4046_v62 = vadd.f32 %v3890_v33, %v8737_v4  ;;  %v8743_v39 = vld [vmem:[#allocation37_spill] sm:$0xff]  ;;  %v8744_v33 = vld [vmem:[#allocation40_spill] sm:$0xff] }
 0x54e   : > { %v4117_v22 = vadd.f32 %v8212_v13, %v4045_v61  ;;  %v4179_v58 = vmax.f32 %v4115_v45, 0.0 }
 0x54f   : > { %v4118_v35 = vadd.f32 %v8215_v46, %v4046_v62  ;;  %v4180_v31 = vmax.f32 %v4116_v47, 0.0  ;;  %5512 = vmatpush3.bf16.msra.mxu1 %v6151_v60 }
 0x550   : > { %v4181_v27 = vmax.f32 %v4117_v22, 0.0  ;;  %v8745_v22 = vld [vmem:[#allocation41_spill] sm:$0xff] }
 0x551   : > { %v4182_v23 = vmax.f32 %v4118_v35, 0.0  ;;  %v3894_v36 = vpop.f32.mrb[4].mxu1  ;;  %v6152_v35 = vld [vmem:[#allocation11 + $0x78] sm:$0xff]  }
 0x552   : > { %v4243_v42 = vpack.c.bf16 %v4181_v27, %v4179_v58  ;;  %v4047_v0 = vadd.f32 %v3894_v36, %v8738_v32  ;;  %v3896_v57 = vpop.f32.mrb[5].mxu1  ;;  %v8746_v32 = vld [vmem:[#allocation38_spill] sm:$0xff]  ;;  %5513 = vmatprep.subr.bf16.mxu1 %v6152_v35 }
 0x553   : > { %v4048_v41 = vadd.f32 %v3896_v57, %v8739_v53  ;;  %v3898_v50 = vpop.f32.mrb[6].mxu1  ;;  %v4244_v49 = vpack.c.bf16 %v4182_v23, %v4180_v31  ;;  %v8747_v53 = vld [vmem:[#allocation39_spill] sm:$0xff] }
 0x554   : > { %v4119_v1 = vadd.f32 %v8212_v13, %v4047_v0  ;;  %v4049_v56 = vadd.f32 %v3898_v50, %v8740_v10  ;;  %v3900_v24 = vpop.f32.mrb[7].mxu1  ;;  %v8748_v10 = vld [vmem:[#allocation42_spill] sm:$0xff] }
 0x555   : > { %v4120_v44 = vadd.f32 %v8215_v46, %v4048_v41  ;;  %v4050_v11 = vadd.f32 %v3900_v24, %v8741_v43  ;;  %4507 = vmatprep.mubr.bf16.mxu0 %v4244_v49  ;;  %v8749_v43 = vld [vmem:[#allocation43_spill] sm:$0xff] }
 0x556   : > { %v4121_v26 = vadd.f32 %v8212_v13, %v4049_v56  ;;  %4508 = vmatmul.mubr.bf16.vlgmr.msra.gmra.mrb[192].mxu0 %v4243_v42  ;;  %v4183_v63 = vmax.f32 %v4119_v1, 0.0  ;;  %v6153_v42 = vld [vmem:[#allocation11 + $0x38] sm:$0xff]  }
 0x557   : > { %v4122_v37 = vadd.f32 %v8215_v46, %v4050_v11  ;;  %v4184_v2 = vmax.f32 %v4120_v44, 0.0  ;;  %5514 = vmatpush3.bf16.msra.mxu1 %v6153_v42 }
 0x558   : > { %v4185_v6 = vmax.f32 %v4121_v26, 0.0 }
 0x559   : > { %v4186_v16 = vmax.f32 %v4122_v37, 0.0  ;;  %v3904_v38 = vpop.f32.mrb[8].mxu1 }
 0x55a   : > { %v4051_v52 = vadd.f32 %v3904_v38, %v8742_v12  ;;  %v3906_v54 = vpop.f32.mrb[9].mxu1  ;;  %v4245_v9 = vpack.c.bf16 %v4185_v6, %v4183_v63 }
 0x55b   : > { %v4052_v51 = vadd.f32 %v3906_v54, %v8743_v39  ;;  %v3908_v45 = vpop.f32.mrb[10].mxu1  ;;  %v4246_v7 = vpack.c.bf16 %v4186_v16, %v4184_v2  ;;  %v8750_v16 = vld [vmem:[#allocation46_spill] sm:$0xff] }
 0x55c   : > { %v4123_v61 = vadd.f32 %v8212_v13, %v4051_v52  ;;  %v4053_v47 = vadd.f32 %v3908_v45, %v8744_v33  ;;  %v3910_v4 = vpop.f32.mrb[11].mxu1  ;;  %v8751_v52 = vld [vmem:[#allocation47_spill] sm:$0xff]  ;;  %v8753_v33 = vld [vmem:[#allocation49_spill] sm:$0xff] }
 0x55d   : > { %v4124_v62 = vadd.f32 %v8215_v46, %v4052_v51  ;;  %v4054_v59 = vadd.f32 %v3910_v4, %v8745_v22  ;;  %4517 = vmatprep.mubr.bf16.mxu0 %v4246_v7  ;;  %v8752_v51 = vld [vmem:[#allocation48_spill] sm:$0xff] }
 0x55e   : > { %v4125_v20 = vadd.f32 %v8212_v13, %v4053_v47  ;;  %4518 = vmatmul.mubr.bf16.gmra.mrb[196].mxu0 %v4245_v9  ;;  %v4187_v27 = vmax.f32 %v4123_v61, 0.0 }
 0x55f   : > { %v4126_v58 = vadd.f32 %v8215_v46, %v4054_v59  ;;  %v4188_v23 = vmax.f32 %v4124_v62, 0.0 }
 0x560   : > { %v4189_v31 = vmax.f32 %v4125_v20, 0.0 }
 0x561   : > { %v4190_v36 = vmax.f32 %v4126_v58, 0.0  ;;  %v3914_v21 = vpop.f32.mrb[12].mxu1  ;;  %v8754_v58 = vld [vmem:[#allocation44_spill] sm:$0xff] }
 0x562   : > { %v4055_v0 = vadd.f32 %v3914_v21, %v8746_v32  ;;  %v3916_v57 = vpop.f32.mrb[13].mxu1  ;;  %v4247_v19 = vpack.c.bf16 %v4189_v31, %v4187_v27 }
 0x563   : > { %v4056_v41 = vadd.f32 %v3916_v57, %v8747_v53  ;;  %v3918_v50 = vpop.f32.mrb[14].mxu1  ;;  %v4248_v49 = vpack.c.bf16 %v4190_v36, %v4188_v23  ;;  %v8755_v36 = vld [vmem:[#allocation45_spill] sm:$0xff]  ;;  %v8756_v57 = vld [vmem:[#allocation54_spill] sm:$0xff] }
 0x564   : > { %v4127_v1 = vadd.f32 %v8212_v13, %v4055_v0  ;;  %v4057_v56 = vadd.f32 %v3918_v50, %v8748_v10  ;;  %v3920_v24 = vpop.f32.mrb[15].mxu1  ;;  %v8757_v50 = vld [vmem:[#allocation55_spill] sm:$0xff] }
 0x565   : > { %v4128_v44 = vadd.f32 %v8215_v46, %v4056_v41  ;;  %v4058_v11 = vadd.f32 %v3920_v24, %v8749_v43  ;;  %4527 = vmatprep.mubr.bf16.mxu0 %v4248_v49 }
 0x566   : > { %v4129_v34 = vadd.f32 %v8212_v13, %v4057_v56  ;;  %4528 = vmatmul.mubr.bf16.gmra.mrb[200].mxu0 %v4247_v19  ;;  %v4191_v17 = vmax.f32 %v4127_v1, 0.0 }
 0x567   : > { %v4130_v26 = vadd.f32 %v8215_v46, %v4058_v11  ;;  %v4192_v63 = vmax.f32 %v4128_v44, 0.0 }
 0x568   : > { %v4193_v37 = vmax.f32 %v4129_v34, 0.0  ;;  %v8758_v34 = vld [vmem:[#allocation63_spill] sm:$0xff] }
 0x569   : > { %v4194_v6 = vmax.f32 %v4130_v26, 0.0  ;;  %v3924_v2 = vpop.f32.mrb[16].mxu1 }
 0x56a   : > { %v4059_v38 = vadd.f32 %v3924_v2, %v8750_v16  ;;  %v3926_v25 = vpop.f32.mrb[17].mxu1  ;;  %v4249_v12 = vpack.c.bf16 %v4193_v37, %v4191_v17 }
 0x56b   : > { %v4060_v54 = vadd.f32 %v3926_v25, %v8751_v52  ;;  %v3928_v9 = vpop.f32.mrb[18].mxu1  ;;  %v4250_v29 = vpack.c.bf16 %v4194_v6, %v4192_v63  ;;  %v8759_v63 = vld [vmem:[#allocation64_spill] sm:$0xff]  ;;  %v8760_v25 = vld [vmem:[#allocation65_spill] sm:$0xff] }
 0x56c   : > { %v4131_v39 = vadd.f32 %v8212_v13, %v4059_v38  ;;  %v4061_v45 = vadd.f32 %v3928_v9, %v8752_v51  ;;  %v3930_v7 = vpop.f32.mrb[19].mxu1  ;;  %v8761_v9 = vld [vmem:[#allocation66_spill] sm:$0xff] }
 0x56d   : > { %v4132_v61 = vadd.f32 %v8215_v46, %v4060_v54  ;;  %v4062_v47 = vadd.f32 %v3930_v7, %v8753_v33  ;;  %4537 = vmatprep.mubr.bf16.mxu0 %v4250_v29 }
 0x56e   : > { %v4133_v4 = vadd.f32 %v8212_v13, %v4061_v45  ;;  %4538 = vmatmul.mubr.bf16.gmra.mrb[204].mxu0 %v4249_v12  ;;  %v4195_v22 = vmax.f32 %v4131_v39, 0.0 }
 0x56f   : > { %v4134_v62 = vadd.f32 %v8215_v46, %v4062_v47  ;;  %v4196_v60 = vmax.f32 %v4132_v61, 0.0 }
 0x570   : > { %v4197_v59 = vmax.f32 %v4133_v4, 0.0  ;;  %v8762_v4 = vld [vmem:[#allocation50_spill] sm:$0xff] }
 0x571   : > { %v4198_v20 = vmax.f32 %v4134_v62, 0.0  ;;  %v3934_v35 = vpop.f32.mrb[20].mxu1 }
 0x572   : > { %v4063_v27 = vadd.f32 %v3934_v35, %v8754_v58  ;;  %v3936_v31 = vpop.f32.mrb[21].mxu1  ;;  %v4251_v23 = vpack.c.bf16 %v4197_v59, %v4195_v22 }
 0x573   : > { %v4064_v21 = vadd.f32 %v3936_v31, %v8755_v36  ;;  %v3938_v42 = vpop.f32.mrb[22].mxu1  ;;  %v4252_v32 = vpack.c.bf16 %v4198_v20, %v4196_v60  ;;  %v8763_v60 = vld [vmem:[#allocation51_spill] sm:$0xff]  ;;  %v8764_v31 = vld [vmem:[#allocation73_spill] sm:$0xff] }
 0x574   : > { %v4135_v0 = vadd.f32 %v8212_v13, %v4063_v27  ;;  %v4065_v19 = vadd.f32 %v3938_v42, %v8756_v57  ;;  %v3940_v53 = vpop.f32.mrb[23].mxu1  ;;  %v8765_v42 = vld [vmem:[#allocation74_spill] sm:$0xff] }
 0x575   : > { %v4136_v41 = vadd.f32 %v8215_v46, %v4064_v21  ;;  %v4066_v49 = vadd.f32 %v3940_v53, %v8757_v50  ;;  %4547 = vmatprep.mubr.bf16.mxu0 %v4252_v32 }
 0x576   : > { %v4137_v1 = vadd.f32 %v8212_v13, %v4065_v19  ;;  %4548 = vmatmul.mubr.bf16.gmra.mrb[208].mxu0 %v4251_v23  ;;  %v4199_v56 = vmax.f32 %v4135_v0, 0.0 }
 0x577   : > { %v4138_v10 = vadd.f32 %v8215_v46, %v4066_v49  ;;  %v4200_v44 = vmax.f32 %v4136_v41, 0.0 }
 0x578   : > { %v4201_v24 = vmax.f32 %v4137_v1, 0.0  ;;  %v8766_v1 = vld [vmem:[#allocation79_spill] sm:$0xff] }
 0x579   : > { %v4202_v43 = vmax.f32 %v4138_v10, 0.0  ;;  %v3944_v11 = vpop.f32.mrb[24].mxu1 }
 0x57a   : > { %v4067_v26 = vadd.f32 %v3944_v11, %v8758_v34  ;;  %v3946_v17 = vpop.f32.mrb[25].mxu1  ;;  %v4253_v37 = vpack.c.bf16 %v4201_v24, %v4199_v56 }
 0x57b   : > { %v4068_v6 = vadd.f32 %v3946_v17, %v8759_v63  ;;  %v3948_v2 = vpop.f32.mrb[26].mxu1  ;;  %v4254_v16 = vpack.c.bf16 %v4202_v43, %v4200_v44  ;;  %v8767_v44 = vld [vmem:[#allocation80_spill] sm:$0xff]  ;;  %v8768_v17 = vld [vmem:[#allocation85_spill] sm:$0xff] }
 0x57c   : > { %v4139_v38 = vadd.f32 %v8212_v13, %v4067_v26  ;;  %v4069_v12 = vadd.f32 %v3948_v2, %v8760_v25  ;;  %v3950_v52 = vpop.f32.mrb[27].mxu1  ;;  %v8769_v2 = vld [vmem:[#allocation86_spill] sm:$0xff] }
 0x57d   : > { %v4140_v54 = vadd.f32 %v8215_v46, %v4068_v6  ;;  %v4070_v29 = vadd.f32 %v3950_v52, %v8761_v9  ;;  %4557 = vmatprep.mubr.bf16.mxu0 %v4254_v16 }
 0x57e   : > { %v4141_v39 = vadd.f32 %v8212_v13, %v4069_v12  ;;  %4558 = vmatmul.mubr.bf16.gmra.mrb[212].mxu0 %v4253_v37  ;;  %v4203_v45 = vmax.f32 %v4139_v38, 0.0 }
 0x57f   : > { %v4142_v51 = vadd.f32 %v8215_v46, %v4070_v29  ;;  %v4204_v61 = vmax.f32 %v4140_v54, 0.0 }
 0x580   : > { %v4205_v7 = vmax.f32 %v4141_v39, 0.0  ;;  %v8770_v39 = vld [vmem:[#allocation58_spill] sm:$0xff] }
 0x581   : > { %v4206_v33 = vmax.f32 %v4142_v51, 0.0  ;;  %v3954_v47 = vpop.f32.mrb[28].mxu1 }
 0x582   : > { %v4071_v62 = vadd.f32 %v3954_v47, %v8762_v4  ;;  %v3956_v22 = vpop.f32.mrb[29].mxu1  ;;  %v4255_v59 = vpack.c.bf16 %v4205_v7, %v4203_v45 }
 0x583   : > { %v4072_v20 = vadd.f32 %v3956_v22, %v8763_v60  ;;  %v3958_v35 = vpop.f32.mrb[30].mxu1  ;;  %v4256_v58 = vpack.c.bf16 %v4206_v33, %v4204_v61  ;;  %v8771_v61 = vld [vmem:[#allocation59_spill] sm:$0xff] }
 0x584   : > { %v4143_v27 = vadd.f32 %v8212_v13, %v4071_v62  ;;  %v4073_v23 = vadd.f32 %v3958_v35, %v8764_v31  ;;  %v3960_v36 = vpop.f32.mrb[31].mxu1 }
 0x585   : > { %v4144_v21 = vadd.f32 %v8215_v46, %v4072_v20  ;;  %v4074_v32 = vadd.f32 %v3960_v36, %v8765_v42  ;;  %4567 = vmatprep.mubr.bf16.mxu0 %v4256_v58 }
 0x586   : > { %v4145_v0 = vadd.f32 %v8212_v13, %v4073_v23  ;;  %4568 = vmatmul.mubr.bf16.gmra.mrb[216].mxu0 %v4255_v59  ;;  %v4207_v19 = vmax.f32 %v4143_v27, 0.0 }
 0x587   : > { %v4146_v57 = vadd.f32 %v8215_v46, %v4074_v32  ;;  %v4208_v41 = vmax.f32 %v4144_v21, 0.0 }
 0x588   : > { %v4209_v53 = vmax.f32 %v4145_v0, 0.0 }
 0x589   : > { %v4210_v50 = vmax.f32 %v4146_v57, 0.0  ;;  %v3964_v49 = vpop.f32.mrb[32].mxu1 }
 0x58a   : > { %v4075_v10 = vadd.f32 %v3964_v49, %v8766_v1  ;;  %v3966_v56 = vpop.f32.mrb[33].mxu1  ;;  %v4257_v24 = vpack.c.bf16 %v4209_v53, %v4207_v19  ;;  %v8772_v53 = vld [vmem:[#allocation91_spill] sm:$0xff]  ;;  %v8773_v1 = vld [vmem:[#allocation92_spill] sm:$0xff] }
 0x58b   : > { %v4076_v43 = vadd.f32 %v3966_v56, %v8767_v44  ;;  %v3968_v11 = vpop.f32.mrb[34].mxu1  ;;  %v4258_v34 = vpack.c.bf16 %v4210_v50, %v4208_v41 }
 0x58c   : > { %v4147_v26 = vadd.f32 %v8212_v13, %v4075_v10  ;;  %v4077_v37 = vadd.f32 %v3968_v11, %v8768_v17  ;;  %v3970_v63 = vpop.f32.mrb[35].mxu1 }
 0x58d   : > { %v4148_v6 = vadd.f32 %v8215_v46, %v4076_v43  ;;  %v4078_v16 = vadd.f32 %v3970_v63, %v8769_v2  ;;  %4577 = vmatprep.mubr.bf16.mxu0 %v4258_v34  ;;  %v8774_v34 = vld [vmem:[#allocation69_spill] sm:$0xff]  ;;  %v8775_v63 = vld [vmem:[#allocation70_spill] sm:$0xff] }
 0x58e   : > { %v4149_v38 = vadd.f32 %v8212_v13, %v4077_v37  ;;  %4578 = vmatmul.mubr.bf16.gmra.mrb[220].mxu0 %v4257_v24  ;;  %v4211_v12 = vmax.f32 %v4147_v26, 0.0 }
 0x58f   : > { %v4150_v25 = vadd.f32 %v8215_v46, %v4078_v16  ;;  %v4212_v54 = vmax.f32 %v4148_v6, 0.0 }
 0x590   : > { %v4213_v52 = vmax.f32 %v4149_v38, 0.0 }
 0x591   : > { %v4214_v9 = vmax.f32 %v4150_v25, 0.0  ;;  %v3974_v29 = vpop.f32.mrb[36].mxu1  ;;  %v8776_v25 = vld [vmem:[#allocation93_spill] sm:$0xff] }
 0x592   : > { %v4079_v51 = vadd.f32 %v3974_v29, %v8770_v39  ;;  %v3976_v45 = vpop.f32.mrb[37].mxu1  ;;  %v4259_v7 = vpack.c.bf16 %v4213_v52, %v4211_v12 }
 0x593   : > { %v4080_v33 = vadd.f32 %v3976_v45, %v8771_v61  ;;  %v3978_v47 = vpop.f32.mrb[38].mxu1  ;;  %v4260_v4 = vpack.c.bf16 %v4214_v9, %v4212_v54  ;;  %v8777_v9 = vld [vmem:[#allocation94_spill] sm:$0xff] }
 0x594   : > { %v4151_v62 = vadd.f32 %v8212_v13, %v4079_v51  ;;  %v4081_v22 = vadd.f32 %v3978_v47, %v7537_v18  ;;  %v3980_v59 = vpop.f32.mrb[39].mxu1 }
 0x595   : > { %v4152_v60 = vadd.f32 %v8215_v46, %v4080_v33  ;;  %v4082_v20 = vadd.f32 %v3980_v59, %v7539_v28  ;;  %4587 = vmatprep.mubr.bf16.mxu0 %v4260_v4  ;;  %v8778_v4 = vld [vmem:[#allocation56_spill] sm:$0xff] }
 0x596   : > { %v4153_v35 = vadd.f32 %v8212_v13, %v4081_v22  ;;  %4588 = vmatmul.mubr.bf16.gmra.mrb[224].mxu0 %v4259_v7  ;;  %v4215_v27 = vmax.f32 %v4151_v62, 0.0 }
 0x597   : > { %v4154_v58 = vadd.f32 %v8215_v46, %v4082_v20  ;;  %v4216_v23 = vmax.f32 %v4152_v60, 0.0  ;;  %v8779_v60 = vld [vmem:[#allocation60_spill] sm:$0xff] }
 0x598   : > { %v4217_v31 = vmax.f32 %v4153_v35, 0.0 }
 0x599   : > { %v4218_v36 = vmax.f32 %v4154_v58, 0.0  ;;  %v3984_v21 = vpop.f32.mrb[40].mxu1 }
 0x59a   : > { %v4083_v42 = vadd.f32 %v3984_v21, %v7573_v15  ;;  %v3986_v32 = vpop.f32.mrb[41].mxu1  ;;  %v4261_v18 = vpack.c.bf16 %v4217_v31, %v4215_v27  ;;  %v8780_v31 = vld [vmem:[#allocation62_spill] sm:$0xff] }
 0x59b   : > { %v4084_v0 = vadd.f32 %v3986_v32, %v7583_v8  ;;  %v3988_v57 = vpop.f32.mrb[42].mxu1  ;;  %v4262_v19 = vpack.c.bf16 %v4218_v36, %v4216_v23 }
 0x59c   : > { %v4155_v28 = vadd.f32 %v8212_v13, %v4083_v42  ;;  %v4085_v41 = vadd.f32 %v3988_v57, %v8772_v53  ;;  %v3990_v50 = vpop.f32.mrb[43].mxu1  ;;  %v8781_v42 = vld [vmem:[#allocation72_spill] sm:$0xff] }
 0x59d   : > { %v4156_v49 = vadd.f32 %v8215_v46, %v4084_v0  ;;  %v4086_v10 = vadd.f32 %v3990_v50, %v8773_v1  ;;  %4597 = vmatprep.mubr.bf16.mxu0 %v4262_v19  ;;  %v8782_v50 = vld [vmem:[#allocation82_spill] sm:$0xff] }
 0x59e   : > { %v4157_v56 = vadd.f32 %v8212_v13, %v4085_v41  ;;  %4598 = vmatmul.mubr.bf16.gmra.mrb[228].mxu0 %v4261_v18  ;;  %v4219_v24 = vmax.f32 %v4155_v28, 0.0 }
 0x59f   : > { %v4158_v15 = vadd.f32 %v8215_v46, %v4086_v10  ;;  %v4220_v8 = vmax.f32 %v4156_v49, 0.0 }
 0x5a0   : > { %v4221_v44 = vmax.f32 %v4157_v56, 0.0  ;;  %v8783_v56 = vld [vmem:[#allocation83_spill] sm:$0xff] }
 0x5a1   : > { %v4222_v43 = vmax.f32 %v4158_v15, 0.0  ;;  %v3994_v11 = vpop.f32.mrb[44].mxu1 }
 0x5a2   : > { %v4087_v26 = vadd.f32 %v3994_v11, %v8774_v34  ;;  %v3996_v17 = vpop.f32.mrb[45].mxu1  ;;  %v4263_v37 = vpack.c.bf16 %v4221_v44, %v4219_v24 }
 0x5a3   : > { %v4088_v6 = vadd.f32 %v3996_v17, %v8775_v63  ;;  %v3998_v2 = vpop.f32.mrb[46].mxu1  ;;  %v4264_v16 = vpack.c.bf16 %v4222_v43, %v4220_v8  ;;  %v8784_v43 = vld [vmem:[#allocation67_spill] sm:$0xff] }
 0x5a4   : > { %v4159_v38 = vadd.f32 %v8212_v13, %v4087_v26  ;;  %v4089_v12 = vadd.f32 %v3998_v2, %v8776_v25  ;;  %v4000_v52 = vpop.f32.mrb[47].mxu1  ;;  %v8785_v17 = vld [vmem:[#allocation71_spill] sm:$0xff] }
 0x5a5   : > { %v4160_v54 = vadd.f32 %v8215_v46, %v4088_v6  ;;  %v4090_v29 = vadd.f32 %v4000_v52, %v8777_v9  ;;  %4607 = vmatprep.mubr.bf16.mxu0 %v4264_v16 }
 0x5a6   : > { %v4161_v39 = vadd.f32 %v8212_v13, %v4089_v12  ;;  %4608 = vmatmul.mubr.bf16.gmra.mrb[232].mxu0 %v4263_v37  ;;  %v4223_v45 = vmax.f32 %v4159_v38, 0.0 }
 0x5a7   : > { %v4162_v51 = vadd.f32 %v8215_v46, %v4090_v29  ;;  %v4224_v61 = vmax.f32 %v4160_v54, 0.0 }
 0x5a8   : > { %v4225_v7 = vmax.f32 %v4161_v39, 0.0 }
 0x5a9   : > { %v4226_v33 = vmax.f32 %v4162_v51, 0.0  ;;  %v4004_v47 = vpop.f32.mrb[48].mxu1 }
 0x5aa   : > { %v4091_v62 = vadd.f32 %v4004_v47, %v8778_v4  ;;  %v4006_v22 = vpop.f32.mrb[49].mxu1  ;;  %v4265_v59 = vpack.c.bf16 %v4225_v7, %v4223_v45 }
 0x5ab   : > { %v4092_v20 = vadd.f32 %v4006_v22, %v8779_v60  ;;  %v4008_v35 = vpop.f32.mrb[50].mxu1  ;;  %v4266_v58 = vpack.c.bf16 %v4226_v33, %v4224_v61 }
 0x5ac   : > { %v4163_v27 = vadd.f32 %v8212_v13, %v4091_v62  ;;  %v4093_v23 = vadd.f32 %v4008_v35, %v8780_v31  ;;  %v4010_v36 = vpop.f32.mrb[51].mxu1 }
 0x5ad   : > { %v4164_v21 = vadd.f32 %v8215_v46, %v4092_v20  ;;  %v4094_v32 = vadd.f32 %v4010_v36, %v8781_v42  ;;  %4617 = vmatprep.mubr.bf16.mxu0 %v4266_v58  ;;  %v8786_v20 = vld [vmem:[#allocation89_spill] sm:$0xff] }
 0x5ae   : > { %v4165_v18 = vadd.f32 %v8212_v13, %v4093_v23  ;;  %4618 = vmatmul.mubr.bf16.gmra.mrb[236].mxu0 %v4265_v59  ;;  %v4227_v57 = vmax.f32 %v4163_v27, 0.0  ;;  %v8787_v27 = vld [vmem:[#allocation90_spill] sm:$0xff] }
 0x5af   : > { %v4166_v0 = vadd.f32 %v8215_v46, %v4094_v32  ;;  %v4228_v28 = vmax.f32 %v4164_v21, 0.0 }
 0x5b0   : > { %v4229_v19 = vmax.f32 %v4165_v18, 0.0 }
 0x5b1   : > { %v4230_v53 = vmax.f32 %v4166_v0, 0.0  ;;  %v4014_v41 = vpop.f32.mrb[52].mxu1 }
 0x5b2   : > { %v4095_v49 = vadd.f32 %v4014_v41, %v8782_v50  ;;  %v4016_v1 = vpop.f32.mrb[53].mxu1  ;;  %v4267_v10 = vpack.c.bf16 %v4229_v19, %v4227_v57 }
 0x5b3   : > { %v4096_v15 = vadd.f32 %v4016_v1, %v8783_v56  ;;  %v4018_v24 = vpop.f32.mrb[54].mxu1  ;;  %v4268_v44 = vpack.c.bf16 %v4230_v53, %v4228_v28  ;;  %v8346_v1 = vld [vmem:[#allocation13] sm:$0xff] }
 0x5b4   : > { %v4167_v8 = vadd.f32 %v8212_v13, %v4095_v49  ;;  %v4097_v11 = vadd.f32 %v4018_v24, %v8784_v43  ;;  %v4020_v34 = vpop.f32.mrb[55].mxu1 }
 0x5b5   : > { %v4168_v26 = vadd.f32 %v8215_v46, %v4096_v15  ;;  %v4098_v37 = vadd.f32 %v4020_v34, %v8785_v17  ;;  %4627 = vmatprep.mubr.bf16.mxu0 %v4268_v44 }
 0x5b6   : > { %v4169_v63 = vadd.f32 %v8212_v13, %v4097_v11  ;;  %4628 = vmatmul.mubr.bf16.gmra.mrb[240].mxu0 %v4267_v10  ;;  %v4231_v2 = vmax.f32 %v4167_v8, 0.0  ;;  %v6175_v10 = vld [vmem:[#allocation13 + $0x8] sm:$0xff] }
 0x5b7   : > { %v4170_v6 = vadd.f32 %v8215_v46, %v4098_v37  ;;  %v4232_v38 = vmax.f32 %v4168_v26, 0.0 }
 0x5b8   : > { %v4233_v16 = vmax.f32 %v4169_v63, 0.0 }
 0x5b9   : > { %v4234_v25 = vmax.f32 %v4170_v6, 0.0  ;;  %v4024_v12 = vpop.f32.mrb[56].mxu1 }
 0x5ba   : > { %v4099_v52 = vadd.f32 %v4024_v12, %v7819_v3  ;;  %v4026_v54 = vpop.f32.mrb[57].mxu1  ;;  %v4269_v9 = vpack.c.bf16 %v4233_v16, %v4231_v2 }
 0x5bb   : > { %v4100_v29 = vadd.f32 %v4026_v54, %v7821_v14  ;;  %v4028_v39 = vpop.f32.mrb[58].mxu1  ;;  %v4270_v51 = vpack.c.bf16 %v4234_v25, %v4232_v38 }
 0x5bc   : > { %v4171_v45 = vadd.f32 %v8212_v13, %v4099_v52  ;;  %v4101_v7 = vadd.f32 %v4028_v39, %v7836_v55  ;;  %v4030_v61 = vpop.f32.mrb[59].mxu1 }
 0x5bd   : > { %v4172_v33 = vadd.f32 %v8215_v46, %v4100_v29  ;;  %v4102_v47 = vadd.f32 %v4030_v61, %v7838_v48  ;;  %4637 = vmatprep.mubr.bf16.mxu0 %v4270_v51 }
 0x5be   : > { %v4173_v4 = vadd.f32 %v8212_v13, %v4101_v7  ;;  %4638 = vmatmul.mubr.bf16.gmra.mrb[244].mxu0 %v4269_v9  ;;  %v4235_v62 = vmax.f32 %v4171_v45, 0.0 }
 0x5bf   : > { %v4174_v3 = vadd.f32 %v8215_v46, %v4102_v47  ;;  %v4236_v14 = vmax.f32 %v4172_v33, 0.0 }
 0x5c0   : > { %v4237_v22 = vmax.f32 %v4173_v4, 0.0 }
 0x5c1   : > { %v4238_v59 = vmax.f32 %v4174_v3, 0.0  ;;  %v4034_v60 = vpop.f32.mrb[60].mxu1 }
 0x5c2   : > { %v4103_v35 = vadd.f32 %v4034_v60, %v8786_v20  ;;  %v4036_v58 = vpop.f32.mrb[61].mxu1  ;;  %v4271_v55 = vpack.c.bf16 %v4237_v22, %v4235_v62 }
 0x5c3   : > { %v4104_v31 = vadd.f32 %v4036_v58, %v8787_v27  ;;  %v4038_v23 = vpop.f32.mrb[62].mxu1  ;;  %v4272_v36 = vpack.c.bf16 %v4238_v59, %v4236_v14 }
 0x5c4   : > { %v4175_v48 = vadd.f32 %v8212_v13, %v4103_v35  ;;  %v4105_v21 = vadd.f32 %v4038_v23, %v7875_v5  ;;  %v4040_v42 = vpop.f32.mrb[63].mxu1  ;;  %v4309_v5 = vsub.s32 5, %v8733_v40 }
 0x5c5   : > { %v4176_v32 = vadd.f32 %v8215_v46, %v4104_v31  ;;  %v4106_v18 = vadd.f32 %v4040_v42, %v7877_v30  ;;  %4647 = vmatprep.mubr.bf16.mxu0 %v4272_v36 }
 0x5c6   : > { %v4177_v0 = vadd.f32 %v8212_v13, %v4105_v21  ;;  %4648 = vmatmul.mubr.bf16.gmra.mrb[248].mxu0 %v4271_v55  ;;  %v4239_v19 = vmax.f32 %v4175_v48, 0.0  ;;  %v8349_v30 = vrot.slane %v8346_v1, %v4309_v5  ;;  %v8351_v13 = vrot.slane %v6175_v10, %v4309_v5 }
 0x5c7   : > { %v4178_v57 = vadd.f32 %v8215_v46, %v4106_v18  ;;  %v4240_v53 = vmax.f32 %v4176_v32, 0.0 }
 0x5c8   : > { %v4241_v28 = vmax.f32 %v4177_v0, 0.0 }
 0x5c9   : > { %v4242_v41 = vmax.f32 %v4178_v57, 0.0 }
 0x5ca   : > { %v4273_v50 = vpack.c.bf16 %v4241_v28, %v4239_v19 }
 0x5cb   : > { %v4274_v49 = vpack.c.bf16 %v4242_v41, %v4240_v53 }
 0x5cd   : > { %4657 = vmatprep.mubr.bf16.mxu0 %v4274_v49 }
 0x5ce   : > { %4658 = vmatmul.mubr.bf16.gmra.mrb[252].mxu0 %v4273_v50 }
 0x629   : > { %v4509_v56 = vpop.f32.mrb[192].mxu0 }
 0x62a   : > { %v4510_v46 = vadd.f32 %v4509_v56, %v8349_v30  ;;  %v4511_v15 = vpop.f32.mrb[193].mxu0 }
 0x62b   : > { %v4512_v24 = vadd.f32 %v4511_v15, %v8351_v13  ;;  %v4513_v44 = vpop.f32.mrb[194].mxu0 }
 0x62c   : > { %v4514_v8 = vadd.f32 %v4513_v44, %v8349_v30  ;;  %v4515_v43 = vpop.f32.mrb[195].mxu0  ;;  %v4668_v34 = vmax.f32 %v4510_v46, 0.0 }
 0x62d   : > { %v4516_v11 = vadd.f32 %v4515_v43, %v8351_v13  ;;  %v4669_v17 = vmax.f32 %v4512_v24, 0.0 }
 0x62e   : > { %v4670_v26 = vmax.f32 %v4514_v8, 0.0 }
 0x62f   : > { %v4671_v37 = vmax.f32 %v4516_v11, 0.0 }
 0x630   : > { %v4732_v63 = vpack.c.bf16 %v4670_v26, %v4668_v34 }
 0x631   : > { %v4733_v6 = vpack.c.bf16 %v4671_v37, %v4669_v17  ;;  %v4519_v2 = vpop.f32.mrb[196].mxu0 }
 0x632   : > { %v4520_v16 = vadd.f32 %v4519_v2, %v8349_v30  ;;  %v4521_v38 = vpop.f32.mrb[197].mxu0 }
 0x633   : > { %v4522_v25 = vadd.f32 %v4521_v38, %v8351_v13  ;;  %v4523_v12 = vpop.f32.mrb[198].mxu0  ;;  %4928 = vmatprep.mubr.bf16.mxu1 %v4733_v6 }
 0x634   : > { %v4524_v52 = vadd.f32 %v4523_v12, %v8349_v30  ;;  %v4525_v54 = vpop.f32.mrb[199].mxu0  ;;  %4929 = vmatmul.mubr.bf16.vlgmr.msra.gmra.mrb[128].mxu1 %v4732_v63  ;;  %v4672_v29 = vmax.f32 %v4520_v16, 0.0 }
 0x635   : > { %v4526_v9 = vadd.f32 %v4525_v54, %v8351_v13  ;;  %v4673_v51 = vmax.f32 %v4522_v25, 0.0 }
 0x636   : > { %v4674_v39 = vmax.f32 %v4524_v52, 0.0 }
 0x637   : > { %v4675_v45 = vmax.f32 %v4526_v9, 0.0 }
 0x638   : > { %v4734_v7 = vpack.c.bf16 %v4674_v39, %v4672_v29 }
 0x639   : > { %v4735_v61 = vpack.c.bf16 %v4675_v45, %v4673_v51  ;;  %v4529_v33 = vpop.f32.mrb[200].mxu0 }
 0x63a   : > { %v4530_v47 = vadd.f32 %v4529_v33, %v8349_v30  ;;  %v4531_v4 = vpop.f32.mrb[201].mxu0 }
 0x63b   : > { %v4532_v3 = vadd.f32 %v4531_v4, %v8351_v13  ;;  %v4533_v62 = vpop.f32.mrb[202].mxu0  ;;  %4936 = vmatprep.mubr.bf16.mxu1 %v4735_v61 }
 0x63c   : > { %v4534_v22 = vadd.f32 %v4533_v62, %v8349_v30  ;;  %v4535_v14 = vpop.f32.mrb[203].mxu0  ;;  %4937 = vmatmul.mubr.bf16.gmra.mrb[132].mxu1 %v4734_v7  ;;  %v4676_v60 = vmax.f32 %v4530_v47, 0.0 }
 0x63d   : > { %v4536_v59 = vadd.f32 %v4535_v14, %v8351_v13  ;;  %v4677_v35 = vmax.f32 %v4532_v3, 0.0 }
 0x63e   : > { %v4678_v20 = vmax.f32 %v4534_v22, 0.0 }
 0x63f   : > { %v4679_v58 = vmax.f32 %v4536_v59, 0.0 }
 0x640   : > { %v4736_v55 = vpack.c.bf16 %v4678_v20, %v4676_v60 }
 0x641   : > { %v4737_v27 = vpack.c.bf16 %v4679_v58, %v4677_v35  ;;  %v4539_v31 = vpop.f32.mrb[204].mxu0 }
 0x642   : > { %v4540_v23 = vadd.f32 %v4539_v31, %v8349_v30  ;;  %v4541_v36 = vpop.f32.mrb[205].mxu0 }
 0x643   : > { %v4542_v48 = vadd.f32 %v4541_v36, %v8351_v13  ;;  %v4543_v21 = vpop.f32.mrb[206].mxu0  ;;  %4944 = vmatprep.mubr.bf16.mxu1 %v4737_v27 }
 0x644   : > { %v4544_v42 = vadd.f32 %v4543_v21, %v8349_v30  ;;  %v4545_v32 = vpop.f32.mrb[207].mxu0  ;;  %4945 = vmatmul.mubr.bf16.gmra.mrb[136].mxu1 %v4736_v55  ;;  %v4680_v0 = vmax.f32 %v4540_v23, 0.0 }
 0x645   : > { %v4546_v18 = vadd.f32 %v4545_v32, %v8351_v13  ;;  %v4681_v19 = vmax.f32 %v4542_v48, 0.0 }
 0x646   : > { %v4682_v57 = vmax.f32 %v4544_v42, 0.0 }
 0x647   : > { %v4683_v28 = vmax.f32 %v4546_v18, 0.0 }
 0x648   : > { %v4738_v53 = vpack.c.bf16 %v4682_v57, %v4680_v0 }
 0x649   : > { %v4739_v41 = vpack.c.bf16 %v4683_v28, %v4681_v19  ;;  %v4549_v50 = vpop.f32.mrb[208].mxu0 }
 0x64a   : > { %v4550_v49 = vadd.f32 %v4549_v50, %v8349_v30  ;;  %v4551_v5 = vpop.f32.mrb[209].mxu0 }
 0x64b   : > { %v4552_v10 = vadd.f32 %v4551_v5, %v8351_v13  ;;  %v4553_v56 = vpop.f32.mrb[210].mxu0  ;;  %4952 = vmatprep.mubr.bf16.mxu1 %v4739_v41 }
 0x64c   : > { %v4554_v46 = vadd.f32 %v4553_v56, %v8349_v30  ;;  %v4555_v15 = vpop.f32.mrb[211].mxu0  ;;  %4953 = vmatmul.mubr.bf16.gmra.mrb[140].mxu1 %v4738_v53  ;;  %v4684_v44 = vmax.f32 %v4550_v49, 0.0 }
 0x64d   : > { %v4556_v24 = vadd.f32 %v4555_v15, %v8351_v13  ;;  %v4685_v43 = vmax.f32 %v4552_v10, 0.0 }
 0x64e   : > { %v4686_v8 = vmax.f32 %v4554_v46, 0.0 }
 0x64f   : > { %v4687_v11 = vmax.f32 %v4556_v24, 0.0 }
 0x650   : > { %v4740_v34 = vpack.c.bf16 %v4686_v8, %v4684_v44 }
 0x651   : > { %v4741_v26 = vpack.c.bf16 %v4687_v11, %v4685_v43  ;;  %v4559_v17 = vpop.f32.mrb[212].mxu0 }
 0x652   : > { %v4560_v37 = vadd.f32 %v4559_v17, %v8349_v30  ;;  %v4561_v63 = vpop.f32.mrb[213].mxu0 }
 0x653   : > { %v4562_v6 = vadd.f32 %v4561_v63, %v8351_v13  ;;  %v4563_v2 = vpop.f32.mrb[214].mxu0  ;;  %4960 = vmatprep.mubr.bf16.mxu1 %v4741_v26 }
 0x654   : > { %v4564_v16 = vadd.f32 %v4563_v2, %v8349_v30  ;;  %v4565_v38 = vpop.f32.mrb[215].mxu0  ;;  %4961 = vmatmul.mubr.bf16.gmra.mrb[144].mxu1 %v4740_v34  ;;  %v4688_v12 = vmax.f32 %v4560_v37, 0.0 }
 0x655   : > { %v4566_v25 = vadd.f32 %v4565_v38, %v8351_v13  ;;  %v4689_v54 = vmax.f32 %v4562_v6, 0.0 }
 0x656   : > { %v4690_v52 = vmax.f32 %v4564_v16, 0.0 }
 0x657   : > { %v4691_v9 = vmax.f32 %v4566_v25, 0.0 }
 0x658   : > { %v4742_v29 = vpack.c.bf16 %v4690_v52, %v4688_v12 }
 0x659   : > { %v4743_v39 = vpack.c.bf16 %v4691_v9, %v4689_v54  ;;  %v4569_v51 = vpop.f32.mrb[216].mxu0 }
 0x65a   : > { %v4570_v45 = vadd.f32 %v4569_v51, %v8349_v30  ;;  %v4571_v7 = vpop.f32.mrb[217].mxu0 }
 0x65b   : > { %v4572_v61 = vadd.f32 %v4571_v7, %v8351_v13  ;;  %v4573_v33 = vpop.f32.mrb[218].mxu0  ;;  %4968 = vmatprep.mubr.bf16.mxu1 %v4743_v39 }
 0x65c   : > { %v4574_v47 = vadd.f32 %v4573_v33, %v8349_v30  ;;  %v4575_v4 = vpop.f32.mrb[219].mxu0  ;;  %4969 = vmatmul.mubr.bf16.gmra.mrb[148].mxu1 %v4742_v29  ;;  %v4692_v62 = vmax.f32 %v4570_v45, 0.0 }
 0x65d   : > { %v4576_v3 = vadd.f32 %v4575_v4, %v8351_v13  ;;  %v4693_v14 = vmax.f32 %v4572_v61, 0.0 }
 0x65e   : > { %v4694_v22 = vmax.f32 %v4574_v47, 0.0 }
 0x65f   : > { %v4695_v59 = vmax.f32 %v4576_v3, 0.0 }
 0x660   : > { %v4744_v60 = vpack.c.bf16 %v4694_v22, %v4692_v62 }
 0x661   : > { %v4745_v20 = vpack.c.bf16 %v4695_v59, %v4693_v14  ;;  %v4579_v35 = vpop.f32.mrb[220].mxu0 }
 0x662   : > { %v4580_v58 = vadd.f32 %v4579_v35, %v8349_v30  ;;  %v4581_v55 = vpop.f32.mrb[221].mxu0 }
 0x663   : > { %v4582_v27 = vadd.f32 %v4581_v55, %v8351_v13  ;;  %v4583_v31 = vpop.f32.mrb[222].mxu0  ;;  %4976 = vmatprep.mubr.bf16.mxu1 %v4745_v20 }
 0x664   : > { %v4584_v23 = vadd.f32 %v4583_v31, %v8349_v30  ;;  %v4585_v36 = vpop.f32.mrb[223].mxu0  ;;  %4977 = vmatmul.mubr.bf16.gmra.mrb[152].mxu1 %v4744_v60  ;;  %v4696_v21 = vmax.f32 %v4580_v58, 0.0 }
 0x665   : > { %v4586_v48 = vadd.f32 %v4585_v36, %v8351_v13  ;;  %v4697_v32 = vmax.f32 %v4582_v27, 0.0 }
 0x666   : > { %v4698_v42 = vmax.f32 %v4584_v23, 0.0 }
 0x667   : > { %v4699_v18 = vmax.f32 %v4586_v48, 0.0 }
 0x668   : > { %v4746_v0 = vpack.c.bf16 %v4698_v42, %v4696_v21 }
 0x669   : > { %v4747_v57 = vpack.c.bf16 %v4699_v18, %v4697_v32  ;;  %v4589_v19 = vpop.f32.mrb[224].mxu0 }
 0x66a   : > { %v4590_v28 = vadd.f32 %v4589_v19, %v8349_v30  ;;  %v4591_v53 = vpop.f32.mrb[225].mxu0 }
 0x66b   : > { %v4592_v41 = vadd.f32 %v4591_v53, %v8351_v13  ;;  %v4593_v50 = vpop.f32.mrb[226].mxu0  ;;  %4984 = vmatprep.mubr.bf16.mxu1 %v4747_v57 }
 0x66c   : > { %v4594_v49 = vadd.f32 %v4593_v50, %v8349_v30  ;;  %v4595_v5 = vpop.f32.mrb[227].mxu0  ;;  %4985 = vmatmul.mubr.bf16.gmra.mrb[156].mxu1 %v4746_v0  ;;  %v4700_v56 = vmax.f32 %v4590_v28, 0.0 }
 0x66d   : > { %v4596_v10 = vadd.f32 %v4595_v5, %v8351_v13  ;;  %v4701_v15 = vmax.f32 %v4592_v41, 0.0 }
 0x66e   : > { %v4702_v46 = vmax.f32 %v4594_v49, 0.0 }
 0x66f   : > { %v4703_v24 = vmax.f32 %v4596_v10, 0.0 }
 0x670   : > { %v4748_v44 = vpack.c.bf16 %v4702_v46, %v4700_v56 }
 0x671   : > { %v4749_v8 = vpack.c.bf16 %v4703_v24, %v4701_v15  ;;  %v4599_v43 = vpop.f32.mrb[228].mxu0 }
 0x672   : > { %v4600_v11 = vadd.f32 %v4599_v43, %v8349_v30  ;;  %v4601_v34 = vpop.f32.mrb[229].mxu0 }
 0x673   : > { %v4602_v26 = vadd.f32 %v4601_v34, %v8351_v13  ;;  %v4603_v17 = vpop.f32.mrb[230].mxu0  ;;  %4992 = vmatprep.mubr.bf16.mxu1 %v4749_v8 }
 0x674   : > { %v4604_v37 = vadd.f32 %v4603_v17, %v8349_v30  ;;  %v4605_v63 = vpop.f32.mrb[231].mxu0  ;;  %4993 = vmatmul.mubr.bf16.gmra.mrb[160].mxu1 %v4748_v44  ;;  %v4704_v2 = vmax.f32 %v4600_v11, 0.0 }
 0x675   : > { %v4606_v6 = vadd.f32 %v4605_v63, %v8351_v13  ;;  %v4705_v38 = vmax.f32 %v4602_v26, 0.0 }
 0x676   : > { %v4706_v16 = vmax.f32 %v4604_v37, 0.0 }
 0x677   : > { %v4707_v25 = vmax.f32 %v4606_v6, 0.0 }
 0x678   : > { %v4750_v12 = vpack.c.bf16 %v4706_v16, %v4704_v2 }
 0x679   : > { %v4751_v52 = vpack.c.bf16 %v4707_v25, %v4705_v38  ;;  %v4609_v54 = vpop.f32.mrb[232].mxu0 }
 0x67a   : > { %v4610_v9 = vadd.f32 %v4609_v54, %v8349_v30  ;;  %v4611_v29 = vpop.f32.mrb[233].mxu0 }
 0x67b   : > { %v4612_v39 = vadd.f32 %v4611_v29, %v8351_v13  ;;  %v4613_v51 = vpop.f32.mrb[234].mxu0  ;;  %5000 = vmatprep.mubr.bf16.mxu1 %v4751_v52 }
 0x67c   : > { %v4614_v45 = vadd.f32 %v4613_v51, %v8349_v30  ;;  %v4615_v7 = vpop.f32.mrb[235].mxu0  ;;  %5001 = vmatmul.mubr.bf16.gmra.mrb[164].mxu1 %v4750_v12  ;;  %v4708_v33 = vmax.f32 %v4610_v9, 0.0 }
 0x67d   : > { %v4616_v61 = vadd.f32 %v4615_v7, %v8351_v13  ;;  %v4709_v4 = vmax.f32 %v4612_v39, 0.0 }
 0x67e   : > { %v4710_v47 = vmax.f32 %v4614_v45, 0.0 }
 0x67f   : > { %v4711_v3 = vmax.f32 %v4616_v61, 0.0 }
 0x680   : > { %v4752_v62 = vpack.c.bf16 %v4710_v47, %v4708_v33 }
 0x681   : > { %v4753_v22 = vpack.c.bf16 %v4711_v3, %v4709_v4  ;;  %v4619_v14 = vpop.f32.mrb[236].mxu0 }
 0x682   : > { %v4620_v59 = vadd.f32 %v4619_v14, %v8349_v30  ;;  %v4621_v60 = vpop.f32.mrb[237].mxu0 }
 0x683   : > { %v4622_v20 = vadd.f32 %v4621_v60, %v8351_v13  ;;  %v4623_v35 = vpop.f32.mrb[238].mxu0  ;;  %5008 = vmatprep.mubr.bf16.mxu1 %v4753_v22 }
 0x684   : > { %v4624_v58 = vadd.f32 %v4623_v35, %v8349_v30  ;;  %v4625_v55 = vpop.f32.mrb[239].mxu0  ;;  %5009 = vmatmul.mubr.bf16.gmra.mrb[168].mxu1 %v4752_v62  ;;  %v4712_v31 = vmax.f32 %v4620_v59, 0.0 }
 0x685   : > { %v4626_v27 = vadd.f32 %v4625_v55, %v8351_v13  ;;  %v4713_v36 = vmax.f32 %v4622_v20, 0.0 }
 0x686   : > { %v4714_v23 = vmax.f32 %v4624_v58, 0.0 }
 0x687   : > { %v4715_v48 = vmax.f32 %v4626_v27, 0.0 }
 0x688   : > { %v4754_v21 = vpack.c.bf16 %v4714_v23, %v4712_v31 }
 0x689   : > { %v4755_v42 = vpack.c.bf16 %v4715_v48, %v4713_v36  ;;  %v4629_v32 = vpop.f32.mrb[240].mxu0  ;;  %v4798_v36 = vsub.s32 6, %v8733_v40 }
 0x68a   : > { %v4630_v18 = vadd.f32 %v4629_v32, %v8349_v30  ;;  %v4631_v0 = vpop.f32.mrb[241].mxu0 }
 0x68b   : > { %v4632_v57 = vadd.f32 %v4631_v0, %v8351_v13  ;;  %v4633_v19 = vpop.f32.mrb[242].mxu0  ;;  %5016 = vmatprep.mubr.bf16.mxu1 %v4755_v42 }
 0x68c   : > { %v4634_v28 = vadd.f32 %v4633_v19, %v8349_v30  ;;  %v4635_v53 = vpop.f32.mrb[243].mxu0  ;;  %5017 = vmatmul.mubr.bf16.gmra.mrb[172].mxu1 %v4754_v21  ;;  %v4716_v50 = vmax.f32 %v4630_v18, 0.0 }
 0x68d   : > { %v4636_v41 = vadd.f32 %v4635_v53, %v8351_v13  ;;  %v4717_v5 = vmax.f32 %v4632_v57, 0.0 }
 0x68e   : > { %v4718_v49 = vmax.f32 %v4634_v28, 0.0 }
 0x68f   : > { %v4719_v10 = vmax.f32 %v4636_v41, 0.0 }
 0x690   : > { %v4756_v56 = vpack.c.bf16 %v4718_v49, %v4716_v50 }
 0x691   : > { %v4757_v46 = vpack.c.bf16 %v4719_v10, %v4717_v5  ;;  %v4639_v15 = vpop.f32.mrb[244].mxu0 }
 0x692   : > { %v4640_v24 = vadd.f32 %v4639_v15, %v8349_v30  ;;  %v4641_v44 = vpop.f32.mrb[245].mxu0 }
 0x693   : > { %v4642_v8 = vadd.f32 %v4641_v44, %v8351_v13  ;;  %v4643_v43 = vpop.f32.mrb[246].mxu0  ;;  %5024 = vmatprep.mubr.bf16.mxu1 %v4757_v46 }
 0x694   : > { %v4644_v11 = vadd.f32 %v4643_v43, %v8349_v30  ;;  %v4645_v34 = vpop.f32.mrb[247].mxu0  ;;  %5025 = vmatmul.mubr.bf16.gmra.mrb[176].mxu1 %v4756_v56  ;;  %v4720_v17 = vmax.f32 %v4640_v24, 0.0 }
 0x695   : > { %v4646_v26 = vadd.f32 %v4645_v34, %v8351_v13  ;;  %v4721_v63 = vmax.f32 %v4642_v8, 0.0 }
 0x696   : > { %v4722_v37 = vmax.f32 %v4644_v11, 0.0 }
 0x697   : > { %v4723_v6 = vmax.f32 %v4646_v26, 0.0 }
 0x698   : > { %v4758_v2 = vpack.c.bf16 %v4722_v37, %v4720_v17 }
 0x699   : > { %v4759_v16 = vpack.c.bf16 %v4723_v6, %v4721_v63  ;;  %v4649_v38 = vpop.f32.mrb[248].mxu0 }
 0x69a   : > { %v4650_v25 = vadd.f32 %v4649_v38, %v8349_v30  ;;  %v4651_v12 = vpop.f32.mrb[249].mxu0 }
 0x69b   : > { %v4652_v52 = vadd.f32 %v4651_v12, %v8351_v13  ;;  %v4653_v54 = vpop.f32.mrb[250].mxu0  ;;  %5032 = vmatprep.mubr.bf16.mxu1 %v4759_v16 }
 0x69c   : > { %v4654_v9 = vadd.f32 %v4653_v54, %v8349_v30  ;;  %v4655_v29 = vpop.f32.mrb[251].mxu0  ;;  %5033 = vmatmul.mubr.bf16.gmra.mrb[180].mxu1 %v4758_v2  ;;  %v4724_v51 = vmax.f32 %v4650_v25, 0.0 }
 0x69d   : > { %v4656_v39 = vadd.f32 %v4655_v29, %v8351_v13  ;;  %v4725_v7 = vmax.f32 %v4652_v52, 0.0 }
 0x69e   : > { %v4726_v45 = vmax.f32 %v4654_v9, 0.0 }
 0x69f   : > { %v4727_v61 = vmax.f32 %v4656_v39, 0.0 }
 0x6a0   : > { %v4760_v33 = vpack.c.bf16 %v4726_v45, %v4724_v51 }
 0x6a1   : > { %v4761_v47 = vpack.c.bf16 %v4727_v61, %v4725_v7  ;;  %v4659_v4 = vpop.f32.mrb[252].mxu0 }
 0x6a2   : > { %v4660_v3 = vadd.f32 %v4659_v4, %v8349_v30  ;;  %v4661_v62 = vpop.f32.mrb[253].mxu0 }
 0x6a3   : > { %v4662_v22 = vadd.f32 %v4661_v62, %v8351_v13  ;;  %v4663_v14 = vpop.f32.mrb[254].mxu0  ;;  %5040 = vmatprep.mubr.bf16.mxu1 %v4761_v47 }
 0x6a4   : > { %v4664_v59 = vadd.f32 %v4663_v14, %v8349_v30  ;;  %v4665_v60 = vpop.f32.mrb[255].mxu0  ;;  %5041 = vmatmul.mubr.bf16.gmra.mrb[184].mxu1 %v4760_v33  ;;  %v4728_v35 = vmax.f32 %v4660_v3, 0.0  ;;  %v8422_v30 = vrot.slane %v8346_v1, %v4798_v36 }
 0x6a5   : > { %v4666_v20 = vadd.f32 %v4665_v60, %v8351_v13  ;;  %v4729_v55 = vmax.f32 %v4662_v22, 0.0 }
 0x6a6   : > { %v4730_v58 = vmax.f32 %v4664_v59, 0.0 }
 0x6a7   : > { %v4731_v27 = vmax.f32 %v4666_v20, 0.0 }
 0x6a8   : > { %v4762_v31 = vpack.c.bf16 %v4730_v58, %v4728_v35 }
 0x6a9   : > { %v4763_v23 = vpack.c.bf16 %v4731_v27, %v4729_v55 }
 0x6ab   : > { %5048 = vmatprep.mubr.bf16.mxu1 %v4763_v23 }
 0x6ac   : > { %5049 = vmatmul.mubr.bf16.gmra.mrb[188].mxu1 %v4762_v31 }
 0x707   : > { %v5515_v48 = vpop.f32.mrb[128].mxu1 }
 0x708   : > { %v5516_v21 = vpop.f32.mrb[129].mxu1 }
 0x709   : > { %v5517_v42 = vadd.f32 %v5516_v21, %v5515_v48  ;;  %v5518_v13 = vpop.f32.mrb[130].mxu1 }
 0x70a   : > { %v5519_v32 = vpop.f32.mrb[131].mxu1 }
 0x70b   : > { %v4931_v18 = vadd.f32 %v5517_v42, %v8422_v30  ;;  %v5520_v0 = vadd.f32 %v5519_v32, %v5518_v13 }
 0x70d   : > { %5057 = vst [vmem:[%s8425_s22] sm:$0xff] %v4931_v18  ;;  %v4934_v40 = vadd.f32 %v5520_v0, %v8422_v30 }
 0x70f   : > { %5058 = vst [vmem:[%s8425_s22 + $0x8] sm:$0xff] %v4934_v40  ;;  %v5521_v57 = vpop.f32.mrb[132].mxu1 }
 0x710   : > { %v5522_v1 = vpop.f32.mrb[133].mxu1 }
 0x711   : > { %v5523_v19 = vadd.f32 %v5522_v1, %v5521_v57  ;;  %v5524_v28 = vpop.f32.mrb[134].mxu1 }
 0x712   : > { %v5525_v53 = vpop.f32.mrb[135].mxu1 }
 0x713   : > { %v4939_v41 = vadd.f32 %v5523_v19, %v8422_v30  ;;  %v5526_v50 = vadd.f32 %v5525_v53, %v5524_v28 }
 0x715   : > { %5059 = vst [vmem:[%s8425_s22 + $0x10] sm:$0xff] %v4939_v41  ;;  %v4942_v49 = vadd.f32 %v5526_v50, %v8422_v30 }
 0x717   : > { %5060 = vst [vmem:[%s8425_s22 + $0x18] sm:$0xff] %v4942_v49  ;;  %v5527_v5 = vpop.f32.mrb[136].mxu1 }
 0x718   : > { %v5528_v10 = vpop.f32.mrb[137].mxu1 }
 0x719   : > { %v5529_v56 = vadd.f32 %v5528_v10, %v5527_v5  ;;  %v5530_v46 = vpop.f32.mrb[138].mxu1 }
 0x71a   : > { %v5531_v15 = vpop.f32.mrb[139].mxu1 }
 0x71b   : > { %v4947_v24 = vadd.f32 %v5529_v56, %v8422_v30  ;;  %v5532_v44 = vadd.f32 %v5531_v15, %v5530_v46 }
 0x71d   : > { %5061 = vst [vmem:[%s8425_s22 + $0x20] sm:$0xff] %v4947_v24  ;;  %v4950_v8 = vadd.f32 %v5532_v44, %v8422_v30 }
 0x71f   : > { %5062 = vst [vmem:[%s8425_s22 + $0x28] sm:$0xff] %v4950_v8  ;;  %v5533_v43 = vpop.f32.mrb[140].mxu1 }
 0x720   : > { %v5534_v11 = vpop.f32.mrb[141].mxu1 }
 0x721   : > { %v5535_v34 = vadd.f32 %v5534_v11, %v5533_v43  ;;  %v5536_v26 = vpop.f32.mrb[142].mxu1 }
 0x722   : > { %v5537_v17 = vpop.f32.mrb[143].mxu1 }
 0x723   : > { %v4955_v37 = vadd.f32 %v5535_v34, %v8422_v30  ;;  %v5538_v63 = vadd.f32 %v5537_v17, %v5536_v26 }
 0x725   : > { %5063 = vst [vmem:[%s8425_s22 + $0x30] sm:$0xff] %v4955_v37  ;;  %v4958_v6 = vadd.f32 %v5538_v63, %v8422_v30 }
 0x727   : > { %5064 = vst [vmem:[%s8425_s22 + $0x38] sm:$0xff] %v4958_v6  ;;  %v5539_v2 = vpop.f32.mrb[144].mxu1 }
 0x728   : > { %v5540_v16 = vpop.f32.mrb[145].mxu1 }
 0x729   : > { %v5541_v38 = vadd.f32 %v5540_v16, %v5539_v2  ;;  %v5542_v25 = vpop.f32.mrb[146].mxu1 }
 0x72a   : > { %v5543_v12 = vpop.f32.mrb[147].mxu1 }
 0x72b   : > { %v4963_v52 = vadd.f32 %v5541_v38, %v8422_v30  ;;  %v5544_v54 = vadd.f32 %v5543_v12, %v5542_v25 }
 0x72d   : > { %5065 = vst [vmem:[%s8425_s22 + $0x40] sm:$0xff] %v4963_v52  ;;  %v4966_v9 = vadd.f32 %v5544_v54, %v8422_v30 }
 0x72f   : > { %5066 = vst [vmem:[%s8425_s22 + $0x48] sm:$0xff] %v4966_v9  ;;  %v5545_v29 = vpop.f32.mrb[148].mxu1 }
 0x730   : > { %v5546_v39 = vpop.f32.mrb[149].mxu1 }
 0x731   : > { %v5547_v51 = vadd.f32 %v5546_v39, %v5545_v29  ;;  %v5548_v45 = vpop.f32.mrb[150].mxu1 }
 0x732   : > { %v5549_v7 = vpop.f32.mrb[151].mxu1 }
 0x733   : > { %v4971_v61 = vadd.f32 %v5547_v51, %v8422_v30  ;;  %v5550_v33 = vadd.f32 %v5549_v7, %v5548_v45 }
 0x735   : > { %5067 = vst [vmem:[%s8425_s22 + $0x50] sm:$0xff] %v4971_v61  ;;  %v4974_v47 = vadd.f32 %v5550_v33, %v8422_v30 }
 0x737   : > { %5068 = vst [vmem:[%s8425_s22 + $0x58] sm:$0xff] %v4974_v47  ;;  %v5551_v4 = vpop.f32.mrb[152].mxu1 }
 0x738   : > { %v5552_v3 = vpop.f32.mrb[153].mxu1 }
 0x739   : > { %v5553_v62 = vadd.f32 %v5552_v3, %v5551_v4  ;;  %v5554_v22 = vpop.f32.mrb[154].mxu1 }
 0x73a   : > { %v5555_v14 = vpop.f32.mrb[155].mxu1 }
 0x73b   : > { %v4979_v59 = vadd.f32 %v5553_v62, %v8422_v30  ;;  %v5556_v60 = vadd.f32 %v5555_v14, %v5554_v22 }
 0x73d   : > { %5069 = vst [vmem:[%s8425_s22 + $0x60] sm:$0xff] %v4979_v59  ;;  %v4982_v20 = vadd.f32 %v5556_v60, %v8422_v30 }
 0x73f   : > { %5070 = vst [vmem:[%s8425_s22 + $0x68] sm:$0xff] %v4982_v20  ;;  %v5557_v35 = vpop.f32.mrb[156].mxu1 }
 0x740   : > { %v5558_v58 = vpop.f32.mrb[157].mxu1 }
 0x741   : > { %v5559_v55 = vadd.f32 %v5558_v58, %v5557_v35  ;;  %v5560_v27 = vpop.f32.mrb[158].mxu1 }
 0x742   : > { %v5561_v31 = vpop.f32.mrb[159].mxu1 }
 0x743   : > { %v4987_v23 = vadd.f32 %v5559_v55, %v8422_v30  ;;  %v5562_v36 = vadd.f32 %v5561_v31, %v5560_v27 }
 0x745   : > { %5071 = vst [vmem:[%s8425_s22 + $0x70] sm:$0xff] %v4987_v23  ;;  %v4990_v48 = vadd.f32 %v5562_v36, %v8422_v30 }
 0x747   : > { %5072 = vst [vmem:[%s8425_s22 + $0x78] sm:$0xff] %v4990_v48  ;;  %v5563_v21 = vpop.f32.mrb[160].mxu1 }
 0x748   : > { %v5564_v42 = vpop.f32.mrb[161].mxu1 }
 0x749   : > { %v5565_v13 = vadd.f32 %v5564_v42, %v5563_v21  ;;  %v5566_v32 = vpop.f32.mrb[162].mxu1 }
 0x74a   : > { %v5567_v18 = vpop.f32.mrb[163].mxu1 }
 0x74b   : > { %v4995_v0 = vadd.f32 %v5565_v13, %v8422_v30  ;;  %v5568_v40 = vadd.f32 %v5567_v18, %v5566_v32 }
 0x74d   : > { %5073 = vst [vmem:[%s8425_s22 + $0x80] sm:$0xff] %v4995_v0  ;;  %v4998_v57 = vadd.f32 %v5568_v40, %v8422_v30 }
 0x74f   : > { %5074 = vst [vmem:[%s8425_s22 + $0x88] sm:$0xff] %v4998_v57  ;;  %v5569_v1 = vpop.f32.mrb[164].mxu1 }
 0x750   : > { %v5570_v19 = vpop.f32.mrb[165].mxu1 }
 0x751   : > { %v5571_v28 = vadd.f32 %v5570_v19, %v5569_v1  ;;  %v5572_v53 = vpop.f32.mrb[166].mxu1 }
 0x752   : > { %v5573_v41 = vpop.f32.mrb[167].mxu1 }
 0x753   : > { %v5003_v50 = vadd.f32 %v5571_v28, %v8422_v30  ;;  %v5574_v49 = vadd.f32 %v5573_v41, %v5572_v53 }
 0x755   : > { %5075 = vst [vmem:[%s8425_s22 + $0x90] sm:$0xff] %v5003_v50  ;;  %v5006_v5 = vadd.f32 %v5574_v49, %v8422_v30 }
 0x757   : > { %5076 = vst [vmem:[%s8425_s22 + $0x98] sm:$0xff] %v5006_v5  ;;  %v5575_v10 = vpop.f32.mrb[168].mxu1 }
 0x758   : > { %v5576_v56 = vpop.f32.mrb[169].mxu1 }
 0x759   : > { %v5577_v46 = vadd.f32 %v5576_v56, %v5575_v10  ;;  %v5578_v15 = vpop.f32.mrb[170].mxu1 }
 0x75a   : > { %v5579_v24 = vpop.f32.mrb[171].mxu1 }
 0x75b   : > { %v5011_v44 = vadd.f32 %v5577_v46, %v8422_v30  ;;  %v5580_v8 = vadd.f32 %v5579_v24, %v5578_v15 }
 0x75d   : > { %5077 = vst [vmem:[%s8425_s22 + $0xa0] sm:$0xff] %v5011_v44  ;;  %v5014_v43 = vadd.f32 %v5580_v8, %v8422_v30 }
 0x75f   : > { %5078 = vst [vmem:[%s8425_s22 + $0xa8] sm:$0xff] %v5014_v43  ;;  %v5581_v11 = vpop.f32.mrb[172].mxu1 }
 0x760   : > { %v5582_v34 = vpop.f32.mrb[173].mxu1 }
 0x761   : > { %v5583_v26 = vadd.f32 %v5582_v34, %v5581_v11  ;;  %v5584_v17 = vpop.f32.mrb[174].mxu1 }
 0x762   : > { %v5585_v37 = vpop.f32.mrb[175].mxu1 }
 0x763   : > { %v5019_v63 = vadd.f32 %v5583_v26, %v8422_v30  ;;  %v5586_v6 = vadd.f32 %v5585_v37, %v5584_v17 }
 0x765   : > { %5079 = vst [vmem:[%s8425_s22 + $0xb0] sm:$0xff] %v5019_v63  ;;  %v5022_v2 = vadd.f32 %v5586_v6, %v8422_v30 }
 0x767   : > { %5080 = vst [vmem:[%s8425_s22 + $0xb8] sm:$0xff] %v5022_v2  ;;  %v5587_v16 = vpop.f32.mrb[176].mxu1 }
 0x768   : > { %v5588_v38 = vpop.f32.mrb[177].mxu1 }
 0x769   : > { %v5589_v25 = vadd.f32 %v5588_v38, %v5587_v16  ;;  %v5590_v12 = vpop.f32.mrb[178].mxu1 }
 0x76a   : > { %v5591_v52 = vpop.f32.mrb[179].mxu1 }
 0x76b   : > { %v5027_v54 = vadd.f32 %v5589_v25, %v8422_v30  ;;  %v5592_v9 = vadd.f32 %v5591_v52, %v5590_v12 }
 0x76d   : > { %5081 = vst [vmem:[%s8425_s22 + $0xc0] sm:$0xff] %v5027_v54  ;;  %v5030_v29 = vadd.f32 %v5592_v9, %v8422_v30 }
 0x76f   : > { %5082 = vst [vmem:[%s8425_s22 + $0xc8] sm:$0xff] %v5030_v29  ;;  %v5593_v39 = vpop.f32.mrb[180].mxu1 }
 0x770   : > { %v5594_v51 = vpop.f32.mrb[181].mxu1 }
 0x771   : > { %v5595_v45 = vadd.f32 %v5594_v51, %v5593_v39  ;;  %v5596_v7 = vpop.f32.mrb[182].mxu1 }
 0x772   : > { %v5597_v61 = vpop.f32.mrb[183].mxu1 }
 0x773   : > { %v5035_v33 = vadd.f32 %v5595_v45, %v8422_v30  ;;  %v5598_v47 = vadd.f32 %v5597_v61, %v5596_v7 }
 0x775   : > { %5083 = vst [vmem:[%s8425_s22 + $0xd0] sm:$0xff] %v5035_v33  ;;  %v5038_v4 = vadd.f32 %v5598_v47, %v8422_v30 }
 0x777   : > { %5084 = vst [vmem:[%s8425_s22 + $0xd8] sm:$0xff] %v5038_v4  ;;  %v5599_v3 = vpop.f32.mrb[184].mxu1 }
 0x778   : > { %v5600_v62 = vpop.f32.mrb[185].mxu1 }
 0x779   : > { %v5601_v22 = vadd.f32 %v5600_v62, %v5599_v3  ;;  %v5602_v14 = vpop.f32.mrb[186].mxu1 }
 0x77a   : > { %v5603_v59 = vpop.f32.mrb[187].mxu1 }
 0x77b   : > { %v5043_v60 = vadd.f32 %v5601_v22, %v8422_v30  ;;  %v5604_v20 = vadd.f32 %v5603_v59, %v5602_v14 }
 0x77d   : > { %5085 = vst [vmem:[%s8425_s22 + $0xe0] sm:$0xff] %v5043_v60  ;;  %v5046_v35 = vadd.f32 %v5604_v20, %v8422_v30 }
 0x77f   : > { %5086 = vst [vmem:[%s8425_s22 + $0xe8] sm:$0xff] %v5046_v35  ;;  %v5605_v58 = vpop.f32.mrb[188].mxu1 }
 0x780   : > { %v5606_v55 = vpop.f32.mrb[189].mxu1 }
 0x781   : > { %v5607_v27 = vadd.f32 %v5606_v55, %v5605_v58  ;;  %v5608_v31 = vpop.f32.mrb[190].mxu1 }
 0x782   : > { %v5609_v23 = vpop.f32.mrb[191].mxu1 }
 0x783   : > { %v5051_v36 = vadd.f32 %v5607_v27, %v8422_v30  ;;  %v5610_v48 = vadd.f32 %v5609_v23, %v5608_v31 }
 0x785   : > { %5087 = vst [vmem:[%s8425_s22 + $0xf0] sm:$0xff] %v5051_v36  ;;  %v5054_v21 = vadd.f32 %v5610_v48, %v8422_v30 }
 0x787   : > { %5088 = vst [vmem:[%s8425_s22 + $0xf8] sm:$0xff] %v5054_v21 }
 0x788   : > { %6385 = shalt.err (!%p6382_p2)
}
 0x789   : > { %s6386_s4 = scalar_lea.hbm %s8492_s30, 4096  ;;  %s6390_s14 = scalar_lea.hbm %s8788_s28, 8192 }
 0x78a   : > { %p6387_p3 = scmp.ne.s32.totalorder %s8492_s30, %s6386_s4  ;;  %p6391_p7 = scmp.lt.u32.totalorder %s8492_s30, %s8788_s28 }
 0x78b   : > { %p6392_p8 = scmp.lt.u32.totalorder %s6390_s14, %s6386_s4  ;;  %p6394_p13 = scmp.lt.u32.totalorder %s6386_s4, %s8492_s30 }
 0x78c   : > { %p6388_p4 = pnand %p6387_p3, %p8789_p1 }
 0x78d   : > { %p6393_p11 = por %p6392_p8, %p6391_p7 }
 0x78e   : > { %p6389_p12 = pneg %p6388_p4 }
 0x78f   : > { %p6395_p6 = por %p6394_p13, %p6393_p11 }
 0x791   : > { %p6396_p9 = pnand %p6395_p6, %p6389_p12 }
 0x793   : > { %6399 = shalt.err (!%p6396_p9)
}
 0x794   : > { %s6466_s29 = smov 128   ;;  %s6467_s15 = smov 8  }
 0x795   : > { %5703 = dma.vmem_to_hbm [thread:$0]  (%p8789_p1), %s8494_s11, 4096, %s8492_s30, %s8501_s21, %s6466_s29, %s6466_s29, %s6467_s15  }
 0x796 PF: > { %s8790_s22 = sld [smem:[#allocation22_spill]]  ;;  %s8791_s6 = sld [smem:[#allocation20_spill]] }
 0x797   : > { %s8792_s17 = sld [smem:[#allocation25_spill]] }
 0x79c   : > { %p5745_p5 = scmp.ge.s32.totalorder %s8790_s22, 2  ;;  %s5118_s20 = sand.u32 1, %s8791_s6  }
 0x79d   : > { %p8793_p10 = scmp.ne.s32.totalorder %s8792_s17, 0  ;;  %s5119_s16 = scalar_lea.sflag [#allocation4], %s5118_s20 }
 0x79f   : > { %p5728_p0 = pnand %p5745_p5, %p8793_p10 }
 0x7a1   : > { %6433 = dma.done.wait (!%p5728_p0), %s5119_s16, 4096  }
 0x7a2   : > { %6435 = vsyncadd (!%p5728_p0), %s5119_s16, 4294963200  ;;  %s8794_s20 = sld [smem:[#allocation23_spill]]  ;;  %s8795_s24 = sld [smem:[#allocation21_spill]] }
 0x7a3   : > { %s8796_s19 = sld [smem:[#allocation24_spill]]  ;;  %s8797_s17 = smov %s6442_s18 }
 0x7a8   : > { %p25_p2 = scmp.ge.s32.totalorder %s8794_s20, 4   ;;  %s8798_s18 = smov %s8795_s24 }
 0x7aa   :  { %27 = sbr.rel (!%p25_p2) target bundleno = 11 (0xb), region = 131 }
 0x7b1   :  { %5124 = vsyncpa [#allocation3], 1 }
 0x7b2   :  { %5126 = vsyncpa [#allocation3 + $0x1], 1 }
 0x7b3   :  { %5127 = vsyncpa [#allocation6], 1 }
 0x7b4   :  { %5128 = vsyncpa [#allocation9], 1 }
 0x7b5   :  { %5129 = vsyncpa [#allocation12], 1 }
 0x7b6   :  { %5130 = vsyncpa [#allocation4], 1 }
 0x7b7   :  { %5132 = vsyncpa [#allocation4 + $0x1], 1 }

</bundles_post_ra>
